<compile_context>
chip_gen: v6e
topology: v6e:2x2x1
jax: 0.10.0
libtpu: 0.0.40
codegen_flags: <defaults>
</compile_context>

<pallas_src>
import functools

import jax
import jax.numpy as jnp
from jax.experimental import pallas as pl
from jax.experimental.pallas import tpu as pltpu


# --------------------------------------------------------------------------- #
# Pallas kernel: whole iAFF forward for one batch element.
# --------------------------------------------------------------------------- #
def _iaff_kernel(x_ref, r_ref, w1_ref, b1_ref, w2_ref, b2_ref, o_ref, *,
                 hw_true, inv_hw):
    x = x_ref[0].astype(jnp.float32)            # (C, HWp)
    res = r_ref[0].astype(jnp.float32)          # (C, HWp)
    xa = x + res                                # padded lanes stay exactly zero
    _, hwp = xa.shape

    hi = jax.lax.Precision.HIGHEST

    # Additive -inf mask for max-pool, built once and reused by both stages.
    if hw_true != hwp:
        lane = jax.lax.broadcasted_iota(jnp.int32, (1, hwp), 1)
        pad_neg = jnp.where(lane < hw_true, 0.0, -jnp.inf).astype(jnp.float32)
    else:
        pad_neg = None

    def conv1(i, t):                            # (inter, C) @ (C, P) + bias
        w = w1_ref[i].astype(jnp.float32)
        b = b1_ref[i].astype(jnp.float32)
        return jnp.dot(w, t, precision=hi, preferred_element_type=jnp.float32) + b

    def conv2(i, t):                            # (C, inter) @ (inter, P) + bias
        w = w2_ref[i].astype(jnp.float32)
        b = b2_ref[i].astype(jnp.float32)
        return jnp.dot(w, t, precision=hi, preferred_element_type=jnp.float32) + b

    def mlp(i, t):                              # 1x1 conv -> ReLU -> 1x1 conv (BN folded)
        return conv2(i, jnp.maximum(conv1(i, t), 0.0))

    def sigmoid(z):                             # one EUP transcendental per element
        return 0.5 * jnp.tanh(0.5 * z) + 0.5

    def attention(t, local_idx, max_idx):
        # t: (C, HWp) with exact zeros in padded lanes.
        xl = mlp(local_idx, t)                                   # local branch (plane)
        avg = jnp.sum(t, axis=-1, keepdims=True) * inv_hw        # (C, 1) avg-pool
        xg = mlp(1, avg)                                         # global_att (shared)
        tm = t if pad_neg is None else t + pad_neg
        mx = jnp.max(tm, axis=-1, keepdims=True)                 # (C, 1) max-pool
        xg1 = mlp(max_idx, mx)                                   # global max branch (no BN)
        # combine the two (C,1) columns first -> a single full-plane broadcast add
        return sigmoid(xl + (xg + xg1))

    wei = attention(xa, 0, 2)          # stage 1: local_att / global_att / global_att_1
    xi = xa * wei                      # == x*wei + residual*wei
    wei2 = attention(xi, 3, 4)         # stage 2: local_att2 / global_att / global_att_2
    o_ref[0] = (xa * wei2).astype(o_ref.dtype)


# --------------------------------------------------------------------------- #
# Host wrapper: fold eval-mode BN into the 1x1 convs, pad H*W lane-dense, call kernel.
# --------------------------------------------------------------------------- #
def iaff(x, residual, params, *, bn_eps=1e-5):
    b, c, h, w = x.shape
    hw = h * w
    hwp = ((hw + 127) // 128) * 128            # lane-dense spatial extent
    inter = params["local_att"]["w1"].shape[0]

    def fold(wt, bias, bn):
        g, beta, m, v = bn
        s = g / jnp.sqrt(v + bn_eps)
        return wt * s[:, None], s * (bias - m) + beta

    def fold_branch(p, has_bn):
        if has_bn:
            w1, b1 = fold(p["w1"], p["b1"], p["bn1"])
            w2, b2 = fold(p["w2"], p["b2"], p["bn2"])
            return w1, b1, w2, b2
        return p["w1"], p["b1"], p["w2"], p["b2"]

    # Branch order used by the kernel:
    #   0: local_att, 1: global_att (avg, shared by both stages), 2: global_att_1 (max),
    #   3: local_att2, 4: global_att_2 (max).   (global_att2 is unused by forward().)
    branches = [
        fold_branch(params["local_att"], True),
        fold_branch(params["global_att"], True),
        fold_branch(params["global_att_1"], False),
        fold_branch(params["local_att2"], True),
        fold_branch(params["global_att_2"], False),
    ]
    w1_all = jnp.stack([br[0] for br in branches]).astype(jnp.float32)              # (5, inter, C)
    b1_all = jnp.stack([br[1] for br in branches]).astype(jnp.float32)[:, :, None]  # (5, inter, 1)
    w2_all = jnp.stack([br[2] for br in branches]).astype(jnp.float32)              # (5, C, inter)
    b2_all = jnp.stack([br[3] for br in branches]).astype(jnp.float32)[:, :, None]  # (5, C, 1)

    x3 = x.reshape(b, c, hw)
    r3 = residual.reshape(b, c, hw)
    if hwp != hw:
        pad = ((0, 0), (0, 0), (0, hwp - hw))
        x3 = jnp.pad(x3, pad)
        r3 = jnp.pad(r3, pad)

    # Scoped VMEM: double-buffered x/residual/out planes + f32 plane temporaries in the
    # body + parameters.  Clamp to [32 MiB, 48 MiB] (safe on v5e/v6e/v7x).
    itemsize = jnp.dtype(x.dtype).itemsize
    plane_bytes = c * hwp * itemsize
    param_bytes = 4 * (w1_all.size + b1_all.size + w2_all.size + b2_all.size)
    est = 2 * 3 * plane_bytes + 8 * c * hwp * 4 + 2 * param_bytes
    vmem_limit = int(min(max(2 * est, 32 * 1024 * 1024), 48 * 1024 * 1024))

    out3 = pl.pallas_call(
        functools.partial(_iaff_kernel, hw_true=hw, inv_hw=1.0 / hw),
        out_shape=jax.ShapeDtypeStruct((b, c, hwp), x.dtype),
        grid_spec=pltpu.PrefetchScalarGridSpec(
            num_scalar_prefetch=0,
            grid=(b,),
            in_specs=[
                pl.BlockSpec((1, c, hwp), lambda i: (i, 0, 0)),       # x plane
                pl.BlockSpec((1, c, hwp), lambda i: (i, 0, 0)),       # residual plane
                pl.BlockSpec((5, inter, c), lambda i: (0, 0, 0)),     # conv-1 weights (resident)
                pl.BlockSpec((5, inter, 1), lambda i: (0, 0, 0)),     # conv-1 biases
                pl.BlockSpec((5, c, inter), lambda i: (0, 0, 0)),     # conv-2 weights (resident)
                pl.BlockSpec((5, c, 1), lambda i: (0, 0, 0)),         # conv-2 biases
            ],
            out_specs=pl.BlockSpec((1, c, hwp), lambda i: (i, 0, 0)),
        ),
        compiler_params=pltpu.CompilerParams(
            dimension_semantics=("parallel",),
            vmem_limit_bytes=vmem_limit),
    )(x3, r3, w1_all, b1_all, w2_all, b2_all)

    if hwp != hw:
        out3 = out3[:, :, :hw]
    return out3.reshape(b, c, h, w)


# --------------------------------------------------------------------------- #
# Pure-JAX reference mirroring the PyTorch module (eval-mode BN), unfused.
# --------------------------------------------------------------------------- #
def iaff_reference(x, residual, params, *, bn_eps=1e-5):
    hi = jax.lax.Precision.HIGHEST

    def conv1x1(t, wt, bias):
        return jnp.einsum("oc,bchw->bohw", wt, t, precision=hi) + bias[None, :, None, None]

    def bn(t, stats):
        g, beta, m, v = stats
        s = g / jnp.sqrt(v + bn_eps)
        return (t - m[None, :, None, None]) * s[None, :, None, None] + beta[None, :, None, None]

    def local(t, p):
        h = jnp.maximum(bn(conv1x1(t, p["w1"], p["b1"]), p["bn1"]), 0.0)
        return bn(conv1x1(h, p["w2"], p["b2"]), p["bn2"])

    def gavg(t, p):
        pooled = jnp.mean(t, axis=(2, 3), keepdims=True)
        h = jnp.maximum(bn(conv1x1(pooled, p["w1"], p["b1"]), p["bn1"]), 0.0)
        return bn(conv1x1(h, p["w2"], p["b2"]), p["bn2"])

    def gmax(t, p):
        pooled = jnp.max(t, axis=(2, 3), keepdims=True)
        h = jnp.maximum(conv1x1(pooled, p["w1"], p["b1"]), 0.0)
        return conv1x1(h, p["w2"], p["b2"])

    xa = x + residual
    xl = local(xa, params["local_att"])
    xg = gavg(xa, params["global_att"])
    xg1 = gmax(xa, params["global_att_1"])
    wei = jax.nn.sigmoid(xl + xg + xg1)
    xi = x * wei + residual * wei
    xl2 = local(xi, params["local_att2"])
    xg2 = gavg(xi, params["global_att"])          # reuses global_att, as in PyTorch forward()
    xg3 = gmax(xi, params["global_att_2"])
    wei2 = jax.nn.sigmoid(xl2 + xg2 + xg3)
    return x * wei2 + residual * wei2


# --------------------------------------------------------------------------- #
# Deterministic parameter construction (eval-mode BN with nontrivial stats).
# --------------------------------------------------------------------------- #
def make_params(key, channels=64, r=4):
    inter = channels // r
    ks = iter(jax.random.split(key, 64))

    def conv(o, i):
        wt = jax.random.normal(next(ks), (o, i), jnp.float32) * (i ** -0.5)
        bias = 0.05 * jax.random.normal(next(ks), (o,), jnp.float32)
        return wt, bias

    def bn_stats(o):
        g = 1.0 + 0.1 * jax.random.normal(next(ks), (o,), jnp.float32)
        beta = 0.1 * jax.random.normal(next(ks), (o,), jnp.float32)
        m = 0.1 * jax.random.normal(next(ks), (o,), jnp.float32)
        v = jax.random.uniform(next(ks), (o,), jnp.float32, minval=0.5, maxval=1.5)
        return (g, beta, m, v)

    def branch_bn():
        w1, b1 = conv(inter, channels)
        bn1 = bn_stats(inter)
        w2, b2 = conv(channels, inter)
        bn2 = bn_stats(channels)
        return dict(w1=w1, b1=b1, bn1=bn1, w2=w2, b2=b2, bn2=bn2)

    def branch_nobn():
        w1, b1 = conv(inter, channels)
        w2, b2 = conv(channels, inter)
        return dict(w1=w1, b1=b1, w2=w2, b2=b2)

    # global_att2 exists in the PyTorch module but is never used by forward(); omitted.
    return dict(local_att=branch_bn(), global_att=branch_bn(), global_att_1=branch_nobn(),
                local_att2=branch_bn(), global_att_2=branch_nobn())


if __name__ == "__main__":
    key = jax.random.PRNGKey(0)
    kx, kr, kp = jax.random.split(key, 3)

    B, C, H, W = 2, 64, 16, 16        # channels=64, r=4 as in the module defaults
    x = jax.random.normal(kx, (B, C, H, W), dtype=jnp.float32)
    residual = jax.random.normal(kr, (B, C, H, W), dtype=jnp.float32)
    params = make_params(kp, channels=C, r=4)

    out = iaff(x, residual, params)
    out = jax.block_until_ready(out)

    ref = iaff_reference(x, residual, params)
    assert out.shape == x.shape and out.dtype == x.dtype
    max_err = jnp.max(jnp.abs(out - ref))
    assert jnp.allclose(out, ref, atol=1e-4, rtol=1e-4), f"mismatch vs reference, max_err={max_err}"

    print("KERNEL_OK")
</pallas_src>

<mosaic_0001>
module attributes {stable_mosaic.version = 11 : i64} {
  func.func @_iaff_kernel(%arg0: i32, %arg1: memref<1x64x256xf32, #tpu.memory_space<vmem>>, %arg2: memref<1x64x256xf32, #tpu.memory_space<vmem>>, %arg3: memref<5x16x64xf32, #tpu.memory_space<vmem>>, %arg4: memref<5x16x1xf32, #tpu.memory_space<vmem>>, %arg5: memref<5x64x16xf32, #tpu.memory_space<vmem>>, %arg6: memref<5x64x1xf32, #tpu.memory_space<vmem>>, %arg7: memref<1x64x256xf32, #tpu.memory_space<vmem>>) attributes {dimension_semantics = [#tpu.dimension_semantics<parallel>], iteration_bounds = array<i64: 2>, scalar_prefetch = 0 : i64, scratch_operands = 0 : i64, tpu.core_type = #tpu.core_type<tc>, window_params = [{transform_indices = @transform_0, window_bounds = array<i64: 1, 64, 256>}, {transform_indices = @transform_1, window_bounds = array<i64: 1, 64, 256>}, {pipeline_mode = #tpu.pipeline_mode<synchronous>, transform_indices = @transform_2, window_bounds = array<i64: 5, 16, 64>}, {pipeline_mode = #tpu.pipeline_mode<synchronous>, transform_indices = @transform_3, window_bounds = array<i64: 5, 16, 1>}, {pipeline_mode = #tpu.pipeline_mode<synchronous>, transform_indices = @transform_4, window_bounds = array<i64: 5, 64, 16>}, {pipeline_mode = #tpu.pipeline_mode<synchronous>, transform_indices = @transform_5, window_bounds = array<i64: 5, 64, 1>}, {transform_indices = @transform_6, window_bounds = array<i64: 1, 64, 256>}]} {
    %c0 = arith.constant 0 : index
    %c0_0 = arith.constant 0 : index
    %c0_1 = arith.constant 0 : index
    %0 = vector.load %arg1[%c0, %c0_0, %c0_1] : memref<1x64x256xf32, #tpu.memory_space<vmem>>, vector<1x64x256xf32>
    %1 = vector.shape_cast %0 : vector<1x64x256xf32> to vector<64x256xf32>
    %c0_2 = arith.constant 0 : index
    %c0_3 = arith.constant 0 : index
    %c0_4 = arith.constant 0 : index
    %2 = vector.load %arg2[%c0_2, %c0_3, %c0_4] : memref<1x64x256xf32, #tpu.memory_space<vmem>>, vector<1x64x256xf32>
    %3 = vector.shape_cast %2 : vector<1x64x256xf32> to vector<64x256xf32>
    %4 = arith.addf %1, %3 : vector<64x256xf32>
    %c0_5 = arith.constant 0 : index
    %c0_6 = arith.constant 0 : index
    %c0_7 = arith.constant 0 : index
    %5 = vector.load %arg3[%c0_5, %c0_6, %c0_7] : memref<5x16x64xf32, #tpu.memory_space<vmem>>, vector<1x16x64xf32>
    %6 = vector.shape_cast %5 : vector<1x16x64xf32> to vector<16x64xf32>
    %c0_8 = arith.constant 0 : index
    %c0_9 = arith.constant 0 : index
    %c0_10 = arith.constant 0 : index
    %7 = vector.load %arg4[%c0_8, %c0_9, %c0_10] : memref<5x16x1xf32, #tpu.memory_space<vmem>>, vector<1x16x1xf32>
    %8 = vector.shape_cast %7 : vector<1x16x1xf32> to vector<16x1xf32>
    %cst = arith.constant dense<0.000000e+00> : vector<16x256xf32>
    %9 = tpu.matmul %6, %4, %cst {dimension_numbers = #tpu.dot_dimension_numbers<[1], [0], [0], [1], [0, 0, 1, 1], [], []>, precision = #tpu.contract_precision<fp32>} : vector<16x64xf32>, vector<64x256xf32>, vector<16x256xf32> -> vector<16x256xf32>
    %10 = vector.broadcast %8 : vector<16x1xf32> to vector<16x256xf32>
    %11 = arith.addf %9, %10 : vector<16x256xf32>
    %cst_11 = arith.constant 0.000000e+00 : f32
    %12 = vector.broadcast %cst_11 : f32 to vector<16x256xf32>
    %13 = arith.maximumf %11, %12 : vector<16x256xf32>
    %c0_12 = arith.constant 0 : index
    %c0_13 = arith.constant 0 : index
    %c0_14 = arith.constant 0 : index
    %14 = vector.load %arg5[%c0_12, %c0_13, %c0_14] : memref<5x64x16xf32, #tpu.memory_space<vmem>>, vector<1x64x16xf32>
    %15 = vector.shape_cast %14 : vector<1x64x16xf32> to vector<64x16xf32>
    %c0_15 = arith.constant 0 : index
    %c0_16 = arith.constant 0 : index
    %c0_17 = arith.constant 0 : index
    %16 = vector.load %arg6[%c0_15, %c0_16, %c0_17] : memref<5x64x1xf32, #tpu.memory_space<vmem>>, vector<1x64x1xf32>
    %17 = vector.shape_cast %16 : vector<1x64x1xf32> to vector<64x1xf32>
    %cst_18 = arith.constant dense<0.000000e+00> : vector<64x256xf32>
    %18 = tpu.matmul %15, %13, %cst_18 {dimension_numbers = #tpu.dot_dimension_numbers<[1], [0], [0], [1], [0, 0, 1, 1], [], []>, precision = #tpu.contract_precision<fp32>} : vector<64x16xf32>, vector<16x256xf32>, vector<64x256xf32> -> vector<64x256xf32>
    %19 = vector.broadcast %17 : vector<64x1xf32> to vector<64x256xf32>
    %20 = arith.addf %18, %19 : vector<64x256xf32>
    %cst_19 = arith.constant dense<0.000000e+00> : vector<64xf32>
    %21 = vector.multi_reduction <add>, %4, %cst_19 [1] : vector<64x256xf32> to vector<64xf32>
    %22 = vector.shape_cast %21 : vector<64xf32> to vector<64x1xf32>
    %cst_20 = arith.constant 3.906250e-03 : f32
    %23 = vector.broadcast %cst_20 : f32 to vector<64x1xf32>
    %24 = arith.mulf %22, %23 : vector<64x1xf32>
    %c1 = arith.constant 1 : index
    %c0_21 = arith.constant 0 : index
    %c0_22 = arith.constant 0 : index
    %25 = vector.load %arg3[%c1, %c0_21, %c0_22] : memref<5x16x64xf32, #tpu.memory_space<vmem>>, vector<1x16x64xf32>
    %26 = vector.shape_cast %25 : vector<1x16x64xf32> to vector<16x64xf32>
    %c1_23 = arith.constant 1 : index
    %c0_24 = arith.constant 0 : index
    %c0_25 = arith.constant 0 : index
    %27 = vector.load %arg4[%c1_23, %c0_24, %c0_25] : memref<5x16x1xf32, #tpu.memory_space<vmem>>, vector<1x16x1xf32>
    %28 = vector.shape_cast %27 : vector<1x16x1xf32> to vector<16x1xf32>
    %cst_26 = arith.constant dense<0.000000e+00> : vector<16x1xf32>
    %29 = tpu.matmul %26, %24, %cst_26 {dimension_numbers = #tpu.dot_dimension_numbers<[1], [0], [0], [1], [0, 0, 1, 1], [], []>, precision = #tpu.contract_precision<fp32>} : vector<16x64xf32>, vector<64x1xf32>, vector<16x1xf32> -> vector<16x1xf32>
    %30 = arith.addf %29, %28 : vector<16x1xf32>
    %cst_27 = arith.constant 0.000000e+00 : f32
    %31 = vector.broadcast %cst_27 : f32 to vector<16x1xf32>
    %32 = arith.maximumf %30, %31 : vector<16x1xf32>
    %c1_28 = arith.constant 1 : index
    %c0_29 = arith.constant 0 : index
    %c0_30 = arith.constant 0 : index
    %33 = vector.load %arg5[%c1_28, %c0_29, %c0_30] : memref<5x64x16xf32, #tpu.memory_space<vmem>>, vector<1x64x16xf32>
    %34 = vector.shape_cast %33 : vector<1x64x16xf32> to vector<64x16xf32>
    %c1_31 = arith.constant 1 : index
    %c0_32 = arith.constant 0 : index
    %c0_33 = arith.constant 0 : index
    %35 = vector.load %arg6[%c1_31, %c0_32, %c0_33] : memref<5x64x1xf32, #tpu.memory_space<vmem>>, vector<1x64x1xf32>
    %36 = vector.shape_cast %35 : vector<1x64x1xf32> to vector<64x1xf32>
    %cst_34 = arith.constant dense<0.000000e+00> : vector<64x1xf32>
    %37 = tpu.matmul %34, %32, %cst_34 {dimension_numbers = #tpu.dot_dimension_numbers<[1], [0], [0], [1], [0, 0, 1, 1], [], []>, precision = #tpu.contract_precision<fp32>} : vector<64x16xf32>, vector<16x1xf32>, vector<64x1xf32> -> vector<64x1xf32>
    %38 = arith.addf %37, %36 : vector<64x1xf32>
    %cst_35 = arith.constant dense<0xFF800000> : vector<64xf32>
    %39 = vector.multi_reduction <maximumf>, %4, %cst_35 [1] : vector<64x256xf32> to vector<64xf32>
    %40 = vector.shape_cast %39 : vector<64xf32> to vector<64x1xf32>
    %c2 = arith.constant 2 : index
    %c0_36 = arith.constant 0 : index
    %c0_37 = arith.constant 0 : index
    %41 = vector.load %arg3[%c2, %c0_36, %c0_37] : memref<5x16x64xf32, #tpu.memory_space<vmem>>, vector<1x16x64xf32>
    %42 = vector.shape_cast %41 : vector<1x16x64xf32> to vector<16x64xf32>
    %c2_38 = arith.constant 2 : index
    %c0_39 = arith.constant 0 : index
    %c0_40 = arith.constant 0 : index
    %43 = vector.load %arg4[%c2_38, %c0_39, %c0_40] : memref<5x16x1xf32, #tpu.memory_space<vmem>>, vector<1x16x1xf32>
    %44 = vector.shape_cast %43 : vector<1x16x1xf32> to vector<16x1xf32>
    %cst_41 = arith.constant dense<0.000000e+00> : vector<16x1xf32>
    %45 = tpu.matmul %42, %40, %cst_41 {dimension_numbers = #tpu.dot_dimension_numbers<[1], [0], [0], [1], [0, 0, 1, 1], [], []>, precision = #tpu.contract_precision<fp32>} : vector<16x64xf32>, vector<64x1xf32>, vector<16x1xf32> -> vector<16x1xf32>
    %46 = arith.addf %45, %44 : vector<16x1xf32>
    %cst_42 = arith.constant 0.000000e+00 : f32
    %47 = vector.broadcast %cst_42 : f32 to vector<16x1xf32>
    %48 = arith.maximumf %46, %47 : vector<16x1xf32>
    %c2_43 = arith.constant 2 : index
    %c0_44 = arith.constant 0 : index
    %c0_45 = arith.constant 0 : index
    %49 = vector.load %arg5[%c2_43, %c0_44, %c0_45] : memref<5x64x16xf32, #tpu.memory_space<vmem>>, vector<1x64x16xf32>
    %50 = vector.shape_cast %49 : vector<1x64x16xf32> to vector<64x16xf32>
    %c2_46 = arith.constant 2 : index
    %c0_47 = arith.constant 0 : index
    %c0_48 = arith.constant 0 : index
    %51 = vector.load %arg6[%c2_46, %c0_47, %c0_48] : memref<5x64x1xf32, #tpu.memory_space<vmem>>, vector<1x64x1xf32>
    %52 = vector.shape_cast %51 : vector<1x64x1xf32> to vector<64x1xf32>
    %cst_49 = arith.constant dense<0.000000e+00> : vector<64x1xf32>
    %53 = tpu.matmul %50, %48, %cst_49 {dimension_numbers = #tpu.dot_dimension_numbers<[1], [0], [0], [1], [0, 0, 1, 1], [], []>, precision = #tpu.contract_precision<fp32>} : vector<64x16xf32>, vector<16x1xf32>, vector<64x1xf32> -> vector<64x1xf32>
    %54 = arith.addf %53, %52 : vector<64x1xf32>
    %55 = arith.addf %38, %54 : vector<64x1xf32>
    %56 = vector.broadcast %55 : vector<64x1xf32> to vector<64x256xf32>
    %57 = arith.addf %20, %56 : vector<64x256xf32>
    %cst_50 = arith.constant 5.000000e-01 : f32
    %58 = vector.broadcast %cst_50 : f32 to vector<64x256xf32>
    %59 = arith.mulf %58, %57 : vector<64x256xf32>
    %60 = math.tanh %59 : vector<64x256xf32>
    %cst_51 = arith.constant 5.000000e-01 : f32
    %61 = vector.broadcast %cst_51 : f32 to vector<64x256xf32>
    %62 = arith.mulf %61, %60 : vector<64x256xf32>
    %cst_52 = arith.constant 5.000000e-01 : f32
    %63 = vector.broadcast %cst_52 : f32 to vector<64x256xf32>
    %64 = arith.addf %62, %63 : vector<64x256xf32>
    %65 = arith.mulf %4, %64 : vector<64x256xf32>
    %c3 = arith.constant 3 : index
    %c0_53 = arith.constant 0 : index
    %c0_54 = arith.constant 0 : index
    %66 = vector.load %arg3[%c3, %c0_53, %c0_54] : memref<5x16x64xf32, #tpu.memory_space<vmem>>, vector<1x16x64xf32>
    %67 = vector.shape_cast %66 : vector<1x16x64xf32> to vector<16x64xf32>
    %c3_55 = arith.constant 3 : index
    %c0_56 = arith.constant 0 : index
    %c0_57 = arith.constant 0 : index
    %68 = vector.load %arg4[%c3_55, %c0_56, %c0_57] : memref<5x16x1xf32, #tpu.memory_space<vmem>>, vector<1x16x1xf32>
    %69 = vector.shape_cast %68 : vector<1x16x1xf32> to vector<16x1xf32>
    %cst_58 = arith.constant dense<0.000000e+00> : vector<16x256xf32>
    %70 = tpu.matmul %67, %65, %cst_58 {dimension_numbers = #tpu.dot_dimension_numbers<[1], [0], [0], [1], [0, 0, 1, 1], [], []>, precision = #tpu.contract_precision<fp32>} : vector<16x64xf32>, vector<64x256xf32>, vector<16x256xf32> -> vector<16x256xf32>
    %71 = vector.broadcast %69 : vector<16x1xf32> to vector<16x256xf32>
    %72 = arith.addf %70, %71 : vector<16x256xf32>
    %cst_59 = arith.constant 0.000000e+00 : f32
    %73 = vector.broadcast %cst_59 : f32 to vector<16x256xf32>
    %74 = arith.maximumf %72, %73 : vector<16x256xf32>
    %c3_60 = arith.constant 3 : index
    %c0_61 = arith.constant 0 : index
    %c0_62 = arith.constant 0 : index
    %75 = vector.load %arg5[%c3_60, %c0_61, %c0_62] : memref<5x64x16xf32, #tpu.memory_space<vmem>>, vector<1x64x16xf32>
    %76 = vector.shape_cast %75 : vector<1x64x16xf32> to vector<64x16xf32>
    %c3_63 = arith.constant 3 : index
    %c0_64 = arith.constant 0 : index
    %c0_65 = arith.constant 0 : index
    %77 = vector.load %arg6[%c3_63, %c0_64, %c0_65] : memref<5x64x1xf32, #tpu.memory_space<vmem>>, vector<1x64x1xf32>
    %78 = vector.shape_cast %77 : vector<1x64x1xf32> to vector<64x1xf32>
    %cst_66 = arith.constant dense<0.000000e+00> : vector<64x256xf32>
    %79 = tpu.matmul %76, %74, %cst_66 {dimension_numbers = #tpu.dot_dimension_numbers<[1], [0], [0], [1], [0, 0, 1, 1], [], []>, precision = #tpu.contract_precision<fp32>} : vector<64x16xf32>, vector<16x256xf32>, vector<64x256xf32> -> vector<64x256xf32>
    %80 = vector.broadcast %78 : vector<64x1xf32> to vector<64x256xf32>
    %81 = arith.addf %79, %80 : vector<64x256xf32>
    %cst_67 = arith.constant dense<0.000000e+00> : vector<64xf32>
    %82 = vector.multi_reduction <add>, %65, %cst_67 [1] : vector<64x256xf32> to vector<64xf32>
    %83 = vector.shape_cast %82 : vector<64xf32> to vector<64x1xf32>
    %cst_68 = arith.constant 3.906250e-03 : f32
    %84 = vector.broadcast %cst_68 : f32 to vector<64x1xf32>
    %85 = arith.mulf %83, %84 : vector<64x1xf32>
    %c1_69 = arith.constant 1 : index
    %c0_70 = arith.constant 0 : index
    %c0_71 = arith.constant 0 : index
    %86 = vector.load %arg3[%c1_69, %c0_70, %c0_71] : memref<5x16x64xf32, #tpu.memory_space<vmem>>, vector<1x16x64xf32>
    %87 = vector.shape_cast %86 : vector<1x16x64xf32> to vector<16x64xf32>
    %c1_72 = arith.constant 1 : index
    %c0_73 = arith.constant 0 : index
    %c0_74 = arith.constant 0 : index
    %88 = vector.load %arg4[%c1_72, %c0_73, %c0_74] : memref<5x16x1xf32, #tpu.memory_space<vmem>>, vector<1x16x1xf32>
    %89 = vector.shape_cast %88 : vector<1x16x1xf32> to vector<16x1xf32>
    %cst_75 = arith.constant dense<0.000000e+00> : vector<16x1xf32>
    %90 = tpu.matmul %87, %85, %cst_75 {dimension_numbers = #tpu.dot_dimension_numbers<[1], [0], [0], [1], [0, 0, 1, 1], [], []>, precision = #tpu.contract_precision<fp32>} : vector<16x64xf32>, vector<64x1xf32>, vector<16x1xf32> -> vector<16x1xf32>
    %91 = arith.addf %90, %89 : vector<16x1xf32>
    %cst_76 = arith.constant 0.000000e+00 : f32
    %92 = vector.broadcast %cst_76 : f32 to vector<16x1xf32>
    %93 = arith.maximumf %91, %92 : vector<16x1xf32>
    %c1_77 = arith.constant 1 : index
    %c0_78 = arith.constant 0 : index
    %c0_79 = arith.constant 0 : index
    %94 = vector.load %arg5[%c1_77, %c0_78, %c0_79] : memref<5x64x16xf32, #tpu.memory_space<vmem>>, vector<1x64x16xf32>
    %95 = vector.shape_cast %94 : vector<1x64x16xf32> to vector<64x16xf32>
    %c1_80 = arith.constant 1 : index
    %c0_81 = arith.constant 0 : index
    %c0_82 = arith.constant 0 : index
    %96 = vector.load %arg6[%c1_80, %c0_81, %c0_82] : memref<5x64x1xf32, #tpu.memory_space<vmem>>, vector<1x64x1xf32>
    %97 = vector.shape_cast %96 : vector<1x64x1xf32> to vector<64x1xf32>
    %cst_83 = arith.constant dense<0.000000e+00> : vector<64x1xf32>
    %98 = tpu.matmul %95, %93, %cst_83 {dimension_numbers = #tpu.dot_dimension_numbers<[1], [0], [0], [1], [0, 0, 1, 1], [], []>, precision = #tpu.contract_precision<fp32>} : vector<64x16xf32>, vector<16x1xf32>, vector<64x1xf32> -> vector<64x1xf32>
    %99 = arith.addf %98, %97 : vector<64x1xf32>
    %cst_84 = arith.constant dense<0xFF800000> : vector<64xf32>
    %100 = vector.multi_reduction <maximumf>, %65, %cst_84 [1] : vector<64x256xf32> to vector<64xf32>
    %101 = vector.shape_cast %100 : vector<64xf32> to vector<64x1xf32>
    %c4 = arith.constant 4 : index
    %c0_85 = arith.constant 0 : index
    %c0_86 = arith.constant 0 : index
    %102 = vector.load %arg3[%c4, %c0_85, %c0_86] : memref<5x16x64xf32, #tpu.memory_space<vmem>>, vector<1x16x64xf32>
    %103 = vector.shape_cast %102 : vector<1x16x64xf32> to vector<16x64xf32>
    %c4_87 = arith.constant 4 : index
    %c0_88 = arith.constant 0 : index
    %c0_89 = arith.constant 0 : index
    %104 = vector.load %arg4[%c4_87, %c0_88, %c0_89] : memref<5x16x1xf32, #tpu.memory_space<vmem>>, vector<1x16x1xf32>
    %105 = vector.shape_cast %104 : vector<1x16x1xf32> to vector<16x1xf32>
    %cst_90 = arith.constant dense<0.000000e+00> : vector<16x1xf32>
    %106 = tpu.matmul %103, %101, %cst_90 {dimension_numbers = #tpu.dot_dimension_numbers<[1], [0], [0], [1], [0, 0, 1, 1], [], []>, precision = #tpu.contract_precision<fp32>} : vector<16x64xf32>, vector<64x1xf32>, vector<16x1xf32> -> vector<16x1xf32>
    %107 = arith.addf %106, %105 : vector<16x1xf32>
    %cst_91 = arith.constant 0.000000e+00 : f32
    %108 = vector.broadcast %cst_91 : f32 to vector<16x1xf32>
    %109 = arith.maximumf %107, %108 : vector<16x1xf32>
    %c4_92 = arith.constant 4 : index
    %c0_93 = arith.constant 0 : index
    %c0_94 = arith.constant 0 : index
    %110 = vector.load %arg5[%c4_92, %c0_93, %c0_94] : memref<5x64x16xf32, #tpu.memory_space<vmem>>, vector<1x64x16xf32>
    %111 = vector.shape_cast %110 : vector<1x64x16xf32> to vector<64x16xf32>
    %c4_95 = arith.constant 4 : index
    %c0_96 = arith.constant 0 : index
    %c0_97 = arith.constant 0 : index
    %112 = vector.load %arg6[%c4_95, %c0_96, %c0_97] : memref<5x64x1xf32, #tpu.memory_space<vmem>>, vector<1x64x1xf32>
    %113 = vector.shape_cast %112 : vector<1x64x1xf32> to vector<64x1xf32>
    %cst_98 = arith.constant dense<0.000000e+00> : vector<64x1xf32>
    %114 = tpu.matmul %111, %109, %cst_98 {dimension_numbers = #tpu.dot_dimension_numbers<[1], [0], [0], [1], [0, 0, 1, 1], [], []>, precision = #tpu.contract_precision<fp32>} : vector<64x16xf32>, vector<16x1xf32>, vector<64x1xf32> -> vector<64x1xf32>
    %115 = arith.addf %114, %113 : vector<64x1xf32>
    %116 = arith.addf %99, %115 : vector<64x1xf32>
    %117 = vector.broadcast %116 : vector<64x1xf32> to vector<64x256xf32>
    %118 = arith.addf %81, %117 : vector<64x256xf32>
    %cst_99 = arith.constant 5.000000e-01 : f32
    %119 = vector.broadcast %cst_99 : f32 to vector<64x256xf32>
    %120 = arith.mulf %119, %118 : vector<64x256xf32>
    %121 = math.tanh %120 : vector<64x256xf32>
    %cst_100 = arith.constant 5.000000e-01 : f32
    %122 = vector.broadcast %cst_100 : f32 to vector<64x256xf32>
    %123 = arith.mulf %122, %121 : vector<64x256xf32>
    %cst_101 = arith.constant 5.000000e-01 : f32
    %124 = vector.broadcast %cst_101 : f32 to vector<64x256xf32>
    %125 = arith.addf %123, %124 : vector<64x256xf32>
    %126 = arith.mulf %4, %125 : vector<64x256xf32>
    %c0_102 = arith.constant 0 : index
    %c0_103 = arith.constant 0 : index
    %c0_104 = arith.constant 0 : index
    %127 = vector.load %arg7[%c0_102, %c0_103, %c0_104] : memref<1x64x256xf32, #tpu.memory_space<vmem>>, vector<1x64x256xf32>
    %128 = vector.shape_cast %127 : vector<1x64x256xf32> to vector<64x256xf32>
    %129 = vector.shape_cast %126 : vector<64x256xf32> to vector<1x64x256xf32>
    tpu.vector_store %arg7[%c0_102, %c0_103, %c0_104], %129 {strides = array<i32>} : memref<1x64x256xf32, #tpu.memory_space<vmem>>, vector<1x64x256xf32>,
    return
  }
  func.func @transform_0(%arg0: i32) -> (i32, i32, i32) {
    %c0_i32 = arith.constant 0 : i32
    %c0_i32_0 = arith.constant 0 : i32
    %c0_i32_1 = arith.constant 0 : i32
    return %arg0, %c0_i32, %c0_i32_0 : i32, i32, i32
  }
  func.func @transform_1(%arg0: i32) -> (i32, i32, i32) {
    %c0_i32 = arith.constant 0 : i32
    %c0_i32_0 = arith.constant 0 : i32
    %c0_i32_1 = arith.constant 0 : i32
    return %arg0, %c0_i32, %c0_i32_0 : i32, i32, i32
  }
  func.func @transform_2(%arg0: i32) -> (i32, i32, i32) {
    %c0_i32 = arith.constant 0 : i32
    %c0_i32_0 = arith.constant 0 : i32
    %c0_i32_1 = arith.constant 0 : i32
    %c0_i32_2 = arith.constant 0 : i32
    return %c0_i32, %c0_i32_0, %c0_i32_1 : i32, i32, i32
  }
  func.func @transform_3(%arg0: i32) -> (i32, i32, i32) {
    %c0_i32 = arith.constant 0 : i32
    %c0_i32_0 = arith.constant 0 : i32
    %c0_i32_1 = arith.constant 0 : i32
    %c0_i32_2 = arith.constant 0 : i32
    return %c0_i32, %c0_i32_0, %c0_i32_1 : i32, i32, i32
  }
  func.func @transform_4(%arg0: i32) -> (i32, i32, i32) {
    %c0_i32 = arith.constant 0 : i32
    %c0_i32_0 = arith.constant 0 : i32
    %c0_i32_1 = arith.constant 0 : i32
    %c0_i32_2 = arith.constant 0 : i32
    return %c0_i32, %c0_i32_0, %c0_i32_1 : i32, i32, i32
  }
  func.func @transform_5(%arg0: i32) -> (i32, i32, i32) {
    %c0_i32 = arith.constant 0 : i32
    %c0_i32_0 = arith.constant 0 : i32
    %c0_i32_1 = arith.constant 0 : i32
    %c0_i32_2 = arith.constant 0 : i32
    return %c0_i32, %c0_i32_0, %c0_i32_1 : i32, i32, i32
  }
  func.func @transform_6(%arg0: i32) -> (i32, i32, i32) {
    %c0_i32 = arith.constant 0 : i32
    %c0_i32_0 = arith.constant 0 : i32
    %c0_i32_1 = arith.constant 0 : i32
    return %arg0, %c0_i32, %c0_i32_0 : i32, i32, i32
  }
}

</mosaic_0001>

<bundles_post_ra>
// kernel: tpu_custom_call.1
= control target key start
LH: loop header
LB: loop body
LE: loop exit
PB: predicated region body
PF: predicated region fallthrough
CT: control target
= control target key end

     0   :  { %11 = vsyncpa [#allocation3], 0  ;;  %s14758_s0 = inlined_call_operand.vmem [shape: f32[2,64,256], index: 0, kind: input, shape index: {}]   ;;  %s14759_s1 = inlined_call_operand.vmem [shape: f32[2,64,256], index: 1, kind: input, shape index: {}]   ;;  %s14760_s2 = inlined_call_operand.vmem [shape: f32[5,16,64], index: 2, kind: input, shape index: {}]   ;;  %s14761_s3 = inlined_call_operand.vmem [shape: f32[5,16,1], index: 3, kind: input, shape index: {}]   ;;  %s14762_s4 = inlined_call_operand.vmem [shape: f32[5,64,16], index: 4, kind: input, shape index: {}]   ;;  %s14763_s5 = inlined_call_operand.vmem [shape: f32[5,64,1], index: 5, kind: input, shape index: {}]   ;;  %s14764_s6 = inlined_call_operand.hbm [shape: f32[2,64,256], index: 6, kind: output, shape index: {}]  }
   0x1   :  { %13 = vsyncpa [#allocation3 + $0x1], 0  ;;  %s11264_s21 = smov 0   ;;  %s11266_s22 = smov 0  }
   0x2   :  { %s11268_s23 = smov 0   ;;  %s11270_s24 = smov 0  }
   0x3 LB: > { %s11285_s25 = sadd.s32 4294967295, %s11222_s24   ;;  %s9626_s26 = sadd.s32 4294967294, %s11222_s24   ;;  %s11222_s24 = sphi %s11270_s24, %s15266_s24   ;;  %s11218_s23 = sphi %s11268_s23, %s15265_s23   ;;  %s11214_s22 = sphi %s11266_s22, %s15264_s22   ;;  %s11210_s21 = sphi %s11264_s21, %s15263_s21  }
   0x4   : > { %s11289_s27 = sadd.s32 1, %s11222_s24   ;;  %s162_s28 = sadd.s32 1, %s11218_s23 }
   0x5   : > { %s159_s29 = ssub.s32 %s11222_s24, %s11289_s27  ;;  %p172_p0 = scmp.ne.s32.totalorder %s11218_s23, %s11214_s22 }
   0x6   : > { %p160_p1 = scmp.eq.s32.totalorder %s159_s29, 0  ;;  %p173_p2 = scmp.eq.s32.totalorder %s11285_s25, 1 }
   0x7   : > { %p178_p3 = scmp.ne.s32.totalorder %s11214_s22, %s11210_s21  ;;  %p179_p4 = scmp.eq.s32.totalorder %s9626_s26, 1 }
   0x8   : > { %s11300_s30 = scalar_select %p160_p1, %s11218_s23, %s162_s28  }
   0x9   : > { %p11302_p5 = por %p173_p2, %p172_p0  ;;  %p11306_p6 = por %p179_p4, %p178_p3 }
   0xa   : > { %p9629_p7 = scmp.ge.s32.totalorder %s11222_s24, 1  ;;  %p225_p8 = scmp.lt.s32.totalorder %s11222_s24, 3 }
   0xc   : > { %p226_p9 = pnand %p9629_p7, %p225_p8 }
   0xe   : > { %229 = sbr.rel (%p226_p9) target bundleno = 2698 (0xa8a), region = 44 }
  0x13   : > { %p260_p10 = scmp.lt.s32.totalorder %s11285_s25, 1  ;;  %v318_v0 = vld [vmem:[%s14760_s2] sm:$0xff]  ;;  %vm332_vm0 = vcmask 523264   ;;  %v319_v1 = vld [vmem:[%s14760_s2 + $0x8] sm:$0xff]  ;;  %v14776_v2 = vmov 0.0   ;;  %v11225_v8 = vmov 0  }
  0x14   : > { %419 = vmatprep.mubr.f32.mxu0 %v14776_v2  ;;  %v334_v3 = vsel %vm332_vm0, %v318_v0, 0  ;;  %586 = vmatprep.mubr.f32.mxu1 %v14776_v2  ;;  %v337_v4 = vsel %vm332_vm0, %v319_v1, 0  ;;  %v321_v5 = vld [vmem:[%s14761_s3 + $0x8] sm:$0xff]  ;;  %v320_v10 = vld [vmem:[%s14761_s3] sm:$0xff]  ;;  %vm1095_vm1 = vcmask 130048   ;;  %s257_s12 = sand.u32 1, %s11214_s22  }
  0x15   : > { %s261_s15 = scalar_select %p260_p10, %s11285_s25, 1  ;;  %v11327_v6 = vand.u32 4294901760, %v334_v3  ;;  %v11329_v7 = vand.u32 4294901760, %v337_v4  ;;  %11086 = vset.pattern.permute.xlu0 %v11225_v8  ;;  %11087 = vset.pattern.permute.xlu1 %v11225_v8 }
  0x16   : > { %329 = vperm.xlu0 %11086, %v321_v5   ;;  %s9630_s13 = sshll.u32 %s257_s12, 7 }
  0x17   : > { %s9720_s16 = sshll.u32 %s261_s15, 7  ;;  %v11332_v9 = vsub.f32 %v334_v3, %v11327_v6  ;;  %v11348_v11 = vsub.f32 %v337_v4, %v11329_v7  ;;  %s14675_s14 = scalar_lea.vmem [#allocation2], %s9630_s13 }
  0x18   : > { %s11340_s26 = scalar_lea.vmem %s14758_s0, %s9720_s16  ;;  %s11345_s9 = scalar_lea.vmem %s14759_s1, %s9720_s16 }
  0x19   : > { %v285_v12 = vld [vmem:[%s11340_s26 + $0x78] sm:$0xff]  ;;  %v284_v14 = vld [vmem:[%s11340_s26 + $0x70] sm:$0xff]  ;;  %v14765_v15 = vand.u32 4294901760, %v11332_v9  ;;  %v283_v18 = vld [vmem:[%s11340_s26 + $0x68] sm:$0xff]  ;;  %s9722_s15 = sshll.u32 %s11285_s25, 11  ;;  %s9552_s16 = sshll.u32 %s14675_s14, 4  ;;  %s14710_s16 = int_to_ptr.vmem [resolvable:$true] %s9552_s16 }
  0x1a   : > { %v301_v13 = vld [vmem:[%s11345_s9 + $0x78] sm:$0xff]  ;;  %v300_v17 = vld [vmem:[%s11345_s9 + $0x70] sm:$0xff]  ;;  %v299_v19 = vld [vmem:[%s11345_s9 + $0x68] sm:$0xff]  ;;  %324 = vperm.xlu0 %11086, %v320_v10   ;;  %s14708_s19 = scalar_lea.hbm %s14764_s6, %s9722_s15  ;;  %s14718_s25 = scalar_lea.sflag [#allocation3], %s257_s12 }
  0x1b   : > { %v11354_v16 = vadd.f32 %v301_v13, %v285_v12  ;;  %v11359_v20 = vadd.f32 %v300_v17, %v284_v14  ;;  %v11361_v21 = vadd.f32 %v299_v19, %v283_v18  ;;  %v282_v22 = vld [vmem:[%s11340_s26 + $0x60] sm:$0xff]  ;;  %v281_v24 = vld [vmem:[%s11340_s26 + $0x58] sm:$0xff]  ;;  %v11369_v25 = vsub.f32 %v11332_v9, %v14765_v15  ;;  %v280_v29 = vld [vmem:[%s11340_s26 + $0x50] sm:$0xff]  ;;  %s11162_s20 = scalar_lea.vmem %s14710_s16, 2048 }
  0x1c   : > { %v298_v23 = vld [vmem:[%s11345_s9 + $0x60] sm:$0xff]  ;;  %v297_v28 = vld [vmem:[%s11345_s9 + $0x58] sm:$0xff]  ;;  %v296_v30 = vld [vmem:[%s11345_s9 + $0x50] sm:$0xff]  ;;  %p11163_p11 = scmp.ne.s32.totalorder %s14710_s16, %s11162_s20 }
  0x1d   : > { %14894 = vst [vmem:[#allocation5_spill] sm:$0xff] %v11354_v16  ;;  %14895 = vst [vmem:[#allocation6_spill] sm:$0xff] %v11359_v20  ;;  %v11372_v26 = vand.u32 4294901760, %v11354_v16  ;;  %v11374_v27 = vadd.f32 %v298_v23, %v282_v22  ;;  %v11381_v32 = vand.u32 4294901760, %v11359_v20  ;;  %v11384_v33 = vand.u32 4294901760, %v11361_v21  ;;  %v279_v36 = vld [vmem:[%s11340_s26 + $0x48] sm:$0xff] }
  0x1e   : > { %14896 = vst [vmem:[#allocation7_spill] sm:$0xff] %v11361_v21  ;;  %v11386_v34 = vadd.f32 %v297_v28, %v281_v24  ;;  %v11388_v35 = vadd.f32 %v296_v30, %v280_v29  ;;  %v295_v37 = vld [vmem:[%s11345_s9 + $0x48] sm:$0xff]  ;;  %v278_v38 = vld [vmem:[%s11340_s26 + $0x40] sm:$0xff]  ;;  %v277_v42 = vld [vmem:[%s11340_s26 + $0x38] sm:$0xff]  ;;  %v424_v45 = vand.u32 4294901760, %v11369_v25  ;;  %p11164_p12 = pnand %p11163_p11, %p11302_p5 }
  0x1f   : > { %14897 = vst [vmem:[#allocation8_spill] sm:$0xff] %v11374_v27  ;;  %356 = vmatprep.subr.mxu0 %v11372_v26  ;;  %v11395_v39 = vand.u32 4294901760, %v11374_v27  ;;  %v11397_v40 = vadd.f32 %v295_v37, %v279_v36  ;;  %v294_v41 = vld [vmem:[%s11345_s9 + $0x40] sm:$0xff]  ;;  %v293_v43 = vld [vmem:[%s11345_s9 + $0x38] sm:$0xff]  ;;  %v11404_v44 = vsub.f32 %v11354_v16, %v11372_v26  ;;  %v276_v50 = vld [vmem:[%s11340_s26 + $0x30] sm:$0xff]  ;;  %v11430_v56 = vsub.f32 %v11359_v20, %v11381_v32 }
  0x20   : > { %14898 = vst [vmem:[#allocation9_spill] sm:$0xff] %v11386_v34  ;;  %14899 = vst [vmem:[#allocation10_spill] sm:$0xff] %v11388_v35  ;;  %358 = vmatpush1.msra.mxu0 %v11381_v32  ;;  %v11409_v46 = vand.u32 4294901760, %v11386_v34  ;;  %v11412_v47 = vand.u32 4294901760, %v11388_v35  ;;  %v11414_v48 = vadd.f32 %v294_v41, %v278_v38  ;;  %v11416_v49 = vadd.f32 %v293_v43, %v277_v42  ;;  %v292_v51 = vld [vmem:[%s11345_s9 + $0x30] sm:$0xff]  ;;  %v275_v52 = vld [vmem:[%s11340_s26 + $0x28] sm:$0xff]  ;;  %p11165_p13 = pneg %p11164_p12 }
  0x21   : > { %14900 = vst [vmem:[#allocation11_spill] sm:$0xff] %v11397_v40  ;;  %360 = vmatprep.subr.mxu0 %v11384_v33  ;;  %v11423_v53 = vand.u32 4294901760, %v11397_v40  ;;  %v14772_v54 = vand.u32 4294901760, %v11404_v44  ;;  %v11426_v55 = vadd.f32 %v292_v51, %v276_v50  ;;  %v291_v57 = vld [vmem:[%s11345_s9 + $0x28] sm:$0xff]  ;;  %v274_v58 = vld [vmem:[%s11340_s26 + $0x20] sm:$0xff]  ;;  %v11446_v63 = vsub.f32 %v11361_v21, %v11384_v33  ;;  %v273_v0 = vld [vmem:[%s11340_s26 + $0x18] sm:$0xff] }
  0x22   : > { %14901 = vst [vmem:[#allocation12_spill] sm:$0xff] %v11414_v48  ;;  %14902 = vst [vmem:[#allocation13_spill] sm:$0xff] %v11416_v49  ;;  %v290_v59 = vld [vmem:[%s11345_s9 + $0x20] sm:$0xff]  ;;  %362 = vmatpush1.msra.mxu0 %v11395_v39  ;;  %v11437_v60 = vand.u32 4294901760, %v11414_v48  ;;  %v11440_v61 = vand.u32 4294901760, %v11416_v49  ;;  %v11442_v62 = vadd.f32 %v291_v57, %v275_v52  ;;  %v289_v1 = vld [vmem:[%s11345_s9 + $0x18] sm:$0xff]  ;;  %v11469_v17 = vsub.f32 %v11374_v27, %v11395_v39 }
  0x23   : > { %14903 = vst [vmem:[#allocation14_spill] sm:$0xff] %v11426_v55  ;;  %364 = vmatprep.subr.mxu0 %v11409_v46  ;;  %v461_v3 = vsub.f32 %v11404_v44, %v14772_v54  ;;  %v11455_v4 = vand.u32 4294901760, %v11426_v55  ;;  %v14771_v5 = vand.u32 4294901760, %v11430_v56  ;;  %v11458_v8 = vadd.f32 %v290_v59, %v274_v58  ;;  %v272_v10 = vld [vmem:[%s11340_s26 + $0x10] sm:$0xff]  ;;  %v271_v19 = vld [vmem:[%s11340_s26 + $0x8] sm:$0xff]  ;;  %v270_v41 = vld [vmem:[%s11340_s26] sm:$0xff] }
  0x24   : > { %14904 = vst [vmem:[#allocation15_spill] sm:$0xff] %v11442_v62  ;;  %v288_v12 = vld [vmem:[%s11345_s9 + $0x10] sm:$0xff]  ;;  %366 = vmatpush1.msra.mxu0 %v11412_v47  ;;  %v11464_v13 = vand.u32 4294901760, %v11442_v62  ;;  %v14770_v14 = vand.u32 4294901760, %v11446_v63  ;;  %v11471_v18 = vadd.f32 %v289_v1, %v273_v0  ;;  %v287_v22 = vld [vmem:[%s11345_s9 + $0x8] sm:$0xff]  ;;  %v11484_v29 = vsub.f32 %v11386_v34, %v11409_v46  ;;  %v286_v42 = vld [vmem:[%s11345_s9] sm:$0xff] }
  0x25   : > { %14905 = vst [vmem:[#allocation16_spill] sm:$0xff] %v11458_v8  ;;  %368 = vmatprep.subr.mxu0 %v11423_v53  ;;  %v462_v23 = vand.u32 4294901760, %v461_v3  ;;  %v467_v24 = vsub.f32 %v11430_v56, %v14771_v5  ;;  %v11480_v28 = vand.u32 4294901760, %v11458_v8  ;;  %v14769_v36 = vand.u32 4294901760, %v11469_v17  ;;  %s11226_s26 = smov [#allocation2]  }
  0x26   : > { %14906 = vst [vmem:[#allocation17_spill] sm:$0xff] %v11471_v18  ;;  %370 = vmatpush1.msra.mxu0 %v11437_v60  ;;  %v473_v30 = vsub.f32 %v11446_v63, %v14770_v14  ;;  %v11492_v37 = vand.u32 4294901760, %v11471_v18  ;;  %v11494_v38 = vadd.f32 %v288_v12, %v272_v10  ;;  %v14767_v50 = vand.u32 4294901760, %v11484_v29  ;;  %s11166_s28 = sshll.u32 %s11226_s26, 4  ;;  %s11167_s28 = int_to_ptr.vmem [resolvable:$false] %s11166_s28 }
  0x27   : > { %372 = vmatprep.subr.mxu0 %v11440_v61  ;;  %463 = vmatprep.subr.mxu1 %v462_v23  ;;  %v468_v43 = vand.u32 4294901760, %v467_v24  ;;  %v11502_v51 = vsub.f32 %v11388_v35, %v11412_v47  ;;  %v11504_v52 = vadd.f32 %v287_v22, %v271_v19  ;;  %v479_v58 = vsub.f32 %v11469_v17, %v14769_v36  ;;  %s11168_s29 = scalar_lea.vmem %s11167_s28, 4096  ;;  %p11169_p0 = scmp.lt.s32.totalorder %s14710_s16, %s11167_s28 }
  0x28   : > { %14907 = vst [vmem:[#allocation18_spill] sm:$0xff] %v11494_v38  ;;  %374 = vmatpush1.msra.mxu0 %v11455_v4  ;;  %v474_v57 = vand.u32 4294901760, %v473_v30  ;;  %v11511_v59 = vand.u32 4294901760, %v11494_v38  ;;  %v11515_v0 = vsub.f32 %v11397_v40, %v11423_v53  ;;  %v485_v1 = vsub.f32 %v11484_v29, %v14767_v50  ;;  %p11170_p1 = scmp.lt.s32.totalorder %s11168_s29, %s11162_s20 }
  0x29   : > { %14908 = vst [vmem:[#allocation19_spill] sm:$0xff] %v11504_v52  ;;  %469 = vmatpush1.msra.mxu1 %v468_v43  ;;  %376 = vmatprep.subr.mxu0 %v11464_v13  ;;  %v14766_v3 = vand.u32 4294901760, %v11502_v51  ;;  %v11523_v10 = vand.u32 4294901760, %v11504_v52  ;;  %v11525_v12 = vadd.f32 %v286_v42, %v270_v41  ;;  %v480_v19 = vand.u32 4294901760, %v479_v58 }
  0x2a   : > { %475 = vmatprep.subr.mxu1 %v474_v57  ;;  %378 = vmatpush1.msra.mxu0 %v11480_v28  ;;  %v14768_v22 = vand.u32 4294901760, %v11515_v0  ;;  %v11531_v23 = vsub.f32 %v11414_v48, %v11437_v60  ;;  %v11535_v24 = vsub.f32 %v11416_v49, %v11440_v61  ;;  %v486_v30 = vand.u32 4294901760, %v485_v1  ;;  %p11171_p2 = por %p11170_p1, %p11169_p0 }
  0x2b   : > { %14909 = vst [vmem:[#allocation20_spill] sm:$0xff] %v11525_v12  ;;  %380 = vmatprep.subr.mxu0 %v11492_v37  ;;  %v491_v41 = vsub.f32 %v11502_v51, %v14766_v3  ;;  %v11542_v42 = vand.u32 4294901760, %v11525_v12  ;;  %v11546_v43 = vsub.f32 %v11426_v55, %v11455_v4  ;;  %481 = vmatpush1.msra.mxu1 %v480_v19 }
  0x2c   : > { %382 = vmatpush1.msra.mxu0 %v11511_v59  ;;  %v497_v57 = vsub.f32 %v11515_v0, %v14768_v22  ;;  %v14773_v58 = vand.u32 4294901760, %v11531_v23  ;;  %v14774_v1 = vand.u32 4294901760, %v11535_v24  ;;  %v11556_v15 = vsub.f32 %v11442_v62, %v11464_v13  ;;  %487 = vmatprep.subr.mxu1 %v486_v30  ;;  %p11172_p3 = pnand %p11171_p2, %p11165_p13 }
  0x2d   : > { %v492_v3 = vand.u32 4294901760, %v491_v41  ;;  %384 = vmatprep.subr.mxu0 %v11523_v10  ;;  %v14775_v19 = vand.u32 4294901760, %v11546_v43  ;;  %v11562_v50 = vsub.f32 %v11458_v8, %v11480_v28  ;;  %v11566_v22 = vsub.f32 %v11471_v18, %v11492_v37 }
  0x2e   : > { %v498_v36 = vand.u32 4294901760, %v497_v57  ;;  %386 = vmatpush1.msra.mxu0 %v11542_v42  ;;  %v503_v30 = vsub.f32 %v11531_v23, %v14773_v58  ;;  %v509_v41 = vsub.f32 %v11535_v24, %v14774_v1  ;;  %v14778_v14 = vand.u32 4294901760, %v11556_v15 }
  0x2f   : > { %493 = vmatpush1.msra.mxu1 %v492_v3  ;;  %619 = vmatprep.subr.mxu0 %v11404_v44  ;;  %v515_v5 = vsub.f32 %v11546_v43, %v14775_v19  ;;  %v14779_v57 = vand.u32 4294901760, %v11562_v50  ;;  %v14782_v54 = vand.u32 4294901760, %v11566_v22  ;;  %v11584_v58 = vsub.f32 %v11494_v38, %v11511_v59 }
  0x30   : > { %499 = vmatprep.subr.mxu1 %v498_v36  ;;  %v504_v31 = vand.u32 4294901760, %v503_v30  ;;  %v510_v1 = vand.u32 4294901760, %v509_v41  ;;  %425 = vmatmul.mubr.f32.vlgmr.msra.gmra.mxu0 %v424_v45  ;;  %v521_v3 = vsub.f32 %v11556_v15, %v14778_v14  ;;  %v11593_v19 = vsub.f32 %v11504_v52, %v11523_v10 }
  0x31   : > { %v516_v2 = vand.u32 4294901760, %v515_v5  ;;  %622 = vmatpush1.msra.mxu0 %v11430_v56  ;;  %v527_v36 = vsub.f32 %v11562_v50, %v14779_v57  ;;  %v533_v25 = vsub.f32 %v11566_v22, %v14782_v54  ;;  %v538_v45 = vand.u32 4294901760, %v11584_v58 }
  0x32   : > { %v14910_v30 = vmov 0.0   ;;  %505 = vmatpush1.msra.mxu1 %v504_v31  ;;  %v522_v41 = vand.u32 4294901760, %v521_v3  ;;  %625 = vmatprep.subr.mxu0 %v11446_v63  ;;  %v544_v5 = vand.u32 4294901760, %v11593_v19  ;;  %v11608_v14 = vsub.f32 %v11525_v12, %v11542_v42 }
  0x33   : > { %430 = vmatprep.mubr.f32.mxu0 %v14910_v30  ;;  %511 = vmatprep.subr.mxu1 %v510_v1  ;;  %v528_v57 = vand.u32 4294901760, %v527_v36  ;;  %v534_v18 = vand.u32 4294901760, %v533_v25  ;;  %v539_v54 = vsub.f32 %v11584_v58, %v538_v45  ;;  %v14911_v1 = vand.u32 4294901760, %v11348_v11 }
  0x34   : > { %628 = vmatpush1.msra.mxu0 %v11469_v17  ;;  %517 = vmatpush1.msra.mxu1 %v516_v2  ;;  %v545_v31 = vsub.f32 %v11593_v19, %v544_v5  ;;  %v550_v3 = vand.u32 4294901760, %v11608_v14 }
  0x35   : > { %631 = vmatprep.subr.mxu0 %v11484_v29  ;;  %523 = vmatprep.subr.mxu1 %v522_v41  ;;  %v540_v38 = vand.u32 4294901760, %v539_v54  ;;  %v434_v36 = vsub.f32 %v11348_v11, %v14911_v1  ;;  %v14921_v1 = vand.u32 4294901760, %v11535_v24 }
  0x36   : > { %634 = vmatpush1.msra.mxu0 %v11502_v51  ;;  %529 = vmatpush1.msra.mxu1 %v528_v57  ;;  %v546_v25 = vand.u32 4294901760, %v545_v31  ;;  %v551_v2 = vsub.f32 %v11608_v14, %v550_v3  ;;  %v14914_v57 = vand.u32 4294901760, %v11446_v63  ;;  %v14915_v31 = vand.u32 4294901760, %v11469_v17 }
  0x37   : > { %637 = vmatprep.subr.mxu0 %v11515_v0  ;;  %535 = vmatprep.subr.mxu1 %v534_v18  ;;  %v435_v54 = vand.u32 4294901760, %v434_v36  ;;  %v14912_v18 = vand.u32 4294901760, %v11404_v44  ;;  %v14916_v44 = vand.u32 4294901760, %v11484_v29  ;;  %v14918_v63 = vand.u32 4294901760, %v11515_v0 }
  0x38   : > { %640 = vmatpush1.msra.mxu0 %v11531_v23  ;;  %541 = vmatpush1.msra.mxu1 %v540_v38  ;;  %v552_v41 = vand.u32 4294901760, %v551_v2  ;;  %v14913_v38 = vand.u32 4294901760, %v11430_v56  ;;  %v14917_v56 = vand.u32 4294901760, %v11502_v51  ;;  %v14919_v17 = vand.u32 4294901760, %v11531_v23  ;;  %v1049_v2 = vld [vmem:[%s14763_s5 + $0x10] sm:$0xff] }
  0x39   : > { %643 = vmatprep.subr.mxu0 %v11535_v24  ;;  %547 = vmatprep.subr.mxu1 %v546_v25  ;;  %v14920_v29 = vand.u32 4294901760, %v11332_v9  ;;  %v14922_v51 = vand.u32 4294901760, %v11546_v43  ;;  %v14923_v0 = vand.u32 4294901760, %v11556_v15  ;;  %v14925_v23 = vand.u32 4294901760, %v11348_v11 }
  0x3a   : > { %646 = vmatpush1.msra.mxu0 %v11546_v43  ;;  %553 = vmatpush1.msra.mxu1 %v552_v41 }
  0x3b   : > { %649 = vmatprep.subr.mxu0 %v11556_v15  ;;  %588 = vmatmul.mubr.f32.vlgmr.msra.gmra.mxu1 %v11327_v6  ;;  %v1975_v15 = vadd.f32 %v11354_v16, %v11359_v20 }
  0x3c   : > { %731 = vmatprep.subr.mxu1 %v11372_v26  ;;  %652 = vmatpush1.msra.mxu0 %v11562_v50 }
  0x3d   : > { %733 = vmatpush1.msra.mxu1 %v11381_v32  ;;  %436 = vmatmul.mubr.f32.gmra.mxu0 %v435_v54 }
  0x3e   : > { %735 = vmatprep.subr.mxu1 %v11384_v33  ;;  %655 = vmatprep.subr.mxu0 %v11566_v22 }
  0x3f   : > { %737 = vmatpush1.msra.mxu1 %v11395_v39  ;;  %658 = vmatpush1.msra.mxu0 %v11584_v58  ;;  %v1052_v58 = vld [vmem:[%s14763_s5 + $0x28] sm:$0xff] }
  0x40   : > { %739 = vmatprep.subr.mxu1 %v11409_v46  ;;  %661 = vmatprep.subr.mxu0 %v11593_v19 }
  0x41   : > { %741 = vmatpush1.msra.mxu1 %v11412_v47  ;;  %664 = vmatpush1.msra.mxu0 %v11608_v14  ;;  %v1050_v14 = vld [vmem:[%s14763_s5 + $0x18] sm:$0xff] }
  0x42   : > { %743 = vmatprep.subr.mxu1 %v11423_v53  ;;  %697 = vmatprep.mubr.f32.mxu0 %v14910_v30 }
  0x43   : > { %745 = vmatpush1.msra.mxu1 %v11437_v60  ;;  %700 = vmatmul.mubr.f32.vlgmr.msra.gmra.mxu0 %v11332_v9  ;;  %v14924_v9 = vand.u32 4294901760, %v11562_v50  ;;  %v3403_v50 = vmax.f32 %v11359_v20, %v11354_v16 }
  0x44   : > { %747 = vmatprep.subr.mxu1 %v11440_v61  ;;  %832 = vmatprep.subr.mxu0 %v14912_v18 }
  0x45   : > { %749 = vmatpush1.msra.mxu1 %v11455_v4  ;;  %836 = vmatpush1.msra.mxu0 %v14913_v38 }
  0x46   : > { %593 = vmatprep.mubr.f32.mxu1 %v14910_v30  ;;  %751 = vmatprep.subr.mxu1 %v11464_v13 }
  0x47   : > { %840 = vmatprep.subr.mxu0 %v14914_v57  ;;  %595 = vmatmul.mubr.f32.gmra.mxu1 %v11329_v7 }
  0x48   : > { %844 = vmatpush1.msra.mxu0 %v14915_v31  ;;  %753 = vmatpush1.msra.mxu1 %v11480_v28 }
  0x49   : > { %705 = vmatprep.mubr.f32.mxu0 %v14910_v30  ;;  %755 = vmatprep.subr.mxu1 %v11492_v37 }
  0x4a   : > { %848 = vmatprep.subr.mxu0 %v14916_v44  ;;  %708 = vmatmul.mubr.f32.gmra.mxu0 %v11348_v11  ;;  %v1969_v11 = vadd.f32 %v11386_v34, %v11388_v35 }
  0x4b   : > { %757 = vmatpush1.msra.mxu1 %v11511_v59  ;;  %852 = vmatpush1.msra.mxu0 %v14917_v56 }
  0x4c   : > { %759 = vmatprep.subr.mxu1 %v11523_v10  ;;  %856 = vmatprep.subr.mxu0 %v14918_v63 }
  0x4d   : > { %761 = vmatpush1.msra.mxu1 %v11542_v42  ;;  %794 = vmatprep.mubr.f32.mxu1 %v14910_v30 }
  0x4e   : > { %860 = vmatpush1.msra.mxu0 %v14919_v17  ;;  %798 = vmatmul.mubr.f32.vlgmr.msra.gmra.mxu1 %v14920_v29 }
  0x4f   : > { %864 = vmatprep.subr.mxu0 %v14921_v1  ;;  %957 = vmatprep.subr.mxu1 %v11372_v26  ;;  %v14926_v26 = vand.u32 4294901760, %v11566_v22  ;;  %v3391_v22 = vmax.f32 %v11426_v55, %v11416_v49  ;;  %v1039_v1 = vld [vmem:[%s14762_s4] sm:$0xff] }
  0x50   : > { %868 = vmatpush1.msra.mxu0 %v14922_v51  ;;  %959 = vmatpush1.msra.mxu1 %v11381_v32  ;;  %v3394_v32 = vmax.f32 %v11414_v48, %v11397_v40 }
  0x51   : > { %872 = vmatprep.subr.mxu0 %v14923_v0  ;;  %961 = vmatprep.subr.mxu1 %v11384_v33  ;;  %v1972_v33 = vadd.f32 %v11361_v21, %v11374_v27 }
  0x52   : > { %803 = vmatprep.mubr.f32.mxu1 %v14910_v30  ;;  %876 = vmatpush1.msra.mxu0 %v14924_v9 }
  0x53   : > { %963 = vmatpush1.msra.mxu1 %v11395_v39  ;;  %880 = vmatprep.subr.mxu0 %v14926_v26  ;;  %v3388_v39 = vmax.f32 %v11458_v8, %v11442_v62 }
  0x54   : > { %807 = vmatmul.mubr.f32.gmra.mxu1 %v14925_v23  ;;  %965 = vmatprep.subr.mxu1 %v11409_v46  ;;  %v1966_v46 = vadd.f32 %v11397_v40, %v11414_v48 }
  0x55   : > { %884 = vmatpush1.msra.mxu0 %v538_v45  ;;  %967 = vmatpush1.msra.mxu1 %v11412_v47  ;;  %v3382_v47 = vmax.f32 %v11525_v12, %v11504_v52 }
  0x56   : > { %888 = vmatprep.subr.mxu0 %v544_v5  ;;  %969 = vmatprep.subr.mxu1 %v11423_v53  ;;  %v1963_v53 = vadd.f32 %v11416_v49, %v11426_v55  ;;  %v1051_v5 = vld [vmem:[%s14763_s5 + $0x20] sm:$0xff] }
  0x57   : > { %892 = vmatpush1.msra.mxu0 %v550_v3  ;;  %925 = vmatprep.mubr.f32.mxu0 %v14910_v30 }
  0x58   : > { %971 = vmatpush1.msra.mxu1 %v11437_v60  ;;  %927 = vmatmul.mubr.f32.vlgmr.msra.gmra.mxu0 %v11327_v6  ;;  %v14927_v60 = vld [vmem:[#allocation18_spill] sm:$0xff] }
  0x59   : > { %973 = vmatprep.subr.mxu1 %v11440_v61  ;;  %932 = vmatprep.mubr.f32.mxu0 %v14910_v30  ;;  %v14928_v61 = vld [vmem:[#allocation17_spill] sm:$0xff] }
  0x5a   : > { %975 = vmatpush1.msra.mxu1 %v11455_v4  ;;  %1020 = vmatprep.mubr.f32.mxu1 %v14910_v30  ;;  %v1957_v4 = vadd.f32 %v14928_v61, %v14927_v60  ;;  %v3385_v24 = vmax.f32 %v14927_v60, %v14928_v61 }
  0x5b   : > { %977 = vmatprep.subr.mxu1 %v11464_v13  ;;  %1970 = vadd.xlane.f32.xlu0 %v1969_v11  ;;  %v1954_v13 = vadd.f32 %v11504_v52, %v11525_v12  ;;  %v1097_v11 = vsel %vm1095_vm1, %v1039_v1, 0 }
  0x5c   : > { %979 = vmatpush1.msra.mxu1 %v11480_v28  ;;  %934 = vmatmul.mubr.f32.gmra.mxu0 %v11329_v7  ;;  %v1048_v28 = vld [vmem:[%s14763_s5 + $0x8] sm:$0xff] }
  0x5d   : > { %981 = vmatprep.subr.mxu1 %v11492_v37  ;;  %1976 = vadd.xlane.f32.xlu1 %v1975_v15  ;;  %v1047_v37 = vld [vmem:[%s14763_s5] sm:$0xff] }
  0x5e   : > { %983 = vmatpush1.msra.mxu1 %v11511_v59  ;;  %1188 = vmatprep.mubr.f32.mxu0 %v14910_v30  ;;  %v3400_v59 = vmax.f32 %v11374_v27, %v11361_v21 }
  0x5f   : > { %985 = vmatprep.subr.mxu1 %v11523_v10  ;;  %3395 = vmax.xlane.f32.xlu0 %v3394_v32  ;;  %v3397_v10 = vmax.f32 %v11388_v35, %v11386_v34 }
  0x60   : > { %987 = vmatpush1.msra.mxu1 %v11542_v42  ;;  %v1054_v42 = vld [vmem:[%s14763_s5 + $0x38] sm:$0xff] }
  0x61   : > { %1022 = vmatmul.mubr.f32.vlgmr.msra.gmra.mxu1 %v11327_v6  ;;  %1973 = vadd.xlane.f32.xlu1 %v1972_v33  ;;  %v1960_v6 = vadd.f32 %v11442_v62, %v11458_v8  ;;  %v1040_v33 = vld [vmem:[%s14762_s4 + $0x8] sm:$0xff] }
  0x62   : > { %1027 = vmatprep.mubr.f32.mxu1 %v14910_v30 }
  0x63   : > { %3389 = vmax.xlane.f32.xlu0 %v3388_v39 }
  0x65   : > { %1029 = vmatmul.mubr.f32.gmra.mxu1 %v11329_v7  ;;  %1967 = vadd.xlane.f32.xlu1 %v1966_v46  ;;  %v1053_v7 = vld [vmem:[%s14763_s5 + $0x30] sm:$0xff] }
  0x66   : > { %1361 = vmatprep.mubr.f32.mxu1 %v14910_v30 }
  0x67   : > { %3383 = vmax.xlane.f32.xlu0 %v3382_v47 }
  0x69   : > { %1964 = vadd.xlane.f32.xlu1 %v1963_v53  ;;  %v11786_v53 = vand.u32 4294901760, %v1097_v11 }
  0x6d   : > { %1961 = vadd.xlane.f32.xlu1 %v1960_v6 }
  0x71   : > { %1958 = vadd.xlane.f32.xlu1 %v1957_v4 }
  0x75   : > { %1955 = vadd.xlane.f32.xlu1 %v1954_v13 }
  0x79   : > { %3404 = vmax.xlane.f32.xlu1 %v3403_v50 }
  0x7d   : > { %1087 = vperm.xlu0 %11086, %v1053_v7   ;;  %3401 = vmax.xlane.f32.xlu1 %v3400_v59  ;;  %v1100_v7 = vsel %vm1095_vm1, %v1040_v33, 0 }
  0x81   : > { %1072 = vperm.xlu0 %11086, %v1050_v14   ;;  %3398 = vmax.xlane.f32.xlu1 %v3397_v10  ;;  %v1041_v14 = vld [vmem:[%s14762_s4 + $0x10] sm:$0xff] }
  0x85   : > { %1062 = vperm.xlu0 %11086, %v1048_v28   ;;  %3392 = vmax.xlane.f32.xlu1 %v3391_v22 }
  0x89   : > { %1057 = vperm.xlu0 %11086, %v1047_v37   ;;  %3386 = vmax.xlane.f32.xlu1 %v3385_v24  ;;  %v11793_v24 = vsub.f32 %v1097_v11, %v11786_v53 }
  0x91   : > { %v330_v18 = vpop.permute.xlu0 %329 }
  0x95   : > { %v325_v56 = vpop.permute.xlu0 %324 }
  0x9a   : > { %1092 = vperm.xlu1 %11087, %v1054_v42   ;;  %v11795_v42 = vand.u32 4294901760, %v1100_v7 }
  0x9e   : > { %1082 = vperm.xlu1 %11087, %v1052_v58  }
  0xa2   : > { %1077 = vperm.xlu1 %11087, %v1051_v5  }
  0xa6   : > { %1067 = vperm.xlu1 %11087, %v1049_v2  }
  0xf0   : > { %v426_v43 = vpop.f32.mrf.mxu0 }
  0xf1   : > { %v427_v63 = vadd.f32 %v426_v43, %v325_v56  ;;  %v1103_v43 = vsel %vm1095_vm1, %v1041_v14, 0  ;;  %v1044_v14 = vld [vmem:[%s14762_s4 + $0x28] sm:$0xff] }
  0xf2   : > { %v428_v19 = vpop.f32.mrf.mxu0 }
  0xf3   : > { %v429_v51 = vadd.f32 %v428_v19, %v325_v56 }
  0xfb   : > { %v589_v3 = vpop.f32.mrf.mxu1 }
  0xfc   : > { %v590_v23 = vadd.f32 %v589_v3, %v427_v63 }
  0xfd   : > { %v437_v45 = vpop.f32.mrf.mxu0  ;;  %v591_v25 = vpop.f32.mrf.mxu1 }
  0xfe   : > { %v438_v0 = vadd.f32 %v437_v45, %v330_v18  ;;  %v592_v39 = vadd.f32 %v591_v25, %v429_v51  ;;  %v1042_v25 = vld [vmem:[%s14762_s4 + $0x18] sm:$0xff] }
  0xff   : > { %v439_v36 = vpop.f32.mrf.mxu0 }
 0x100   : > { %v440_v26 = vadd.f32 %v439_v36, %v330_v18 }
 0x103   : > { %v701_v41 = vpop.f32.mrf.mxu0 }
 0x104   : > { %v702_v46 = vadd.f32 %v701_v41, %v590_v23 }
 0x105   : > { %v703_v38 = vpop.f32.mrf.mxu0 }
 0x106   : > { %v704_v6 = vadd.f32 %v703_v38, %v592_v39 }
 0x107   : > { %v596_v54 = vpop.f32.mrf.mxu1 }
 0x108   : > { %v597_v47 = vadd.f32 %v596_v54, %v438_v0 }
 0x109   : > { %v598_v57 = vpop.f32.mrf.mxu1 }
 0x10a   : > { %v709_v31 = vpop.f32.mrf.mxu0  ;;  %v599_v4 = vadd.f32 %v598_v57, %v440_v26  ;;  %v1191_v57 = vand.u32 4294901760, %v11793_v24  ;;  %v1043_v26 = vld [vmem:[%s14762_s4 + $0x20] sm:$0xff] }
 0x10b   : > { %v710_v50 = vadd.f32 %v709_v31, %v597_v47  ;;  %v11803_v31 = vsub.f32 %v1100_v7, %v11795_v42 }
 0x10c   : > { %v711_v17 = vpop.f32.mrf.mxu0  ;;  %v1192_v11 = vsub.f32 %v11793_v24, %v1191_v57 }
 0x10d   : > { %v712_v58 = vadd.f32 %v711_v17, %v599_v4  ;;  %v1109_v4 = vsel %vm1095_vm1, %v1043_v26, 0 }
 0x10e   : > { %v799_v44 = vpop.f32.mrf.mxu1 }
 0x10f   : > { %v800_v13 = vadd.f32 %v799_v44, %v702_v46  ;;  %v11805_v44 = vand.u32 4294901760, %v1103_v43 }
 0x110   : > { %v801_v29 = vpop.f32.mrf.mxu1 }
 0x111   : > { %v802_v59 = vadd.f32 %v801_v29, %v704_v6  ;;  %v1106_v29 = vsel %vm1095_vm1, %v1042_v25, 0 }
 0x112   : > { %v11822_v33 = vand.u32 4294901760, %v1106_v29 }
 0x114   : > { %v808_v15 = vpop.f32.mrf.mxu1 }
 0x115   : > { %v809_v19 = vadd.f32 %v808_v15, %v710_v50  ;;  %v1202_v15 = vand.u32 4294901760, %v11803_v31 }
 0x116   : > { %v810_v28 = vpop.f32.mrf.mxu1 }
 0x117   : > { %v811_v2 = vadd.f32 %v810_v28, %v712_v58  ;;  %v1193_v28 = vand.u32 4294901760, %v1192_v11  ;;  %v11852_v58 = vand.u32 4294901760, %v1109_v4 }
 0x118   : > { %v928_v9 = vpop.f32.mrf.mxu0 }
 0x119   : > { %v929_v10 = vadd.f32 %v928_v9, %v800_v13 }
 0x11a   : > { %v930_v32 = vpop.f32.mrf.mxu0 }
 0x11b   : > { %v931_v45 = vadd.f32 %v930_v32, %v802_v59  ;;  %v11820_v32 = vsub.f32 %v1103_v43, %v11805_v44  ;;  %v11846_v59 = vsub.f32 %v1106_v29, %v11822_v33 }
 0x11c   : > { %v935_v37 = vpop.f32.mrf.mxu0 }
 0x11d   : > { %v936_v41 = vadd.f32 %v935_v37, %v809_v19  ;;  %v1203_v37 = vsub.f32 %v11803_v31, %v1202_v15  ;;  %v1213_v50 = vand.u32 4294901760, %v11820_v32 }
 0x11e   : > { %v937_v3 = vpop.f32.mrf.mxu0 }
 0x11f   : > { %v938_v56 = vadd.f32 %v937_v3, %v811_v2  ;;  %v1045_v3 = vld [vmem:[%s14762_s4 + $0x30] sm:$0xff]  ;;  %v1204_v25 = vand.u32 4294901760, %v1203_v37  ;;  %v1214_v2 = vsub.f32 %v11820_v32, %v1213_v50 }
 0x121   : > { %v1023_v22 = vpop.f32.mrf.mxu1 }
 0x122   : > { %v1024_v5 = vadd.f32 %v1023_v22, %v929_v10 }
 0x123   : > { %v1025_v36 = vpop.f32.mrf.mxu1 }
 0x124   : > { %v1035_v54 = vmax.f32 %v1024_v5, 0.0  ;;  %v1026_v18 = vadd.f32 %v1025_v36, %v931_v45  ;;  %v1112_v45 = vsel %vm1095_vm1, %v1044_v14, 0 }
 0x125   : > { %v1030_v38 = vpop.f32.mrf.mxu1 }
 0x126   : > { %v1036_v63 = vmax.f32 %v1026_v18, 0.0  ;;  %v1031_v17 = vadd.f32 %v1030_v38, %v936_v41  ;;  %v11808_v1 = vand.u32 4294901760, %v1035_v54  ;;  %v1224_v41 = vand.u32 4294901760, %v11846_v59 }
 0x127   : > { %v1032_v51 = vpop.f32.mrf.mxu1  ;;  %v11873_v38 = vsub.f32 %v1109_v4, %v11852_v58 }
 0x128   : > { %v11810_v0 = vand.u32 4294901760, %v1036_v63  ;;  %v1037_v9 = vmax.f32 %v1031_v17, 0.0  ;;  %v1033_v23 = vadd.f32 %v1032_v51, %v938_v56  ;;  %v11830_v6 = vsub.f32 %v1035_v54, %v11808_v1  ;;  %v1046_v51 = vld [vmem:[%s14762_s4 + $0x38] sm:$0xff] }
 0x129   : > { %v11875_v56 = vand.u32 4294901760, %v1112_v45  ;;  %v1115_v17 = vsel %vm1095_vm1, %v1045_v3, 0  ;;  %v1225_v26 = vsub.f32 %v11846_v59, %v1224_v41  ;;  %v1118_v37 = vsel %vm1095_vm1, %v1046_v51, 0 }
 0x12a   : > { %v11824_v39 = vand.u32 4294901760, %v1037_v9  ;;  %v1038_v46 = vmax.f32 %v1033_v23, 0.0  ;;  %v11827_v47 = vsub.f32 %v1036_v63, %v11810_v0  ;;  %v1325_v19 = vand.u32 4294901760, %v11830_v6 }
 0x12b   : > { %v1215_v23 = vand.u32 4294901760, %v1214_v2  ;;  %v11893_v4 = vsub.f32 %v1112_v45, %v11875_v56  ;;  %v11895_v14 = vand.u32 4294901760, %v1115_v17 }
 0x12c   : > { %v11834_v13 = vsub.f32 %v1037_v9, %v11824_v39  ;;  %v11836_v7 = vand.u32 4294901760, %v1038_v46  ;;  %v1319_v43 = vand.u32 4294901760, %v11827_v47  ;;  %v1326_v63 = vsub.f32 %v11830_v6, %v1325_v19 }
 0x12d   : > { %v1246_v3 = vand.u32 4294901760, %v11893_v4 }
 0x12e   : > { %v1313_v10 = vand.u32 4294901760, %v11834_v13  ;;  %1149 = vmatprep.subr.mxu0 %v11836_v7  ;;  %v1306_v22 = vsub.f32 %v1038_v46, %v11836_v7  ;;  %v1320_v18 = vsub.f32 %v11827_v47, %v1319_v43  ;;  %v1235_v46 = vand.u32 4294901760, %v11873_v38 }
 0x12f   : > { %1151 = vmatpush1.msra.mxu0 %v11824_v39  ;;  %v1247_v2 = vsub.f32 %v11893_v4, %v1246_v3 }
 0x130   : > { %1153 = vmatprep.subr.mxu0 %v11810_v0  ;;  %v1307_v5 = vand.u32 4294901760, %v1306_v22  ;;  %v1314_v36 = vsub.f32 %v11834_v13, %v1313_v10  ;;  %v1321_v11 = vand.u32 4294901760, %v1320_v18  ;;  %v1236_v45 = vsub.f32 %v11873_v38, %v1235_v46 }
 0x131   : > { %1155 = vmatpush1.msra.mxu0 %v11808_v1 }
 0x132   : > { %1194 = vmatmul.mubr.f32.vlgmr.msra.gmra.mxu0 %v1193_v28  ;;  %1448 = vmatprep.subr.mxu0 %v1306_v22  ;;  %v1308_v54 = vsub.f32 %v1306_v22, %v1307_v5  ;;  %v1315_v9 = vand.u32 4294901760, %v1314_v36  ;;  %v1327_v28 = vand.u32 4294901760, %v1326_v63  ;;  %v1226_v22 = vand.u32 4294901760, %v1225_v26 }
 0x133   : > { %1451 = vmatpush1.msra.mxu0 %v11834_v13  ;;  %1199 = vmatprep.mubr.f32.mxu0 %v14910_v30  ;;  %v11907_v36 = vand.u32 4294901760, %v1118_v37  ;;  %v1248_v63 = vand.u32 4294901760, %v1247_v2 }
 0x134   : > { %1454 = vmatprep.subr.mxu0 %v11827_v47  ;;  %v1309_v29 = vand.u32 4294901760, %v1308_v54 }
 0x135   : > { %1457 = vmatpush1.msra.mxu0 %v11830_v6  ;;  %v11920_v18 = vsub.f32 %v1118_v37, %v11907_v36 }
 0x136   : > { %1205 = vmatmul.mubr.f32.gmra.mxu0 %v1204_v25  ;;  %1310 = vmatprep.subr.mxu1 %v1309_v29  ;;  %v1237_v25 = vand.u32 4294901760, %v1236_v45 }
 0x137   : > { %1727 = vmatprep.subr.mxu0 %v1307_v5  ;;  %1316 = vmatpush1.msra.mxu1 %v1315_v9  ;;  %v11905_v5 = vsub.f32 %v1115_v17, %v11895_v14  ;;  %v1268_v29 = vand.u32 4294901760, %v11920_v18  ;;  %v1977_v9 = vpop.xlane.xlu1 %1976 }
 0x138   : > { %1322 = vmatprep.subr.mxu1 %v1321_v11  ;;  %1210 = vmatprep.mubr.f32.mxu0 %v14910_v30 }
 0x139   : > { %1328 = vmatpush1.msra.mxu1 %v1327_v28  ;;  %v1257_v54 = vand.u32 4294901760, %v11905_v5  ;;  %v1269_v51 = vsub.f32 %v11920_v18, %v1268_v29 }
 0x13a   : > { %1216 = vmatmul.mubr.f32.gmra.mxu0 %v1215_v23  ;;  %1363 = vmatmul.mubr.f32.vlgmr.msra.gmra.mxu1 %v11786_v53  ;;  %v1985_v23 = vmul.f32 0.00390625, %v1977_v9 }
 0x13b   : > { %1584 = vmatprep.subr.mxu1 %v11836_v7  ;;  %1221 = vmatprep.mubr.f32.mxu0 %v14910_v30  ;;  %v1258_v17 = vsub.f32 %v11905_v5, %v1257_v54  ;;  %v1270_v26 = vand.u32 4294901760, %v1269_v51  ;;  %v1974_v37 = vpop.xlane.xlu1 %1973 }
 0x13c   : > { %1586 = vmatpush1.msra.mxu1 %v11824_v39  ;;  %1368 = vmatprep.mubr.f32.mxu1 %v14910_v30  ;;  %v11942_v11 = vand.u32 4294901760, %v1985_v23 }
 0x13d   : > { %1588 = vmatprep.subr.mxu1 %v11810_v0 }
 0x13e   : > { %1590 = vmatpush1.msra.mxu1 %v11808_v1  ;;  %1227 = vmatmul.mubr.f32.gmra.mxu0 %v1226_v22  ;;  %v11948_v28 = vsub.f32 %v1985_v23, %v11942_v11 }
 0x13f   : > { %1370 = vmatmul.mubr.f32.gmra.mxu1 %v11795_v42  ;;  %1858 = vmatprep.subr.mxu1 %v11836_v7  ;;  %v1259_v7 = vand.u32 4294901760, %v1258_v17  ;;  %v1968_v13 = vpop.xlane.xlu1 %1967 }
 0x140   : > { %1232 = vmatprep.mubr.f32.mxu0 %v14910_v30  ;;  %1375 = vmatprep.mubr.f32.mxu1 %v14910_v30  ;;  %v11958_v22 = vand.u32 4294901760, %v11948_v28 }
 0x142   : > { %1238 = vmatmul.mubr.f32.gmra.mxu0 %v1237_v25  ;;  %v2111_v47 = vsub.f32 %v11948_v28, %v11958_v22 }
 0x143   : > { %1377 = vmatmul.mubr.f32.gmra.mxu1 %v11805_v44  ;;  %1243 = vmatprep.mubr.f32.mxu0 %v14910_v30 }
 0x144   : > { %1382 = vmatprep.mubr.f32.mxu1 %v14910_v30  ;;  %v11976_v6 = vand.u32 4294901760, %v2111_v47 }
 0x146   : > { %1249 = vmatmul.mubr.f32.gmra.mxu0 %v1248_v63 }
 0x147   : > { %1384 = vmatmul.mubr.f32.gmra.mxu1 %v11822_v33  ;;  %1254 = vmatprep.mubr.f32.mxu0 %v14910_v30 }
 0x148   : > { %1389 = vmatprep.mubr.f32.mxu1 %v14910_v30 }
 0x14a   : > { %1260 = vmatmul.mubr.f32.gmra.mxu0 %v1259_v7 }
 0x14b   : > { %1391 = vmatmul.mubr.f32.gmra.mxu1 %v11852_v58  ;;  %1265 = vmatprep.mubr.f32.mxu0 %v14910_v30 }
 0x14c   : > { %1396 = vmatprep.mubr.f32.mxu1 %v14910_v30 }
 0x14e   : > { %1271 = vmatmul.mubr.f32.gmra.mxu0 %v1270_v26  ;;  %v9635_v26 = vld [vmem:[%s14760_s2 + $0x10] sm:$0xff] }
 0x14f   : > { %1398 = vmatmul.mubr.f32.gmra.mxu1 %v11875_v56  ;;  %1490 = vmatprep.mubr.f32.mxu0 %v14910_v30 }
 0x150   : > { %1403 = vmatprep.mubr.f32.mxu1 %v14910_v30 }
 0x152   : > { %1493 = vmatmul.mubr.f32.vlgmr.msra.gmra.mxu0 %v11793_v24  ;;  %v1965_v24 = vpop.xlane.xlu1 %1964 }
 0x153   : > { %1405 = vmatmul.mubr.f32.gmra.mxu1 %v11895_v14  ;;  %1731 = vmatpush1.msra.mxu0 %v1313_v10  ;;  %v1981_v10 = vmul.f32 0.00390625, %v1965_v24  ;;  %v1993_v24 = vsel %vm332_vm0, %v9635_v26, 0 }
 0x154   : > { %1735 = vmatprep.subr.mxu0 %v1319_v43  ;;  %1410 = vmatprep.mubr.f32.mxu1 %v14910_v30 }
 0x155   : > { %1739 = vmatpush1.msra.mxu0 %v1325_v19  ;;  %1498 = vmatprep.mubr.f32.mxu0 %v14910_v30 }
 0x156   : > { %1501 = vmatmul.mubr.f32.gmra.mxu0 %v11803_v31  ;;  %10203 = vmatprep.subr.mxu0 %v11942_v11  ;;  %v1962_v31 = vpop.xlane.xlu1 %1961 }
 0x157   : > { %1412 = vmatmul.mubr.f32.gmra.mxu1 %v11907_v36  ;;  %1506 = vmatprep.mubr.f32.mxu0 %v14910_v30 }
 0x158   : > { %1623 = vmatprep.mubr.f32.mxu1 %v14910_v30 }
 0x15a   : > { %1509 = vmatmul.mubr.f32.gmra.mxu0 %v11820_v32  ;;  %v1982_v32 = vmul.f32 0.00390625, %v1968_v13 }
 0x15b   : > { %1627 = vmatmul.mubr.f32.vlgmr.msra.gmra.mxu1 %v1191_v57  ;;  %1514 = vmatprep.mubr.f32.mxu0 %v14910_v30  ;;  %v1984_v57 = vmul.f32 0.00390625, %v1974_v37 }
 0x15c   : > { %1860 = vmatpush1.msra.mxu1 %v11824_v39  ;;  %1632 = vmatprep.mubr.f32.mxu1 %v14910_v30  ;;  %v12009_v43 = vand.u32 4294901760, %v1982_v32 }
 0x15d   : > { %1862 = vmatprep.subr.mxu1 %v11810_v0 }
 0x15e   : > { %1864 = vmatpush1.msra.mxu1 %v11808_v1  ;;  %1517 = vmatmul.mubr.f32.gmra.mxu0 %v11846_v59  ;;  %v1971_v1 = vpop.xlane.xlu0 %1970  ;;  %v12025_v25 = vsub.f32 %v1982_v32, %v12009_v43  ;;  %v12101_v32 = vand.u32 4294901760, %v1993_v24 }
 0x15f   : > { %1636 = vmatmul.mubr.f32.gmra.mxu1 %v1202_v15  ;;  %1522 = vmatprep.mubr.f32.mxu0 %v14910_v30  ;;  %v1983_v0 = vmul.f32 0.00390625, %v1971_v1  ;;  %v11996_v15 = vand.u32 4294901760, %v1984_v57 }
 0x160   : > { %1641 = vmatprep.mubr.f32.mxu1 %v14910_v30  ;;  %10222 = vmatprep.subr.mxu1 %v11976_v6  ;;  %v12052_v7 = vand.u32 4294901760, %v12025_v25  ;;  %14929 = vst [vmem:[#allocation21_spill] sm:$0xff] %v12101_v32 }
 0x161   : > { %v12002_v39 = vand.u32 4294901760, %v1983_v0  ;;  %v12006_v59 = vsub.f32 %v1984_v57, %v11996_v15  ;;  %v9636_v57 = vld [vmem:[%s14760_s2 + $0x18] sm:$0xff] }
 0x162   : > { %1525 = vmatmul.mubr.f32.gmra.mxu0 %v11873_v38  ;;  %v1980_v38 = vmul.f32 0.00390625, %v1962_v31  ;;  %v2132_v47 = vsub.f32 %v12025_v25, %v12052_v7 }
 0x163   : > { %1645 = vmatmul.mubr.f32.gmra.mxu1 %v1213_v50  ;;  %1530 = vmatprep.mubr.f32.mxu0 %v14910_v30  ;;  %v1959_v50 = vpop.xlane.xlu1 %1958  ;;  %v12015_v19 = vsub.f32 %v1983_v0, %v12002_v39 }
 0x164   : > { %1650 = vmatprep.mubr.f32.mxu1 %v14910_v30  ;;  %v12038_v63 = vand.u32 4294901760, %v1980_v38  ;;  %v2133_v1 = vand.u32 4294901760, %v2132_v47 }
 0x166   : > { %1533 = vmatmul.mubr.f32.gmra.mxu0 %v11893_v4  ;;  %v1979_v4 = vmul.f32 0.00390625, %v1959_v50  ;;  %v12059_v9 = vsub.f32 %v1980_v38, %v12038_v63  ;;  %v1996_v50 = vsel %vm332_vm0, %v9636_v57, 0 }
 0x167   : > { %1654 = vmatmul.mubr.f32.gmra.mxu1 %v1224_v41  ;;  %1538 = vmatprep.mubr.f32.mxu0 %v14910_v30  ;;  %v12018_v41 = vand.u32 4294901760, %v1981_v10  ;;  %v1956_v45 = vpop.xlane.xlu1 %1955 }
 0x168   : > { %1659 = vmatprep.mubr.f32.mxu1 %v14910_v30  ;;  %v12046_v17 = vand.u32 4294901760, %v1979_v4 }
 0x169   : > { %v12036_v2 = vsub.f32 %v1981_v10, %v12018_v41 }
 0x16a   : > { %1541 = vmatmul.mubr.f32.gmra.mxu0 %v11905_v5  ;;  %v1978_v5 = vmul.f32 0.00390625, %v1956_v45  ;;  %v12074_v37 = vsub.f32 %v1979_v4, %v12046_v17  ;;  %v12113_v4 = vand.u32 4294901760, %v1996_v50 }
 0x16b   : > { %1663 = vmatmul.mubr.f32.gmra.mxu1 %v1235_v46  ;;  %1546 = vmatprep.mubr.f32.mxu0 %v14910_v30  ;;  %v12021_v46 = vand.u32 4294901760, %v12006_v59  ;;  %v12066_v23 = vand.u32 4294901760, %v12036_v2 }
 0x16c   : > { %1668 = vmatprep.mubr.f32.mxu1 %v14910_v30  ;;  %v12099_v0 = vand.u32 4294901760, %v12074_v37  ;;  %14930 = vst [vmem:[#allocation22_spill] sm:$0xff] %v12113_v4 }
 0x16e   : > { %1549 = vmatmul.mubr.f32.gmra.mxu0 %v11920_v18  ;;  %v12063_v18 = vand.u32 4294901760, %v1978_v5 }
 0x16f   : > { %1672 = vmatmul.mubr.f32.gmra.mxu1 %v1246_v3  ;;  %1772 = vmatprep.mubr.f32.mxu0 %v14910_v30  ;;  %v12033_v3 = vand.u32 4294901760, %v12015_v19 }
 0x170   : > { %1677 = vmatprep.mubr.f32.mxu1 %v14910_v30  ;;  %v12087_v31 = vsub.f32 %v1978_v5, %v12063_v18  ;;  %v12119_v5 = vsub.f32 %v1993_v24, %v12101_v32 }
 0x171   : > { %v2125_v51 = vsub.f32 %v12015_v19, %v12033_v3 }
 0x172   : > { %1774 = vmatmul.mubr.f32.vlgmr.msra.gmra.mxu0 %v11786_v53  ;;  %v12110_v45 = vand.u32 4294901760, %v12087_v31  ;;  %14931 = vst [vmem:[#allocation23_spill] sm:$0xff] %v12119_v5  ;;  %v12133_v47 = vand.u32 4294901760, %v12119_v5 }
 0x173   : > { %1681 = vmatmul.mubr.f32.gmra.mxu1 %v1257_v54  ;;  %10204 = vmatpush3.msra.mxu0 %v11942_v11  ;;  %v2118_v54 = vsub.f32 %v12006_v59, %v12021_v46  ;;  %v2126_v13 = vand.u32 4294901760, %v2125_v51 }
 0x174   : > { %10205 = vmatprep.subr.mxu0 %v11996_v15  ;;  %1686 = vmatprep.mubr.f32.mxu1 %v14910_v30  ;;  %v2160_v51 = vsub.f32 %v12087_v31, %v12110_v45  ;;  %14933 = vst [vmem:[#allocation25_spill] sm:$0xff] %v12133_v47 }
 0x175   : > { %10206 = vmatpush3.msra.mxu0 %v11996_v15  ;;  %1779 = vmatprep.mubr.f32.mxu0 %v14910_v30 }
 0x176   : > { %10207 = vmatprep.subr.mxu0 %v12002_v39  ;;  %1781 = vmatmul.mubr.f32.gmra.mxu0 %v11795_v42 }
 0x177   : > { %1690 = vmatmul.mubr.f32.gmra.mxu1 %v1268_v29  ;;  %10208 = vmatpush3.msra.mxu0 %v12002_v39  ;;  %v2119_v29 = vand.u32 4294901760, %v2118_v54 }
 0x178   : > { %10209 = vmatprep.subr.mxu0 %v12009_v43  ;;  %1786 = vmatprep.mubr.f32.mxu0 %v14910_v30 }
 0x179   : > { %10210 = vmatpush3.msra.mxu0 %v12009_v43  ;;  %1897 = vmatprep.mubr.f32.mxu1 %v14910_v30 }
 0x17a   : > { %10211 = vmatprep.subr.mxu0 %v12018_v41  ;;  %1788 = vmatmul.mubr.f32.gmra.mxu0 %v11805_v44 }
 0x17b   : > { %1899 = vmatmul.mubr.f32.vlgmr.msra.gmra.mxu1 %v11786_v53  ;;  %10212 = vmatpush3.msra.mxu0 %v12018_v41  ;;  %v2139_v53 = vsub.f32 %v12036_v2, %v12066_v23 }
 0x17c   : > { %10223 = vmatpush3.msra.mxu1 %v11976_v6  ;;  %10213 = vmatprep.subr.mxu0 %v12038_v63  ;;  %v12093_v6 = vand.u32 4294901760, %v12059_v9 }
 0x17d   : > { %10224 = vmatprep.subr.mxu1 %v2119_v29  ;;  %10214 = vmatpush3.msra.mxu0 %v12038_v63  ;;  %v2140_v10 = vand.u32 4294901760, %v2139_v53 }
 0x17e   : > { %10225 = vmatpush3.msra.mxu1 %v2119_v29  ;;  %1793 = vmatprep.mubr.f32.mxu0 %v14910_v30  ;;  %v2146_v38 = vsub.f32 %v12059_v9, %v12093_v6  ;;  %v12128_v29 = vsub.f32 %v1996_v50, %v12113_v4 }
 0x17f   : > { %1904 = vmatprep.mubr.f32.mxu1 %v14910_v30  ;;  %10215 = vmatprep.subr.mxu0 %v12046_v17 }
 0x180   : > { %10226 = vmatprep.subr.mxu1 %v2126_v13  ;;  %1795 = vmatmul.mubr.f32.gmra.mxu0 %v11822_v33  ;;  %v2147_v54 = vand.u32 4294901760, %v2146_v38  ;;  %14932 = vst [vmem:[#allocation24_spill] sm:$0xff] %v12128_v29  ;;  %v12138_v24 = vand.u32 4294901760, %v12128_v29 }
 0x181   : > { %1906 = vmatmul.mubr.f32.gmra.mxu1 %v11795_v42  ;;  %10216 = vmatpush3.msra.mxu0 %v12046_v17  ;;  %v2153_v42 = vsub.f32 %v12074_v37, %v12099_v0 }
 0x182   : > { %10227 = vmatpush3.msra.mxu1 %v2126_v13  ;;  %10217 = vmatprep.subr.mxu0 %v12063_v18  ;;  %v2161_v13 = vand.u32 4294901760, %v2160_v51  ;;  %14934 = vst [vmem:[#allocation26_spill] sm:$0xff] %v12138_v24  ;;  %v2084_v57 = vsub.f32 %v12128_v29, %v12138_v24 }
 0x183   : > { %10228 = vmatprep.subr.mxu1 %v2133_v1  ;;  %10218 = vmatpush3.msra.mxu0 %v12063_v18  ;;  %v2154_v26 = vand.u32 4294901760, %v2153_v42 }
 0x184   : > { %10229 = vmatpush3.msra.mxu1 %v2133_v1  ;;  %1800 = vmatprep.mubr.f32.mxu0 %v14910_v30  ;;  %v12155_v53 = vand.u32 4294901760, %v2084_v57 }
 0x185   : > { %1911 = vmatprep.mubr.f32.mxu1 %v14910_v30  ;;  %10230 = vmatprep.subr.mxu1 %v2140_v10 }
 0x186   : > { %10241 = vmatprep.subr.mxu0 %v11948_v28  ;;  %1802 = vmatmul.mubr.f32.gmra.mxu0 %v11852_v58  ;;  %14936 = vst [vmem:[#allocation28_spill] sm:$0xff] %v12155_v53 }
 0x187   : > { %1913 = vmatmul.mubr.f32.gmra.mxu1 %v11805_v44  ;;  %1807 = vmatprep.mubr.f32.mxu0 %v14910_v30  ;;  %v2074_v44 = vsub.f32 %v12119_v5, %v12133_v47 }
 0x188   : > { %10231 = vmatpush3.msra.mxu1 %v2140_v10  ;;  %1918 = vmatprep.mubr.f32.mxu1 %v14910_v30  ;;  %v9639_v10 = vld [vmem:[%s14762_s4 + $0x40] sm:$0xff] }
 0x189   : > { %10232 = vmatprep.subr.mxu1 %v2147_v54 }
 0x18a   : > { %10233 = vmatpush3.msra.mxu1 %v2147_v54  ;;  %1809 = vmatmul.mubr.f32.gmra.mxu0 %v11875_v56  ;;  %v2599_v54 = vsel %vm1095_vm1, %v9639_v10, 0 }
 0x18b   : > { %10234 = vmatprep.subr.mxu1 %v2154_v26  ;;  %1920 = vmatmul.mubr.f32.gmra.mxu1 %v11822_v33  ;;  %v12150_v33 = vand.u32 4294901760, %v2074_v44 }
 0x18c   : > { %10235 = vmatpush3.msra.mxu1 %v2154_v26  ;;  %1814 = vmatprep.mubr.f32.mxu0 %v14910_v30  ;;  %v12287_v26 = vand.u32 4294901760, %v2599_v54 }
 0x18d   : > { %10236 = vmatprep.subr.mxu1 %v2161_v13  ;;  %1925 = vmatprep.mubr.f32.mxu1 %v14910_v30  ;;  %14935 = vst [vmem:[#allocation27_spill] sm:$0xff] %v12150_v33 }
 0x18e   : > { %10237 = vmatpush3.msra.mxu1 %v2161_v13  ;;  %1816 = vmatmul.mubr.f32.gmra.mxu0 %v11895_v14  ;;  %14951 = vst [vmem:[#allocation43_spill] sm:$0xff] %v12287_v26  ;;  %v12290_v57 = vsub.f32 %v2599_v54, %v12287_v26 }
 0x18f   : > { %10260 = vmatprep.subr.mxu1 %v11942_v11  ;;  %1927 = vmatmul.mubr.f32.gmra.mxu1 %v11852_v58  ;;  %v12236_v58 = vpop.xlane.xlu1 %3404 }
 0x190   : > { %1821 = vmatprep.mubr.f32.mxu0 %v14910_v30  ;;  %1932 = vmatprep.mubr.f32.mxu1 %v14910_v30  ;;  %14952 = vst [vmem:[#allocation44_spill] sm:$0xff] %v12290_v57 }
 0x192   : > { %1823 = vmatmul.mubr.f32.gmra.mxu0 %v11907_v36 }
 0x193   : > { %1934 = vmatmul.mubr.f32.gmra.mxu1 %v11875_v56  ;;  %10219 = vmatprep.mubr.f32.mxu0 %v12150_v33  ;;  %v12238_v56 = vpop.xlane.xlu1 %3401 }
 0x194   : > { %1939 = vmatprep.mubr.f32.mxu1 %v14910_v30 }
 0x196   : > { %10220 = vmatmul.mubr.f32.vlgmr.msra.gmra.mxu0 %v12155_v53 }
 0x197   : > { %1941 = vmatmul.mubr.f32.gmra.mxu1 %v11895_v14  ;;  %10242 = vmatpush3.msra.mxu0 %v11948_v28  ;;  %v12240_v14 = vpop.xlane.xlu0 %3395 }
 0x198   : > { %10243 = vmatprep.subr.mxu0 %v12006_v59  ;;  %1946 = vmatprep.mubr.f32.mxu1 %v14910_v30 }
 0x199   : > { %10244 = vmatpush3.msra.mxu0 %v12006_v59  ;;  %10257 = vmatprep.mubr.f32.mxu0 %v12119_v5 }
 0x19a   : > { %10245 = vmatprep.subr.mxu0 %v12015_v19 }
 0x19b   : > { %1948 = vmatmul.mubr.f32.gmra.mxu1 %v11907_v36  ;;  %10246 = vmatpush3.msra.mxu0 %v12015_v19  ;;  %v12242_v36 = vpop.xlane.xlu1 %3398 }
 0x19c   : > { %10247 = vmatprep.subr.mxu0 %v12025_v25  ;;  %10238 = vmatprep.mubr.f32.mxu1 %v12101_v32 }
 0x19d   : > { %10248 = vmatpush3.msra.mxu0 %v12025_v25 }
 0x19e   : > { %10249 = vmatprep.subr.mxu0 %v12036_v2 }
 0x19f   : > { %10239 = vmatmul.mubr.f32.vlgmr.msra.gmra.mxu1 %v12113_v4  ;;  %10250 = vmatpush3.msra.mxu0 %v12036_v2  ;;  %v12246_v28 = vpop.xlane.xlu1 %3392 }
 0x1a0   : > { %10261 = vmatpush3.msra.mxu1 %v11942_v11  ;;  %10251 = vmatprep.subr.mxu0 %v12059_v9 }
 0x1a1   : > { %10262 = vmatprep.subr.mxu1 %v11996_v15  ;;  %10252 = vmatpush3.msra.mxu0 %v12059_v9 }
 0x1a2   : > { %10263 = vmatpush3.msra.mxu1 %v11996_v15  ;;  %10253 = vmatprep.subr.mxu0 %v12074_v37 }
 0x1a3   : > { %10264 = vmatprep.subr.mxu1 %v12002_v39  ;;  %10254 = vmatpush3.msra.mxu0 %v12074_v37 }
 0x1a4   : > { %10265 = vmatpush3.msra.mxu1 %v12002_v39  ;;  %10255 = vmatprep.subr.mxu0 %v12087_v31 }
 0x1a5   : > { %10266 = vmatprep.subr.mxu1 %v12009_v43  ;;  %10256 = vmatpush3.msra.mxu0 %v12087_v31 }
 0x1a6   : > { %10267 = vmatpush3.msra.mxu1 %v12009_v43  ;;  %10258 = vmatmul.mubr.f32.vlgmr.msra.gmra.mxu0 %v12128_v29 }
 0x1a7   : > { %10268 = vmatprep.subr.mxu1 %v12018_v41  ;;  %10279 = vmatprep.subr.mxu0 %v11958_v22 }
 0x1a8   : > { %10269 = vmatpush3.msra.mxu1 %v12018_v41  ;;  %10280 = vmatpush3.msra.mxu0 %v11958_v22 }
 0x1a9   : > { %10270 = vmatprep.subr.mxu1 %v12038_v63  ;;  %10281 = vmatprep.subr.mxu0 %v12021_v46 }
 0x1aa   : > { %10271 = vmatpush3.msra.mxu1 %v12038_v63  ;;  %10282 = vmatpush3.msra.mxu0 %v12021_v46 }
 0x1ab   : > { %10272 = vmatprep.subr.mxu1 %v12046_v17  ;;  %10283 = vmatprep.subr.mxu0 %v12033_v3 }
 0x1ac   : > { %10273 = vmatpush3.msra.mxu1 %v12046_v17  ;;  %10284 = vmatpush3.msra.mxu0 %v12033_v3 }
 0x1ad   : > { %10274 = vmatprep.subr.mxu1 %v12063_v18  ;;  %10285 = vmatprep.subr.mxu0 %v12052_v7 }
 0x1ae   : > { %10275 = vmatpush3.msra.mxu1 %v12063_v18  ;;  %10276 = vmatprep.mubr.f32.mxu1 %v12133_v47 }
 0x1af   : > { %10286 = vmatpush3.msra.mxu0 %v12052_v7  ;;  %10277 = vmatmul.mubr.f32.vlgmr.msra.gmra.mxu1 %v12138_v24 }
 0x1b0   : > { %10287 = vmatprep.subr.mxu0 %v12066_v23  ;;  %10298 = vmatprep.subr.mxu1 %v11942_v11 }
 0x1b1   : > { %10288 = vmatpush3.msra.mxu0 %v12066_v23  ;;  %10299 = vmatpush3.msra.mxu1 %v11942_v11  ;;  %v12244_v11 = vpop.xlane.xlu0 %3389 }
 0x1b2   : > { %10289 = vmatprep.subr.mxu0 %v12093_v6  ;;  %10300 = vmatprep.subr.mxu1 %v11996_v15 }
 0x1b3   : > { %10290 = vmatpush3.msra.mxu0 %v12093_v6  ;;  %10301 = vmatpush3.msra.mxu1 %v11996_v15  ;;  %v12250_v15 = vpop.xlane.xlu1 %3386 }
 0x1b4   : > { %10291 = vmatprep.subr.mxu0 %v12099_v0  ;;  %10302 = vmatprep.subr.mxu1 %v12002_v39 }
 0x1b5   : > { %10292 = vmatpush3.msra.mxu0 %v12099_v0  ;;  %10303 = vmatpush3.msra.mxu1 %v12002_v39  ;;  %v12248_v22 = vpop.xlane.xlu0 %3383 }
 0x1b6   : > { %10293 = vmatprep.subr.mxu0 %v12110_v45  ;;  %10304 = vmatprep.subr.mxu1 %v12009_v43 }
 0x1b7   : > { %10294 = vmatpush3.msra.mxu0 %v12110_v45  ;;  %10295 = vmatprep.mubr.f32.mxu0 %v12101_v32  ;;  %v12254_v59 = vpop.permute.xlu1 %1092 }
 0x1b8   : > { %10305 = vmatpush3.msra.mxu1 %v12009_v43  ;;  %10296 = vmatmul.mubr.f32.vlgmr.msra.gmra.mxu0 %v12113_v4  ;;  %14938 = vst [vmem:[#allocation30_spill] sm:$0xff] %v12254_v59 }
 0x1b9   : > { %10306 = vmatprep.subr.mxu1 %v12018_v41  ;;  %10314 = vmatprep.mubr.f32.mxu1 %v12101_v32  ;;  %v12252_v39 = vpop.permute.xlu0 %1087 }
 0x1ba   : > { %10307 = vmatpush3.msra.mxu1 %v12018_v41  ;;  %14937 = vst [vmem:[#allocation29_spill] sm:$0xff] %v12252_v39 }
 0x1bb   : > { %10308 = vmatprep.subr.mxu1 %v12038_v63  ;;  %v12258_v19 = vpop.permute.xlu1 %1082 }
 0x1bc   : > { %10309 = vmatpush3.msra.mxu1 %v12038_v63  ;;  %14940 = vst [vmem:[#allocation32_spill] sm:$0xff] %v12258_v19 }
 0x1bd   : > { %10310 = vmatprep.subr.mxu1 %v12046_v17  ;;  %v12256_v43 = vpop.permute.xlu0 %1072 }
 0x1be   : > { %10311 = vmatpush3.msra.mxu1 %v12046_v17  ;;  %14939 = vst [vmem:[#allocation31_spill] sm:$0xff] %v12256_v43 }
 0x1bf   : > { %10312 = vmatprep.subr.mxu1 %v12063_v18  ;;  %v12264_v2 = vpop.permute.xlu1 %1077 }
 0x1c0   : > { %10313 = vmatpush3.msra.mxu1 %v12063_v18  ;;  %14943 = vst [vmem:[#allocation35_spill] sm:$0xff] %v12264_v2 }
 0x1c1   : > { %10315 = vmatmul.mubr.f32.vlgmr.msra.gmra.mxu1 %v12113_v4  ;;  %v12260_v41 = vpop.permute.xlu0 %1062 }
 0x1c2   : > { %14941 = vst [vmem:[#allocation33_spill] sm:$0xff] %v12260_v41  ;;  %10337 = vmatprep.mubr.f32.mxu1 %v12287_v26 }
 0x1c3   : > { %v12275_v6 = vpop.permute.xlu1 %1067 }
 0x1c4   : > { %14948 = vst [vmem:[#allocation40_spill] sm:$0xff] %v12275_v6 }
 0x1c5   : > { %v12266_v63 = vpop.permute.xlu0 %1057 }
 0x1c6   : > { %14944 = vst [vmem:[#allocation36_spill] sm:$0xff] %v12266_v63 }
 0x1f2   : > { %v1195_v46 = vpop.f32.mrf.mxu0 }
 0x1f3   : > { %v1196_v7 = vadd.f32 %v1195_v46, %v12266_v63 }
 0x1f4   : > { %v12262_v25 = vpop.f32.mrf.mxu0 }
 0x1f5   : > { %14942 = vst [vmem:[#allocation34_spill] sm:$0xff] %v12262_v25 }
 0x1f6   : > { %v1206_v3 = vpop.f32.mrf.mxu0 }
 0x1f7   : > { %v1207_v1 = vadd.f32 %v1206_v3, %v12260_v41 }
 0x1f8   : > { %v12268_v17 = vpop.f32.mrf.mxu0 }
 0x1f9   : > { %14945 = vst [vmem:[#allocation37_spill] sm:$0xff] %v12268_v17  ;;  %v9665_v17 = vld [vmem:[%s14762_s4 + $0xb0] sm:$0xff] }
 0x1fa   : > { %v1217_v9 = vpop.f32.mrf.mxu0  ;;  %v1364_v18 = vpop.f32.mrf.mxu1 }
 0x1fb   : > { %v1365_v23 = vadd.f32 %v1364_v18, %v1196_v7  ;;  %v1218_v45 = vadd.f32 %v1217_v9, %v12275_v6  ;;  %v12298_v9 = vand.u32 4294901760, %v12290_v57 }
 0x1fc   : > { %v12271_v37 = vpop.f32.mrf.mxu0  ;;  %v12273_v31 = vpop.f32.mrf.mxu1 }
 0x1fd   : > { %14946 = vst [vmem:[#allocation38_spill] sm:$0xff] %v12271_v37  ;;  %14947 = vst [vmem:[#allocation39_spill] sm:$0xff] %v12273_v31  ;;  %v2692_v10 = vsub.f32 %v12290_v57, %v12298_v9 }
 0x1fe   : > { %v1228_v0 = vpop.f32.mrf.mxu0  ;;  %14955 = vst [vmem:[#allocation47_spill] sm:$0xff] %v12298_v9 }
 0x1ff   : > { %v1371_v50 = vpop.f32.mrf.mxu1  ;;  %v1229_v18 = vadd.f32 %v1228_v0, %v12256_v43 }
 0x200   : > { %v1372_v38 = vadd.f32 %v1371_v50, %v1207_v1  ;;  %v12282_v42 = vpop.f32.mrf.mxu0 }
 0x201   : > { %14949 = vst [vmem:[#allocation41_spill] sm:$0xff] %v12282_v42  ;;  %v12285_v51 = vpop.f32.mrf.mxu1 }
 0x202   : > { %14950 = vst [vmem:[#allocation42_spill] sm:$0xff] %v12285_v51  ;;  %v1239_v13 = vpop.f32.mrf.mxu0 }
 0x203   : > { %v1378_v44 = vpop.f32.mrf.mxu1  ;;  %v1240_v54 = vadd.f32 %v1239_v13, %v12264_v2 }
 0x204   : > { %v1379_v46 = vadd.f32 %v1378_v44, %v1218_v45  ;;  %v12293_v3 = vpop.f32.mrf.mxu0  ;;  %v12308_v44 = vand.u32 4294901760, %v2692_v10 }
 0x205   : > { %14953 = vst [vmem:[#allocation45_spill] sm:$0xff] %v12293_v3  ;;  %v12295_v7 = vpop.f32.mrf.mxu1 }
 0x206   : > { %14954 = vst [vmem:[#allocation46_spill] sm:$0xff] %v12295_v7  ;;  %v1250_v1 = vpop.f32.mrf.mxu0  ;;  %14958 = vst [vmem:[#allocation50_spill] sm:$0xff] %v12308_v44  ;;  %10321 = vmatprep.mubr.f32.mxu0 %v12308_v44 }
 0x207   : > { %v1385_v50 = vpop.f32.mrf.mxu1  ;;  %v1251_v0 = vadd.f32 %v1250_v1, %v12258_v19 }
 0x208   : > { %v1386_v24 = vadd.f32 %v1385_v50, %v1229_v18  ;;  %v12304_v47 = vpop.f32.mrf.mxu0 }
 0x209   : > { %14956 = vst [vmem:[#allocation48_spill] sm:$0xff] %v12304_v47  ;;  %v12306_v45 = vpop.f32.mrf.mxu1 }
 0x20a   : > { %14957 = vst [vmem:[#allocation49_spill] sm:$0xff] %v12306_v45  ;;  %v1261_v29 = vpop.f32.mrf.mxu0 }
 0x20b   : > { %v1392_v4 = vpop.f32.mrf.mxu1  ;;  %v1262_v10 = vadd.f32 %v1261_v29, %v12252_v39 }
 0x20c   : > { %v1393_v32 = vadd.f32 %v1392_v4, %v1240_v54  ;;  %v12312_v5 = vpop.f32.mrf.mxu0 }
 0x20d   : > { %14959 = vst [vmem:[#allocation51_spill] sm:$0xff] %v12312_v5  ;;  %v12314_v53 = vpop.f32.mrf.mxu1 }
 0x20e   : > { %14960 = vst [vmem:[#allocation52_spill] sm:$0xff] %v12314_v53  ;;  %v1272_v33 = vpop.f32.mrf.mxu0 }
 0x20f   : > { %v1399_v13 = vpop.f32.mrf.mxu1  ;;  %v1273_v44 = vadd.f32 %v1272_v33, %v12254_v59 }
 0x210   : > { %v1400_v18 = vadd.f32 %v1399_v13, %v1251_v0  ;;  %v12316_v50 = vpop.f32.mrf.mxu0 }
 0x211   : > { %14961 = vst [vmem:[#allocation53_spill] sm:$0xff] %v12316_v50  ;;  %v12318_v52 = vpop.f32.mrf.mxu1  ;;  %v4037_v50 = vsel %vm1095_vm1, %v9665_v17, 0 }
 0x212   : > { %14962 = vst [vmem:[#allocation54_spill] sm:$0xff] %v12318_v52  ;;  %v1494_v12 = vpop.f32.mrf.mxu0 }
 0x213   : > { %v1406_v62 = vpop.f32.mrf.mxu1  ;;  %v1495_v8 = vadd.f32 %v1494_v12, %v1365_v23 }
 0x214   : > { %v1407_v1 = vadd.f32 %v1406_v62, %v1262_v10  ;;  %v12322_v4 = vpop.f32.mrf.mxu0 }
 0x215   : > { %14963 = vst [vmem:[#allocation55_spill] sm:$0xff] %v12322_v4  ;;  %v12324_v54 = vpop.f32.mrf.mxu1 }
 0x216   : > { %14964 = vst [vmem:[#allocation56_spill] sm:$0xff] %v12324_v54  ;;  %v1502_v61 = vpop.f32.mrf.mxu0 }
 0x217   : > { %v1413_v40 = vpop.f32.mrf.mxu1  ;;  %v1503_v48 = vadd.f32 %v1502_v61, %v1372_v38 }
 0x218   : > { %v1414_v0 = vadd.f32 %v1413_v40, %v1273_v44  ;;  %v12326_v13 = vpop.f32.mrf.mxu0 }
 0x219   : > { %14965 = vst [vmem:[#allocation57_spill] sm:$0xff] %v12326_v13  ;;  %v12328_v21 = vpop.f32.mrf.mxu1 }
 0x21a   : > { %14966 = vst [vmem:[#allocation58_spill] sm:$0xff] %v12328_v21  ;;  %v1510_v60 = vpop.f32.mrf.mxu0 }
 0x21b   : > { %v1511_v29 = vadd.f32 %v1510_v60, %v1379_v46  ;;  %v1628_v27 = vpop.f32.mrf.mxu1 }
 0x21c   : > { %v1629_v16 = vadd.f32 %v1628_v27, %v1495_v8  ;;  %v12330_v12 = vpop.f32.mrf.mxu0 }
 0x21d   : > { %14967 = vst [vmem:[#allocation59_spill] sm:$0xff] %v12330_v12  ;;  %v12332_v33 = vpop.f32.mrf.mxu1 }
 0x21e   : > { %14968 = vst [vmem:[#allocation60_spill] sm:$0xff] %v12332_v33  ;;  %v1518_v62 = vpop.f32.mrf.mxu0 }
 0x21f   : > { %v1519_v23 = vadd.f32 %v1518_v62, %v1386_v24  ;;  %v1637_v10 = vpop.f32.mrf.mxu1 }
 0x220   : > { %v1638_v20 = vadd.f32 %v1637_v10, %v1503_v48  ;;  %v12334_v49 = vpop.f32.mrf.mxu0 }
 0x221   : > { %14969 = vst [vmem:[#allocation61_spill] sm:$0xff] %v12334_v49  ;;  %v12336_v61 = vpop.f32.mrf.mxu1 }
 0x222   : > { %14970 = vst [vmem:[#allocation62_spill] sm:$0xff] %v12336_v61  ;;  %v1526_v40 = vpop.f32.mrf.mxu0 }
 0x223   : > { %v1527_v38 = vadd.f32 %v1526_v40, %v1393_v32  ;;  %v1646_v44 = vpop.f32.mrf.mxu1 }
 0x224   : > { %v1647_v55 = vadd.f32 %v1646_v44, %v1511_v29  ;;  %v12338_v34 = vpop.f32.mrf.mxu0 }
 0x225   : > { %14971 = vst [vmem:[#allocation63_spill] sm:$0xff] %v12338_v34  ;;  %v12340_v60 = vpop.f32.mrf.mxu1 }
 0x226   : > { %14972 = vst [vmem:[#allocation64_spill] sm:$0xff] %v12340_v60  ;;  %v1534_v27 = vpop.f32.mrf.mxu0 }
 0x227   : > { %v1535_v8 = vadd.f32 %v1534_v27, %v1400_v18  ;;  %v1655_v46 = vpop.f32.mrf.mxu1 }
 0x228   : > { %v1656_v35 = vadd.f32 %v1655_v46, %v1519_v23  ;;  %v12342_v33 = vpop.f32.mrf.mxu0 }
 0x229   : > { %14973 = vst [vmem:[#allocation65_spill] sm:$0xff] %v12342_v33  ;;  %v12344_v24 = vpop.f32.mrf.mxu1 }
 0x22a   : > { %14974 = vst [vmem:[#allocation66_spill] sm:$0xff] %v12344_v24  ;;  %v1542_v48 = vpop.f32.mrf.mxu0 }
 0x22b   : > { %v1543_v62 = vadd.f32 %v1542_v48, %v1407_v1  ;;  %v1664_v10 = vpop.f32.mrf.mxu1 }
 0x22c   : > { %v1665_v4 = vadd.f32 %v1664_v10, %v1527_v38  ;;  %v12346_v12 = vpop.f32.mrf.mxu0 }
 0x22d   : > { %14975 = vst [vmem:[#allocation67_spill] sm:$0xff] %v12346_v12  ;;  %v12348_v32 = vpop.f32.mrf.mxu1 }
 0x22e   : > { %14976 = vst [vmem:[#allocation68_spill] sm:$0xff] %v12348_v32  ;;  %v1550_v29 = vpop.f32.mrf.mxu0 }
 0x22f   : > { %v1551_v40 = vadd.f32 %v1550_v29, %v1414_v0  ;;  %v1673_v44 = vpop.f32.mrf.mxu1 }
 0x230   : > { %v1674_v60 = vadd.f32 %v1673_v44, %v1535_v8  ;;  %v12350_v34 = vpop.f32.mrf.mxu0 }
 0x231   : > { %14977 = vst [vmem:[#allocation69_spill] sm:$0xff] %v12350_v34  ;;  %v12352_v18 = vpop.f32.mrf.mxu1 }
 0x232   : > { %14978 = vst [vmem:[#allocation70_spill] sm:$0xff] %v12352_v18  ;;  %v1775_v23 = vpop.f32.mrf.mxu0 }
 0x233   : > { %v1682_v27 = vpop.f32.mrf.mxu1  ;;  %v1776_v46 = vadd.f32 %v1775_v23, %v1629_v16 }
 0x234   : > { %v1683_v61 = vadd.f32 %v1682_v27, %v1543_v62  ;;  %v12354_v7 = vpop.f32.mrf.mxu0 }
 0x235   : > { %14979 = vst [vmem:[#allocation71_spill] sm:$0xff] %v12354_v7  ;;  %v12356_v1 = vpop.f32.mrf.mxu1 }
 0x236   : > { %14980 = vst [vmem:[#allocation72_spill] sm:$0xff] %v12356_v1  ;;  %v1782_v38 = vpop.f32.mrf.mxu0 }
 0x237   : > { %v1691_v48 = vpop.f32.mrf.mxu1  ;;  %v1783_v10 = vadd.f32 %v1782_v38, %v1638_v20 }
 0x238   : > { %v1692_v32 = vadd.f32 %v1691_v48, %v1551_v40  ;;  %v12358_v12 = vpop.f32.mrf.mxu0 }
 0x239   : > { %14981 = vst [vmem:[#allocation73_spill] sm:$0xff] %v12358_v12  ;;  %v12360_v0 = vpop.f32.mrf.mxu1 }
 0x23a   : > { %14982 = vst [vmem:[#allocation74_spill] sm:$0xff] %v12360_v0  ;;  %v1789_v8 = vpop.f32.mrf.mxu0 }
 0x23b   : > { %v1790_v29 = vadd.f32 %v1789_v8, %v1647_v55  ;;  %v1900_v44 = vpop.f32.mrf.mxu1 }
 0x23c   : > { %v12362_v13 = vadd.f32 %v1900_v44, %v1776_v46  ;;  %v12364_v54 = vpop.f32.mrf.mxu0 }
 0x23d   : > { %14984 = vst [vmem:[#allocation76_spill] sm:$0xff] %v12364_v54  ;;  %v12366_v16 = vpop.f32.mrf.mxu1 }
 0x23e   : > { %14983 = vst [vmem:[#allocation75_spill] sm:$0xff] %v12362_v13  ;;  %14985 = vst [vmem:[#allocation77_spill] sm:$0xff] %v12366_v16 }
 0x240   : > { %v1796_v62 = vpop.f32.mrf.mxu0 }
 0x241   : > { %v1797_v23 = vadd.f32 %v1796_v62, %v1656_v35  ;;  %v1907_v27 = vpop.f32.mrf.mxu1 }
 0x242   : > { %v12368_v7 = vadd.f32 %v1907_v27, %v1783_v10  ;;  %v12370_v20 = vpop.f32.mrf.mxu0 }
 0x243   : > { %14987 = vst [vmem:[#allocation79_spill] sm:$0xff] %v12370_v20  ;;  %v12372_v40 = vpop.f32.mrf.mxu1  ;;  %v9645_v20 = vld [vmem:[%s14762_s4 + $0x70] sm:$0xff] }
 0x244   : > { %14986 = vst [vmem:[#allocation78_spill] sm:$0xff] %v12368_v7  ;;  %14988 = vst [vmem:[#allocation80_spill] sm:$0xff] %v12372_v40  ;;  %v2617_v24 = vsel %vm1095_vm1, %v9645_v20, 0 }
 0x245   : > { %v12464_v20 = vand.u32 4294901760, %v2617_v24 }
 0x246   : > { %v1803_v38 = vpop.f32.mrf.mxu0 }
 0x247   : > { %v1804_v48 = vadd.f32 %v1803_v38, %v1665_v4  ;;  %v1914_v12 = vpop.f32.mrf.mxu1  ;;  %15015 = vst [vmem:[#allocation107_spill] sm:$0xff] %v12464_v20 }
 0x248   : > { %v12374_v55 = vadd.f32 %v1914_v12, %v1790_v29  ;;  %v12376_v46 = vpop.f32.mrf.mxu0 }
 0x249   : > { %14990 = vst [vmem:[#allocation82_spill] sm:$0xff] %v12376_v46  ;;  %v12378_v8 = vpop.f32.mrf.mxu1 }
 0x24a   : > { %14989 = vst [vmem:[#allocation81_spill] sm:$0xff] %v12374_v55  ;;  %14991 = vst [vmem:[#allocation83_spill] sm:$0xff] %v12378_v8  ;;  %v1810_v44 = vpop.f32.mrf.mxu0 }
 0x24b   : > { %v1811_v13 = vadd.f32 %v1810_v44, %v1674_v60  ;;  %v1921_v16 = vpop.f32.mrf.mxu1 }
 0x24c   : > { %v12380_v35 = vadd.f32 %v1921_v16, %v1797_v23  ;;  %v12382_v10 = vpop.f32.mrf.mxu0 }
 0x24d   : > { %14993 = vst [vmem:[#allocation85_spill] sm:$0xff] %v12382_v10  ;;  %v12384_v62 = vpop.f32.mrf.mxu1 }
 0x24e   : > { %14992 = vst [vmem:[#allocation84_spill] sm:$0xff] %v12380_v35  ;;  %14994 = vst [vmem:[#allocation86_spill] sm:$0xff] %v12384_v62  ;;  %v1817_v27 = vpop.f32.mrf.mxu0 }
 0x24f   : > { %v1818_v54 = vadd.f32 %v1817_v27, %v1683_v61  ;;  %v1928_v7 = vpop.f32.mrf.mxu1 }
 0x250   : > { %v12386_v4 = vadd.f32 %v1928_v7, %v1804_v48  ;;  %v12388_v12 = vpop.f32.mrf.mxu0 }
 0x251   : > { %14996 = vst [vmem:[#allocation88_spill] sm:$0xff] %v12388_v12  ;;  %v12390_v29 = vpop.f32.mrf.mxu1 }
 0x252   : > { %14995 = vst [vmem:[#allocation87_spill] sm:$0xff] %v12386_v4  ;;  %14997 = vst [vmem:[#allocation89_spill] sm:$0xff] %v12390_v29  ;;  %v1824_v38 = vpop.f32.mrf.mxu0 }
 0x253   : > { %v1825_v55 = vadd.f32 %v1824_v38, %v1692_v32  ;;  %v1935_v8 = vpop.f32.mrf.mxu1  ;;  %v9638_v32 = vld [vmem:[%s14761_s3 + $0x18] sm:$0xff] }
 0x254   : > { %v12392_v60 = vadd.f32 %v1935_v8, %v1811_v13  ;;  %v12402_v7 = vpop.f32.mrf.mxu0  ;;  %v9640_v13 = vld [vmem:[%s14762_s4 + $0x48] sm:$0xff] }
 0x255   : > { %v12394_v16 = vpop.f32.mrf.mxu1  ;;  %15003 = vst [vmem:[#allocation95_spill] sm:$0xff] %v12402_v7  ;;  %v2602_v38 = vsel %vm1095_vm1, %v9640_v13, 0  ;;  %v9643_v13 = vld [vmem:[%s14762_s4 + $0x60] sm:$0xff] }
 0x256   : > { %14998 = vst [vmem:[#allocation90_spill] sm:$0xff] %v12392_v60  ;;  %14999 = vst [vmem:[#allocation91_spill] sm:$0xff] %v12394_v16  ;;  %v10221_v48 = vpop.f32.mrf.mxu0  ;;  %v12423_v40 = vand.u32 4294901760, %v2602_v38 }
 0x257   : > { %v1942_v23 = vpop.f32.mrf.mxu1  ;;  %v2088_v29 = vadd.f32 %v10221_v48, %v9638_v32 }
 0x258   : > { %v12396_v44 = vadd.f32 %v1942_v23, %v1818_v54  ;;  %v2077_v54 = vpop.f32.mrf.mxu0  ;;  %15005 = vst [vmem:[#allocation97_spill] sm:$0xff] %v12423_v40  ;;  %v12435_v7 = vsub.f32 %v2602_v38, %v12423_v40 }
 0x259   : > { %v12398_v46 = vpop.f32.mrf.mxu1 }
 0x25a   : > { %15000 = vst [vmem:[#allocation92_spill] sm:$0xff] %v12396_v44  ;;  %15001 = vst [vmem:[#allocation93_spill] sm:$0xff] %v12398_v46  ;;  %v9637_v46 = vld [vmem:[%s14761_s3 + $0x10] sm:$0xff] }
 0x25b   : > { %v1949_v61 = vpop.f32.mrf.mxu1  ;;  %v2078_v48 = vadd.f32 %v9637_v46, %v2077_v54  ;;  %15007 = vst [vmem:[#allocation99_spill] sm:$0xff] %v12435_v7 }
 0x25c   : > { %v12400_v27 = vadd.f32 %v1949_v61, %v1825_v55  ;;  %v9641_v55 = vld [vmem:[%s14762_s4 + $0x50] sm:$0xff]  ;;  %v9642_v61 = vld [vmem:[%s14762_s4 + $0x58] sm:$0xff] }
 0x25d   : > { %v12404_v4 = vpop.f32.mrf.mxu1  ;;  %v2605_v44 = vsel %vm1095_vm1, %v9641_v55, 0  ;;  %v9644_v55 = vld [vmem:[%s14762_s4 + $0x68] sm:$0xff] }
 0x25e   : > { %15002 = vst [vmem:[#allocation94_spill] sm:$0xff] %v12400_v27  ;;  %15004 = vst [vmem:[#allocation96_spill] sm:$0xff] %v12404_v4  ;;  %v2608_v27 = vsel %vm1095_vm1, %v9642_v61, 0  ;;  %v12429_v1 = vand.u32 4294901760, %v2605_v44  ;;  %v2611_v61 = vsel %vm1095_vm1, %v9643_v13, 0  ;;  %v2614_v54 = vsel %vm1095_vm1, %v9644_v55, 0 }
 0x25f   : > { %v10240_v8 = vpop.f32.mrf.mxu1  ;;  %v12437_v60 = vand.u32 4294901760, %v2608_v27  ;;  %v12447_v38 = vand.u32 4294901760, %v2611_v61  ;;  %v9646_v13 = vld [vmem:[%s14762_s4 + $0x78] sm:$0xff] }
 0x260   : > { %15006 = vst [vmem:[#allocation98_spill] sm:$0xff] %v12429_v1  ;;  %v2205_v32 = vadd.f32 %v10240_v8, %v2088_v29  ;;  %v12444_v29 = vsub.f32 %v2605_v44, %v12429_v1 }
 0x261   : > { %v2198_v12 = vpop.f32.mrf.mxu1  ;;  %15008 = vst [vmem:[#allocation100_spill] sm:$0xff] %v12437_v60  ;;  %15010 = vst [vmem:[#allocation102_spill] sm:$0xff] %v12447_v38  ;;  %v12468_v6 = vsub.f32 %v2611_v61, %v12447_v38  ;;  %v12483_v61 = vsub.f32 %v2617_v24, %v12464_v20 }
 0x262   : > { %v2199_v0 = vadd.f32 %v2198_v12, %v2078_v48  ;;  %15009 = vst [vmem:[#allocation101_spill] sm:$0xff] %v12444_v29  ;;  %v12454_v12 = vand.u32 4294901760, %v12435_v7 }
 0x263   : > { %15016 = vst [vmem:[#allocation108_spill] sm:$0xff] %v12468_v6  ;;  %15020 = vst [vmem:[#allocation112_spill] sm:$0xff] %v12483_v61 }
 0x264   : > { %15011 = vst [vmem:[#allocation103_spill] sm:$0xff] %v12454_v12 }
 0x266   : > { %v10259_v23 = vpop.f32.mrf.mxu0 }
 0x267   : > { %v2300_v53 = vadd.f32 %v10259_v23, %v2205_v32  ;;  %v12457_v23 = vsub.f32 %v2608_v27, %v12437_v60  ;;  %v12459_v32 = vand.u32 4294901760, %v2614_v54  ;;  %v2702_v27 = vsub.f32 %v12435_v7, %v12454_v12 }
 0x268   : > { %v2292_v35 = vpop.f32.mrf.mxu0 }
 0x269   : > { %v2293_v8 = vadd.f32 %v2292_v35, %v2199_v0  ;;  %15012 = vst [vmem:[#allocation104_spill] sm:$0xff] %v12457_v23  ;;  %15013 = vst [vmem:[#allocation105_spill] sm:$0xff] %v12459_v32  ;;  %v12462_v0 = vand.u32 4294901760, %v12444_v29  ;;  %v2620_v35 = vsel %vm1095_vm1, %v9646_v13, 0 }
 0x26a   : > { %v12478_v34 = vand.u32 4294901760, %v2620_v35 }
 0x26b   : > { %15014 = vst [vmem:[#allocation106_spill] sm:$0xff] %v12462_v0 }
 0x26c   : > { %15019 = vst [vmem:[#allocation111_spill] sm:$0xff] %v12478_v34 }
 0x26f   : > { %v10278_v4 = vpop.f32.mrf.mxu1 }
 0x270   : > { %v2389_v16 = vadd.f32 %v10278_v4, %v2300_v53 }
 0x271   : > { %v2380_v46 = vpop.f32.mrf.mxu1 }
 0x272   : > { %v2381_v44 = vadd.f32 %v2380_v46, %v2293_v8  ;;  %v12476_v8 = vsub.f32 %v2614_v54, %v12459_v32 }
 0x274   : > { %15018 = vst [vmem:[#allocation110_spill] sm:$0xff] %v12476_v8  ;;  %v12499_v24 = vand.u32 4294901760, %v12476_v8 }
 0x276   : > { %15023 = vst [vmem:[#allocation115_spill] sm:$0xff] %v12499_v24  ;;  %v2742_v2 = vsub.f32 %v12476_v8, %v12499_v24 }
 0x278   : > { %v10297_v62 = vpop.f32.mrf.mxu0  ;;  %v12529_v25 = vand.u32 4294901760, %v2742_v2 }
 0x279   : > { %v2490_v48 = vadd.f32 %v10297_v62, %v2389_v16  ;;  %v12473_v62 = vand.u32 4294901760, %v12457_v23 }
 0x27a   : > { %v2483_v37 = vpop.f32.mrf.mxu0  ;;  %15030 = vst [vmem:[#allocation122_spill] sm:$0xff] %v12529_v25 }
 0x27b   : > { %v2484_v4 = vadd.f32 %v2483_v37, %v2381_v44  ;;  %15017 = vst [vmem:[#allocation109_spill] sm:$0xff] %v12473_v62  ;;  %v2712_v37 = vsub.f32 %v12444_v29, %v12462_v0 }
 0x281   : > { %v10316_v53 = vpop.f32.mrf.mxu1 }
 0x282   : > { %v2575_v55 = vadd.f32 %v10316_v53, %v2490_v48  ;;  %v12488_v48 = vand.u32 4294901760, %v12468_v6  ;;  %v12490_v53 = vand.u32 4294901760, %v2702_v27  ;;  %v12508_v27 = vand.u32 4294901760, %v12483_v61 }
 0x283   : > { %v2568_v31 = vpop.f32.mrf.mxu1 }
 0x284   : > { %v2579_v16 = vmax.f32 %v2575_v55, 0.0  ;;  %v2569_v46 = vadd.f32 %v2568_v31, %v2484_v4  ;;  %15021 = vst [vmem:[#allocation113_spill] sm:$0xff] %v12488_v48  ;;  %15022 = vst [vmem:[#allocation114_spill] sm:$0xff] %v12490_v53  ;;  %v2722_v31 = vsub.f32 %v12457_v23, %v12473_v62  ;;  %v12502_v55 = vsub.f32 %v2620_v35, %v12478_v34 }
 0x285   : > { %15026 = vst [vmem:[#allocation118_spill] sm:$0xff] %v12508_v27  ;;  %v2732_v39 = vsub.f32 %v12468_v6, %v12488_v48  ;;  %v2752_v51 = vsub.f32 %v12483_v61, %v12508_v27 }
 0x286   : > { %v12485_v13 = vand.u32 4294901760, %v2579_v16  ;;  %v2578_v44 = vmax.f32 %v2569_v46, 0.0  ;;  %15024 = vst [vmem:[#allocation116_spill] sm:$0xff] %v12502_v55  ;;  %v12505_v46 = vand.u32 4294901760, %v2712_v37  ;;  %v12515_v3 = vand.u32 4294901760, %v2722_v31 }
 0x287   : > { %v12526_v49 = vand.u32 4294901760, %v2732_v39  ;;  %v12543_v39 = vand.u32 4294901760, %v12236_v58 }
 0x288   : > { %v2799_v54 = vsub.f32 %v2579_v16, %v12485_v13  ;;  %v12495_v4 = vand.u32 4294901760, %v2578_v44  ;;  %10317 = vmatprep.subr.mxu0 %v12485_v13  ;;  %15025 = vst [vmem:[#allocation117_spill] sm:$0xff] %v12505_v46  ;;  %15027 = vst [vmem:[#allocation119_spill] sm:$0xff] %v12515_v3 }
 0x289   : > { %10318 = vmatpush3.msra.mxu0 %v12485_v13  ;;  %15029 = vst [vmem:[#allocation121_spill] sm:$0xff] %v12526_v49  ;;  %v12554_v2 = vsub.f32 %v12236_v58, %v12543_v39 }
 0x28a   : > { %v2806_v5 = vsub.f32 %v2578_v44, %v12495_v4  ;;  %10319 = vmatprep.subr.mxu0 %v12495_v4  ;;  %v2800_v16 = vand.u32 4294901760, %v2799_v54  ;;  %v12521_v44 = vand.u32 4294901760, %v12502_v55 }
 0x28b   : > { %10320 = vmatpush3.msra.mxu0 %v12495_v4 }
 0x28c   : > { %10322 = vmatmul.mubr.f32.vlgmr.msra.gmra.mxu0 %v12490_v53  ;;  %10349 = vmatprep.subr.mxu0 %v2799_v54  ;;  %v2801_v35 = vsub.f32 %v2799_v54, %v2800_v16  ;;  %v2807_v37 = vand.u32 4294901760, %v2806_v5  ;;  %15028 = vst [vmem:[#allocation120_spill] sm:$0xff] %v12521_v44 }
 0x28d   : > { %10350 = vmatpush3.msra.mxu0 %v2799_v54  ;;  %10324 = vmatprep.mubr.f32.mxu0 %v12505_v46  ;;  %v2762_v54 = vsub.f32 %v12502_v55, %v12521_v44  ;;  %v12533_v46 = vand.u32 4294901760, %v2752_v51  ;;  %v12562_v51 = vand.u32 4294901760, %v12554_v2 }
 0x28e   : > { %10351 = vmatprep.subr.mxu0 %v2806_v5  ;;  %v2802_v31 = vand.u32 4294901760, %v2801_v35  ;;  %v2808_v10 = vsub.f32 %v2806_v5, %v2807_v37  ;;  %v9656_v35 = vld [vmem:[%s14760_s2 + $0x28] sm:$0xff] }
 0x28f   : > { %10352 = vmatpush3.msra.mxu0 %v2806_v5  ;;  %15031 = vst [vmem:[#allocation123_spill] sm:$0xff] %v12533_v46  ;;  %v12538_v5 = vand.u32 4294901760, %v2762_v54  ;;  %v3531_v58 = vsub.f32 %v12554_v2, %v12562_v51  ;;  %v3416_v54 = vsel %vm332_vm0, %v9656_v35, 0 }
 0x290   : > { %10325 = vmatmul.mubr.f32.gmra.mxu0 %v12515_v3  ;;  %10333 = vmatprep.subr.mxu1 %v2802_v31  ;;  %v2809_v53 = vand.u32 4294901760, %v2808_v10  ;;  %v12574_v10 = vand.u32 4294901760, %v12238_v56 }
 0x291   : > { %10381 = vmatprep.subr.mxu0 %v2800_v16  ;;  %10334 = vmatpush3.msra.mxu1 %v2802_v31  ;;  %15032 = vst [vmem:[#allocation124_spill] sm:$0xff] %v12538_v5 }
 0x292   : > { %10335 = vmatprep.subr.mxu1 %v2809_v53  ;;  %10327 = vmatprep.mubr.f32.mxu0 %v12526_v49 }
 0x293   : > { %10336 = vmatpush3.msra.mxu1 %v2809_v53  ;;  %v9655_v53 = vld [vmem:[%s14760_s2 + $0x20] sm:$0xff] }
 0x294   : > { %10328 = vmatmul.mubr.f32.gmra.mxu0 %v12529_v25  ;;  %10338 = vmatmul.mubr.f32.vlgmr.msra.gmra.mxu1 %v12423_v40  ;;  %v3413_v31 = vsel %vm332_vm0, %v9655_v53, 0 }
 0x295   : > { %10365 = vmatprep.subr.mxu1 %v12485_v13  ;;  %10330 = vmatprep.mubr.f32.mxu0 %v12533_v46 }
 0x296   : > { %10366 = vmatpush3.msra.mxu1 %v12485_v13  ;;  %10340 = vmatprep.mubr.f32.mxu1 %v12429_v1 }
 0x297   : > { %10367 = vmatprep.subr.mxu1 %v12495_v4 }
 0x298   : > { %10368 = vmatpush3.msra.mxu1 %v12495_v4  ;;  %10331 = vmatmul.mubr.f32.gmra.mxu0 %v12538_v5 }
 0x299   : > { %10341 = vmatmul.mubr.f32.gmra.mxu1 %v12437_v60  ;;  %10397 = vmatprep.subr.mxu1 %v12485_v13 }
 0x29a   : > { %10343 = vmatprep.mubr.f32.mxu1 %v12447_v38  ;;  %10353 = vmatprep.mubr.f32.mxu0 %v12290_v57 }
 0x29c   : > { %10354 = vmatmul.mubr.f32.vlgmr.msra.gmra.mxu0 %v12435_v7 }
 0x29d   : > { %10344 = vmatmul.mubr.f32.gmra.mxu1 %v12459_v32  ;;  %10382 = vmatpush3.msra.mxu0 %v2800_v16  ;;  %v3532_v16 = vand.u32 4294901760, %v3531_v58  ;;  %v12602_v58 = vand.u32 4294901760, %v12240_v14 }
 0x29e   : > { %10383 = vmatprep.subr.mxu0 %v2807_v37  ;;  %10346 = vmatprep.mubr.f32.mxu1 %v12464_v20 }
 0x29f   : > { %10384 = vmatpush3.msra.mxu0 %v2807_v37  ;;  %10356 = vmatprep.mubr.f32.mxu0 %v12444_v29  ;;  %v12588_v37 = vand.u32 4294901760, %v12242_v36 }
 0x2a0   : > { %10357 = vmatmul.mubr.f32.gmra.mxu0 %v12457_v23  ;;  %10413 = vmatprep.subr.mxu0 %v12543_v39 }
 0x2a1   : > { %10347 = vmatmul.mubr.f32.gmra.mxu1 %v12478_v34  ;;  %10359 = vmatprep.mubr.f32.mxu0 %v12468_v6  ;;  %v12608_v53 = vsub.f32 %v12242_v36, %v12588_v37  ;;  %v12625_v36 = vsub.f32 %v12240_v14, %v12602_v58 }
 0x2a2   : > { %10369 = vmatprep.mubr.f32.mxu1 %v12298_v9 }
 0x2a4   : > { %10360 = vmatmul.mubr.f32.gmra.mxu0 %v12476_v8 }
 0x2a5   : > { %10370 = vmatmul.mubr.f32.vlgmr.msra.gmra.mxu1 %v12454_v12  ;;  %10362 = vmatprep.mubr.f32.mxu0 %v12483_v61 }
 0x2a6   : > { %10398 = vmatpush3.msra.mxu1 %v12485_v13  ;;  %10372 = vmatprep.mubr.f32.mxu1 %v12462_v0  ;;  %v12595_v13 = vsub.f32 %v12238_v56, %v12574_v10  ;;  %v12612_v56 = vand.u32 4294901760, %v12246_v28  ;;  %v12654_v0 = vand.u32 4294901760, %v12250_v15 }
 0x2a7   : > { %10399 = vmatprep.subr.mxu1 %v12495_v4 }
 0x2a8   : > { %10400 = vmatpush3.msra.mxu1 %v12495_v4  ;;  %10363 = vmatmul.mubr.f32.gmra.mxu0 %v12502_v55  ;;  %v12604_v4 = vand.u32 4294901760, %v3413_v31  ;;  %v12617_v35 = vand.u32 4294901760, %v12595_v13  ;;  %v12642_v14 = vsub.f32 %v12246_v28, %v12612_v56  ;;  %v12659_v28 = vand.u32 4294901760, %v12625_v36 }
 0x2a9   : > { %10373 = vmatmul.mubr.f32.gmra.mxu1 %v12473_v62  ;;  %10385 = vmatprep.mubr.f32.mxu0 %v12287_v26  ;;  %v12633_v62 = vand.u32 4294901760, %v12244_v11  ;;  %v12682_v9 = vsub.f32 %v12250_v15, %v12654_v0 }
 0x2aa   : > { %10375 = vmatprep.mubr.f32.mxu1 %v12488_v48  ;;  %10432 = vmatprep.subr.mxu1 %v3532_v16  ;;  %v12619_v48 = vand.u32 4294901760, %v3416_v54  ;;  %v12673_v8 = vand.u32 4294901760, %v12642_v14 }
 0x2ab   : > { %v12707_v57 = vand.u32 4294901760, %v12682_v9 }
 0x2ac   : > { %10386 = vmatmul.mubr.f32.vlgmr.msra.gmra.mxu0 %v12423_v40  ;;  %v12649_v55 = vsub.f32 %v3416_v54, %v12619_v48  ;;  %v12664_v54 = vsub.f32 %v12244_v11, %v12633_v62  ;;  %v12677_v11 = vand.u32 4294901760, %v12248_v22  ;;  %v3559_v15 = vsub.f32 %v12642_v14, %v12673_v8 }
 0x2ad   : > { %10376 = vmatmul.mubr.f32.gmra.mxu1 %v12499_v24  ;;  %10414 = vmatpush3.msra.mxu0 %v12543_v39  ;;  %v12630_v24 = vsub.f32 %v3413_v31, %v12604_v4  ;;  %v3538_v31 = vsub.f32 %v12595_v13, %v12617_v35 }
 0x2ae   : > { %10415 = vmatprep.subr.mxu0 %v12574_v10  ;;  %10378 = vmatprep.mubr.f32.mxu1 %v12508_v27  ;;  %v12638_v27 = vand.u32 4294901760, %v12608_v53  ;;  %v12692_v23 = vand.u32 4294901760, %v12664_v54  ;;  %v15034_v29 = vand.u32 4294901760, %v12649_v55 }
 0x2af   : > { %10416 = vmatpush3.msra.mxu0 %v12574_v10  ;;  %10388 = vmatprep.mubr.f32.mxu0 %v12429_v1  ;;  %v3539_v12 = vand.u32 4294901760, %v3538_v31  ;;  %v3552_v31 = vsub.f32 %v12625_v36, %v12659_v28  ;;  %v15033_v6 = vand.u32 4294901760, %v12630_v24 }
 0x2b0   : > { %10417 = vmatprep.subr.mxu0 %v12588_v37  ;;  %10389 = vmatmul.mubr.f32.gmra.mxu0 %v12437_v60  ;;  %v3545_v61 = vsub.f32 %v12608_v53, %v12638_v27  ;;  %v3504_v7 = vsub.f32 %v12649_v55, %v15034_v29  ;;  %v3566_v29 = vsub.f32 %v12664_v54, %v12692_v23 }
 0x2b1   : > { %10379 = vmatmul.mubr.f32.gmra.mxu1 %v12521_v44  ;;  %10418 = vmatpush3.msra.mxu0 %v12588_v37  ;;  %v3494_v44 = vsub.f32 %v12630_v24, %v15033_v6  ;;  %v3578_v6 = vsub.f32 %v12248_v22, %v12677_v11  ;;  %v3560_v22 = vand.u32 4294901760, %v3559_v15 }
 0x2b2   : > { %10419 = vmatprep.subr.mxu0 %v12602_v58  ;;  %10391 = vmatprep.mubr.f32.mxu0 %v12447_v38  ;;  %v3505_v5 = vand.u32 4294901760, %v3504_v7 }
 0x2b3   : > { %10420 = vmatpush3.msra.mxu0 %v12602_v58  ;;  %10401 = vmatprep.mubr.f32.mxu1 %v12287_v26 }
 0x2b4   : > { %10421 = vmatprep.subr.mxu0 %v12612_v56  ;;  %10392 = vmatmul.mubr.f32.gmra.mxu0 %v12459_v32 }
 0x2b5   : > { %10402 = vmatmul.mubr.f32.vlgmr.msra.gmra.mxu1 %v12423_v40  ;;  %10422 = vmatpush3.msra.mxu0 %v12612_v56 }
 0x2b6   : > { %10433 = vmatpush3.msra.mxu1 %v3532_v16  ;;  %10423 = vmatprep.subr.mxu0 %v12633_v62  ;;  %v3546_v16 = vand.u32 4294901760, %v3545_v61  ;;  %v3495_v61 = vand.u32 4294901760, %v3494_v44  ;;  %v3573_v44 = vsub.f32 %v12682_v9, %v12707_v57 }
 0x2b7   : > { %10434 = vmatprep.subr.mxu1 %v3539_v12  ;;  %10424 = vmatpush3.msra.mxu0 %v12633_v62 }
 0x2b8   : > { %10435 = vmatpush3.msra.mxu1 %v3539_v12  ;;  %10394 = vmatprep.mubr.f32.mxu0 %v12464_v20  ;;  %v3553_v12 = vand.u32 4294901760, %v3552_v31  ;;  %v3567_v31 = vand.u32 4294901760, %v3566_v29 }
 0x2b9   : > { %10404 = vmatprep.mubr.f32.mxu1 %v12429_v1  ;;  %10425 = vmatprep.subr.mxu0 %v12654_v0 }
 0x2ba   : > { %10436 = vmatprep.subr.mxu1 %v3546_v16  ;;  %10395 = vmatmul.mubr.f32.gmra.mxu0 %v12478_v34 }
 0x2bb   : > { %10405 = vmatmul.mubr.f32.gmra.mxu1 %v12437_v60  ;;  %10426 = vmatpush3.msra.mxu0 %v12654_v0  ;;  %v12714_v60 = vand.u32 4294901760, %v3578_v6 }
 0x2bc   : > { %10437 = vmatpush3.msra.mxu1 %v3546_v16  ;;  %10427 = vmatprep.subr.mxu0 %v12677_v11  ;;  %v3574_v16 = vand.u32 4294901760, %v3573_v44 }
 0x2bd   : > { %10438 = vmatprep.subr.mxu1 %v3553_v12  ;;  %10428 = vmatpush3.msra.mxu0 %v12677_v11  ;;  %v3580_v7 = vsub.f32 %v3578_v6, %v12714_v60 }
 0x2be   : > { %10439 = vmatpush3.msra.mxu1 %v3553_v12  ;;  %10407 = vmatprep.mubr.f32.mxu1 %v12447_v38  ;;  %v9657_v38 = vld [vmem:[%s14761_s3 + $0x20] sm:$0xff] }
 0x2bf   : > { %10429 = vmatprep.mubr.f32.mxu0 %v3495_v61  ;;  %10440 = vmatprep.subr.mxu1 %v3560_v22 }
 0x2c0   : > { %10451 = vmatprep.subr.mxu0 %v12554_v2  ;;  %10408 = vmatmul.mubr.f32.gmra.mxu1 %v12459_v32 }
 0x2c1   : > { %10430 = vmatmul.mubr.f32.vlgmr.msra.gmra.mxu0 %v3505_v5  ;;  %10441 = vmatpush3.msra.mxu1 %v3560_v22  ;;  %v3581_v5 = vand.u32 4294901760, %v3580_v7 }
 0x2c2   : > { %10452 = vmatpush3.msra.mxu0 %v12554_v2  ;;  %10442 = vmatprep.subr.mxu1 %v3567_v31  ;;  %v15036_v2 = vand.u32 4294901760, %v12649_v55 }
 0x2c3   : > { %10453 = vmatprep.subr.mxu0 %v12595_v13  ;;  %10443 = vmatpush3.msra.mxu1 %v3567_v31 }
 0x2c4   : > { %10454 = vmatpush3.msra.mxu0 %v12595_v13  ;;  %10410 = vmatprep.mubr.f32.mxu1 %v12464_v20 }
 0x2c5   : > { %10444 = vmatprep.subr.mxu1 %v3574_v16  ;;  %10455 = vmatprep.subr.mxu0 %v12608_v53 }
 0x2c6   : > { %10411 = vmatmul.mubr.f32.gmra.mxu1 %v12478_v34  ;;  %10456 = vmatpush3.msra.mxu0 %v12608_v53 }
 0x2c7   : > { %10445 = vmatpush3.msra.mxu1 %v3574_v16  ;;  %10457 = vmatprep.subr.mxu0 %v12625_v36 }
 0x2c8   : > { %10446 = vmatprep.subr.mxu1 %v3581_v5  ;;  %10458 = vmatpush3.msra.mxu0 %v12625_v36  ;;  %v9652_v36 = vld [vmem:[%s14763_s5 + $0x68] sm:$0xff] }
 0x2c9   : > { %10447 = vmatpush3.msra.mxu1 %v3581_v5  ;;  %10448 = vmatprep.mubr.f32.mxu1 %v12604_v4 }
 0x2ca   : > { %10459 = vmatprep.subr.mxu0 %v12642_v14  ;;  %10470 = vmatprep.subr.mxu1 %v12543_v39 }
 0x2cb   : > { %10449 = vmatmul.mubr.f32.vlgmr.msra.gmra.mxu1 %v12619_v48  ;;  %10460 = vmatpush3.msra.mxu0 %v12642_v14 }
 0x2cc   : > { %10471 = vmatpush3.msra.mxu1 %v12543_v39  ;;  %10461 = vmatprep.subr.mxu0 %v12664_v54 }
 0x2cd   : > { %10472 = vmatprep.subr.mxu1 %v12574_v10  ;;  %10462 = vmatpush3.msra.mxu0 %v12664_v54 }
 0x2ce   : > { %10473 = vmatpush3.msra.mxu1 %v12574_v10  ;;  %10463 = vmatprep.subr.mxu0 %v12682_v9 }
 0x2cf   : > { %10474 = vmatprep.subr.mxu1 %v12588_v37  ;;  %10464 = vmatpush3.msra.mxu0 %v12682_v9  ;;  %v15035_v9 = vand.u32 4294901760, %v12630_v24 }
 0x2d0   : > { %10475 = vmatpush3.msra.mxu1 %v12588_v37  ;;  %10465 = vmatprep.subr.mxu0 %v3578_v6 }
 0x2d1   : > { %10476 = vmatprep.subr.mxu1 %v12602_v58  ;;  %10466 = vmatpush3.msra.mxu0 %v3578_v6  ;;  %v9654_v6 = vld [vmem:[%s14763_s5 + $0x78] sm:$0xff] }
 0x2d2   : > { %10467 = vmatprep.mubr.f32.mxu0 %v12630_v24  ;;  %10477 = vmatpush3.msra.mxu1 %v12602_v58 }
 0x2d3   : > { %10468 = vmatmul.mubr.f32.vlgmr.msra.gmra.mxu0 %v12649_v55  ;;  %10478 = vmatprep.subr.mxu1 %v12612_v56  ;;  %v9648_v55 = vld [vmem:[%s14763_s5 + $0x48] sm:$0xff] }
 0x2d4   : > { %10489 = vmatprep.subr.mxu0 %v12562_v51  ;;  %10479 = vmatpush3.msra.mxu1 %v12612_v56 }
 0x2d5   : > { %10490 = vmatpush3.msra.mxu0 %v12562_v51  ;;  %10480 = vmatprep.subr.mxu1 %v12633_v62 }
 0x2d6   : > { %10491 = vmatprep.subr.mxu0 %v12617_v35  ;;  %10481 = vmatpush3.msra.mxu1 %v12633_v62 }
 0x2d7   : > { %10492 = vmatpush3.msra.mxu0 %v12617_v35  ;;  %10482 = vmatprep.subr.mxu1 %v12654_v0 }
 0x2d8   : > { %10493 = vmatprep.subr.mxu0 %v12638_v27  ;;  %10483 = vmatpush3.msra.mxu1 %v12654_v0 }
 0x2d9   : > { %10494 = vmatpush3.msra.mxu0 %v12638_v27  ;;  %10484 = vmatprep.subr.mxu1 %v12677_v11 }
 0x2da   : > { %10495 = vmatprep.subr.mxu0 %v12659_v28  ;;  %10485 = vmatpush3.msra.mxu1 %v12677_v11 }
 0x2db   : > { %10486 = vmatprep.mubr.f32.mxu1 %v15035_v9  ;;  %10496 = vmatpush3.msra.mxu0 %v12659_v28 }
 0x2dc   : > { %10487 = vmatmul.mubr.f32.vlgmr.msra.gmra.mxu1 %v15036_v2  ;;  %10497 = vmatprep.subr.mxu0 %v12673_v8 }
 0x2dd   : > { %10508 = vmatprep.subr.mxu1 %v12543_v39  ;;  %10498 = vmatpush3.msra.mxu0 %v12673_v8 }
 0x2de   : > { %10509 = vmatpush3.msra.mxu1 %v12543_v39  ;;  %10499 = vmatprep.subr.mxu0 %v12692_v23 }
 0x2df   : > { %10510 = vmatprep.subr.mxu1 %v12574_v10  ;;  %10500 = vmatpush3.msra.mxu0 %v12692_v23 }
 0x2e0   : > { %10511 = vmatpush3.msra.mxu1 %v12574_v10  ;;  %10501 = vmatprep.subr.mxu0 %v12707_v57 }
 0x2e1   : > { %10512 = vmatprep.subr.mxu1 %v12588_v37  ;;  %10502 = vmatpush3.msra.mxu0 %v12707_v57  ;;  %v9659_v57 = vld [vmem:[%s14762_s4 + $0x80] sm:$0xff] }
 0x2e2   : > { %10513 = vmatpush3.msra.mxu1 %v12588_v37  ;;  %10503 = vmatprep.subr.mxu0 %v12714_v60  ;;  %v9650_v37 = vld [vmem:[%s14763_s5 + $0x58] sm:$0xff] }
 0x2e3   : > { %10514 = vmatprep.subr.mxu1 %v12602_v58  ;;  %10504 = vmatpush3.msra.mxu0 %v12714_v60  ;;  %v4019_v60 = vsel %vm1095_vm1, %v9659_v57, 0 }
 0x2e4   : > { %10505 = vmatprep.mubr.f32.mxu0 %v12604_v4  ;;  %10515 = vmatpush3.msra.mxu1 %v12602_v58  ;;  %v12800_v23 = vand.u32 4294901760, %v4019_v60 }
 0x2e5   : > { %10506 = vmatmul.mubr.f32.vlgmr.msra.gmra.mxu0 %v12619_v48  ;;  %10516 = vmatprep.subr.mxu1 %v12612_v56 }
 0x2e6   : > { %10517 = vmatpush3.msra.mxu1 %v12612_v56  ;;  %10524 = vmatprep.mubr.f32.mxu1 %v12604_v4 }
 0x2e7   : > { %10518 = vmatprep.subr.mxu1 %v12633_v62 }
 0x2e8   : > { %10519 = vmatpush3.msra.mxu1 %v12633_v62  ;;  %v12803_v62 = vsub.f32 %v4019_v60, %v12800_v23 }
 0x2e9   : > { %10520 = vmatprep.subr.mxu1 %v12654_v0 }
 0x2ea   : > { %10521 = vmatpush3.msra.mxu1 %v12654_v0  ;;  %v14850_v0 = vand.u32 4294901760, %v12803_v62 }
 0x2eb   : > { %10522 = vmatprep.subr.mxu1 %v12677_v11 }
 0x2ec   : > { %10523 = vmatpush3.msra.mxu1 %v12677_v11  ;;  %v4112_v8 = vsub.f32 %v12803_v62, %v14850_v0 }
 0x2ed   : > { %10525 = vmatmul.mubr.f32.vlgmr.msra.gmra.mxu1 %v12619_v48 }
 0x2ee   : > { %10547 = vmatprep.mubr.f32.mxu1 %v12800_v23  ;;  %v4113_v48 = vand.u32 4294901760, %v4112_v8 }
 0x2f0   : > { %10531 = vmatprep.mubr.f32.mxu0 %v4113_v48 }
 0x34c   : > { %v10323_v24 = vpop.f32.mrf.mxu0 }
 0x34d   : > { %v2706_v51 = vadd.f32 %v10323_v24, %v9648_v55 }
 0x34e   : > { %v12813_v27 = vpop.f32.mrf.mxu0 }
 0x350   : > { %v10326_v39 = vpop.f32.mrf.mxu0 }
 0x351   : > { %v2726_v53 = vadd.f32 %v10326_v39, %v9650_v37 }
 0x352   : > { %v12815_v10 = vpop.f32.mrf.mxu0 }
 0x354   : > { %v10329_v13 = vpop.f32.mrf.mxu0  ;;  %v10339_v58 = vpop.f32.mrf.mxu1 }
 0x355   : > { %v2853_v4 = vadd.f32 %v10339_v58, %v2706_v51  ;;  %v2746_v54 = vadd.f32 %v10329_v13, %v9652_v36 }
 0x356   : > { %v12820_v56 = vpop.f32.mrf.mxu0  ;;  %v12822_v35 = vpop.f32.mrf.mxu1 }
 0x357   : > { %15037 = vst [vmem:[#allocation125_spill] sm:$0xff] %v12822_v35  ;;  %v9653_v35 = vld [vmem:[%s14763_s5 + $0x70] sm:$0xff] }
 0x358   : > { %v10332_v14 = vpop.f32.mrf.mxu0 }
 0x359   : > { %v10342_v28 = vpop.f32.mrf.mxu1  ;;  %v2766_v44 = vadd.f32 %v10332_v14, %v9654_v6 }
 0x35a   : > { %v2865_v11 = vadd.f32 %v10342_v28, %v2726_v53  ;;  %v12827_v15 = vpop.f32.mrf.mxu0 }
 0x35b   : > { %v12832_v12 = vpop.f32.mrf.mxu1 }
 0x35c   : > { %v10355_v61 = vpop.f32.mrf.mxu0 }
 0x35d   : > { %v10345_v29 = vpop.f32.mrf.mxu1  ;;  %v2972_v22 = vadd.f32 %v10355_v61, %v2853_v4 }
 0x35e   : > { %v2877_v31 = vadd.f32 %v10345_v29, %v2746_v54  ;;  %v12834_v7 = vpop.f32.mrf.mxu0 }
 0x35f   : > { %15038 = vst [vmem:[#allocation126_spill] sm:$0xff] %v12834_v7  ;;  %v12836_v16 = vpop.f32.mrf.mxu1 }
 0x360   : > { %v10358_v5 = vpop.f32.mrf.mxu0 }
 0x361   : > { %v10348_v9 = vpop.f32.mrf.mxu1  ;;  %v2986_v2 = vadd.f32 %v10358_v5, %v2865_v11 }
 0x362   : > { %v2889_v57 = vadd.f32 %v10348_v9, %v2766_v44  ;;  %v12838_v60 = vpop.f32.mrf.mxu0 }
 0x363   : > { %15039 = vst [vmem:[#allocation127_spill] sm:$0xff] %v12838_v60  ;;  %v12840_v8 = vpop.f32.mrf.mxu1 }
 0x364   : > { %v10361_v48 = vpop.f32.mrf.mxu0 }
 0x365   : > { %v3000_v24 = vadd.f32 %v10361_v48, %v2877_v31  ;;  %v10371_v55 = vpop.f32.mrf.mxu1 }
 0x366   : > { %v3097_v39 = vadd.f32 %v10371_v55, %v2972_v22  ;;  %v12842_v51 = vpop.f32.mrf.mxu0 }
 0x367   : > { %v12844_v37 = vpop.f32.mrf.mxu1 }
 0x368   : > { %15040 = vst [vmem:[#allocation128_spill] sm:$0xff] %v12844_v37  ;;  %v10364_v13 = vpop.f32.mrf.mxu0  ;;  %v9668_v37 = vld [vmem:[%s14763_s5 + $0x88] sm:$0xff] }
 0x369   : > { %v3014_v58 = vadd.f32 %v10364_v13, %v2889_v57  ;;  %v10374_v4 = vpop.f32.mrf.mxu1 }
 0x36a   : > { %v3113_v53 = vadd.f32 %v10374_v4, %v2986_v2  ;;  %v12846_v36 = vpop.f32.mrf.mxu0 }
 0x36b   : > { %v12848_v14 = vpop.f32.mrf.mxu1 }
 0x36c   : > { %15041 = vst [vmem:[#allocation129_spill] sm:$0xff] %v12848_v14  ;;  %v10387_v28 = vpop.f32.mrf.mxu0 }
 0x36d   : > { %v10377_v54 = vpop.f32.mrf.mxu1  ;;  %v3228_v11 = vadd.f32 %v10387_v28, %v3097_v39 }
 0x36e   : > { %v3129_v6 = vadd.f32 %v10377_v54, %v3000_v24  ;;  %v12850_v61 = vpop.f32.mrf.mxu0 }
 0x36f   : > { %15042 = vst [vmem:[#allocation130_spill] sm:$0xff] %v12850_v61  ;;  %v12852_v29 = vpop.f32.mrf.mxu1 }
 0x370   : > { %v10390_v22 = vpop.f32.mrf.mxu0 }
 0x371   : > { %v10380_v44 = vpop.f32.mrf.mxu1  ;;  %v3240_v31 = vadd.f32 %v10390_v22, %v3113_v53 }
 0x372   : > { %v3145_v5 = vadd.f32 %v10380_v44, %v3014_v58  ;;  %v12854_v9 = vpop.f32.mrf.mxu0 }
 0x373   : > { %15043 = vst [vmem:[#allocation131_spill] sm:$0xff] %v12854_v9  ;;  %v12856_v57 = vpop.f32.mrf.mxu1 }
 0x374   : > { %v10393_v2 = vpop.f32.mrf.mxu0 }
 0x375   : > { %v3252_v48 = vadd.f32 %v10393_v2, %v3129_v6  ;;  %v10403_v55 = vpop.f32.mrf.mxu1 }
 0x376   : > { %v12858_v13 = vadd.f32 %v10403_v55, %v3228_v11  ;;  %v12860_v4 = vpop.f32.mrf.mxu0 }
 0x377   : > { %15045 = vst [vmem:[#allocation133_spill] sm:$0xff] %v12860_v4  ;;  %v12862_v24 = vpop.f32.mrf.mxu1 }
 0x378   : > { %15044 = vst [vmem:[#allocation132_spill] sm:$0xff] %v12858_v13  ;;  %15046 = vst [vmem:[#allocation134_spill] sm:$0xff] %v12862_v24 }
 0x37a   : > { %v10396_v39 = vpop.f32.mrf.mxu0 }
 0x37b   : > { %v3264_v28 = vadd.f32 %v10396_v39, %v3145_v5  ;;  %v10406_v54 = vpop.f32.mrf.mxu1  ;;  %v9658_v5 = vld [vmem:[%s14761_s3 + $0x28] sm:$0xff] }
 0x37c   : > { %v12864_v0 = vadd.f32 %v10406_v54, %v3240_v31  ;;  %v12874_v11 = vpop.f32.mrf.mxu0  ;;  %v9660_v31 = vld [vmem:[%s14762_s4 + $0x88] sm:$0xff] }
 0x37d   : > { %v12866_v53 = vpop.f32.mrf.mxu1  ;;  %v4022_v54 = vsel %vm1095_vm1, %v9660_v31, 0  ;;  %v9663_v31 = vld [vmem:[%s14762_s4 + $0xa0] sm:$0xff] }
 0x37e   : > { %15047 = vst [vmem:[#allocation135_spill] sm:$0xff] %v12866_v53  ;;  %v12895_v46 = vand.u32 4294901760, %v4022_v54  ;;  %v9674_v53 = vld [vmem:[%s14763_s5 + $0xb8] sm:$0xff] }
 0x380   : > { %v10409_v58 = vpop.f32.mrf.mxu1  ;;  %v12907_v63 = vsub.f32 %v4022_v54, %v12895_v46 }
 0x381   : > { %v12868_v22 = vadd.f32 %v10409_v58, %v3252_v48  ;;  %v10431_v55 = vpop.f32.mrf.mxu0 }
 0x382   : > { %v12870_v44 = vpop.f32.mrf.mxu1  ;;  %v3508_v20 = vadd.f32 %v10431_v55, %v9658_v5 }
 0x383   : > { %15048 = vst [vmem:[#allocation136_spill] sm:$0xff] %v12870_v44  ;;  %v3497_v48 = vpop.f32.mrf.mxu0 }
 0x384   : > { %v3498_v55 = vadd.f32 %v9657_v38, %v3497_v48 }
 0x386   : > { %v10412_v6 = vpop.f32.mrf.mxu1 }
 0x387   : > { %v12872_v2 = vadd.f32 %v10412_v6, %v3264_v28  ;;  %v9661_v28 = vld [vmem:[%s14762_s4 + $0x90] sm:$0xff]  ;;  %v9662_v6 = vld [vmem:[%s14762_s4 + $0x98] sm:$0xff] }
 0x388   : > { %v12876_v34 = vpop.f32.mrf.mxu1  ;;  %v4025_v32 = vsel %vm1095_vm1, %v9661_v28, 0  ;;  %v4028_v40 = vsel %vm1095_vm1, %v9662_v6, 0  ;;  %v9664_v28 = vld [vmem:[%s14762_s4 + $0xa8] sm:$0xff]  ;;  %v4031_v6 = vsel %vm1095_vm1, %v9663_v31, 0  ;;  %v9666_v31 = vld [vmem:[%s14762_s4 + $0xb8] sm:$0xff] }
 0x389   : > { %v12901_v3 = vand.u32 4294901760, %v4025_v32  ;;  %v12909_v21 = vand.u32 4294901760, %v4028_v40  ;;  %v4034_v48 = vsel %vm1095_vm1, %v9664_v28, 0  ;;  %v12919_v54 = vand.u32 4294901760, %v4031_v6 }
 0x38a   : > { %v4040_v17 = vsel %vm1095_vm1, %v9666_v31, 0 }
 0x38b   : > { %v10450_v39 = vpop.f32.mrf.mxu1  ;;  %v12936_v33 = vsub.f32 %v4031_v6, %v12919_v54  ;;  %v12945_v42 = vand.u32 4294901760, %v4040_v17 }
 0x38c   : > { %v3625_v5 = vadd.f32 %v10450_v39, %v3508_v20  ;;  %v12916_v20 = vsub.f32 %v4025_v32, %v12901_v3 }
 0x38d   : > { %v3618_v1 = vpop.f32.mrf.mxu1 }
 0x38e   : > { %v3619_v41 = vadd.f32 %v3618_v1, %v3498_v55 }
 0x393   : > { %v10469_v58 = vpop.f32.mrf.mxu0 }
 0x394   : > { %v3720_v18 = vadd.f32 %v10469_v58, %v3625_v5  ;;  %v12927_v58 = vsub.f32 %v4028_v40, %v12909_v21  ;;  %v12929_v5 = vand.u32 4294901760, %v4034_v48  ;;  %v15049_v40 = vand.u32 4294901760, %v12907_v63 }
 0x395   : > { %v3712_v25 = vpop.f32.mrf.mxu0 }
 0x396   : > { %v3713_v39 = vadd.f32 %v3712_v25, %v3619_v41  ;;  %v12932_v25 = vand.u32 4294901760, %v4037_v50 }
 0x398   : > { %v12951_v6 = vsub.f32 %v4037_v50, %v12932_v25  ;;  %v12965_v50 = vsub.f32 %v4040_v17, %v12945_v42 }
 0x39a   : > { %v15052_v52 = vand.u32 4294901760, %v12951_v6 }
 0x39c   : > { %v10488_v49 = vpop.f32.mrf.mxu1  ;;  %v4172_v47 = vsub.f32 %v12951_v6, %v15052_v52 }
 0x39d   : > { %v3809_v45 = vadd.f32 %v10488_v49, %v3720_v18  ;;  %v12943_v49 = vsub.f32 %v4034_v48, %v12929_v5 }
 0x39e   : > { %v3800_v38 = vpop.f32.mrf.mxu1 }
 0x39f   : > { %v3801_v32 = vadd.f32 %v3800_v38, %v3713_v39  ;;  %v4122_v38 = vsub.f32 %v12907_v63, %v15049_v40 }
 0x3a1   : > { %v4123_v40 = vand.u32 4294901760, %v4122_v38 }
 0x3a5   : > { %v10507_v26 = vpop.f32.mrf.mxu0 }
 0x3a6   : > { %v3910_v55 = vadd.f32 %v10507_v26, %v3809_v45  ;;  %v14872_v26 = vand.u32 4294901760, %v12927_v58 }
 0x3a7   : > { %v3903_v59 = vpop.f32.mrf.mxu0 }
 0x3a8   : > { %v3904_v18 = vadd.f32 %v3903_v59, %v3801_v32  ;;  %v15050_v59 = vand.u32 4294901760, %v12916_v20  ;;  %v4142_v48 = vsub.f32 %v12927_v58, %v14872_v26 }
 0x3aa   : > { %v4132_v31 = vsub.f32 %v12916_v20, %v15050_v59 }
 0x3ad   : > { %v10526_v41 = vpop.f32.mrf.mxu1 }
 0x3ae   : > { %v3995_v28 = vadd.f32 %v10526_v41, %v3910_v55  ;;  %v14874_v41 = vand.u32 4294901760, %v12936_v33 }
 0x3af   : > { %v3988_v1 = vpop.f32.mrf.mxu1 }
 0x3b0   : > { %v3999_v45 = vmax.f32 %v3995_v28, 0.0  ;;  %v3989_v39 = vadd.f32 %v3988_v1, %v3904_v18  ;;  %v4143_v28 = vand.u32 4294901760, %v4142_v48 }
 0x3b2   : > { %v12953_v32 = vand.u32 4294901760, %v3999_v45  ;;  %v3998_v55 = vmax.f32 %v3989_v39, 0.0  ;;  %v4133_v39 = vand.u32 4294901760, %v4132_v31  ;;  %v15051_v31 = vand.u32 4294901760, %v12943_v49 }
 0x3b4   : > { %v4219_v1 = vsub.f32 %v3999_v45, %v12953_v32  ;;  %v12960_v18 = vand.u32 4294901760, %v3998_v55  ;;  %10527 = vmatprep.subr.mxu0 %v12953_v32  ;;  %v4152_v45 = vsub.f32 %v12936_v33, %v14874_v41  ;;  %v4162_v38 = vsub.f32 %v12943_v49, %v15051_v31 }
 0x3b5   : > { %10528 = vmatpush3.msra.mxu0 %v12953_v32  ;;  %v4173_v31 = vand.u32 4294901760, %v4172_v47  ;;  %v15053_v47 = vand.u32 4294901760, %v12803_v62 }
 0x3b6   : > { %v4226_v59 = vsub.f32 %v3998_v55, %v12960_v18  ;;  %10529 = vmatprep.subr.mxu0 %v12960_v18  ;;  %v4220_v26 = vand.u32 4294901760, %v4219_v1  ;;  %v4181_v55 = vand.u32 4294901760, %v12965_v50  ;;  %v4153_v48 = vand.u32 4294901760, %v4152_v45 }
 0x3b7   : > { %10530 = vmatpush3.msra.mxu0 %v12960_v18  ;;  %v4163_v24 = vand.u32 4294901760, %v4162_v38 }
 0x3b8   : > { %10532 = vmatmul.mubr.f32.vlgmr.msra.gmra.mxu0 %v4123_v40  ;;  %10559 = vmatprep.subr.mxu0 %v4219_v1  ;;  %v4221_v17 = vsub.f32 %v4219_v1, %v4220_v26  ;;  %v4227_v43 = vand.u32 4294901760, %v4226_v59  ;;  %v4182_v61 = vsub.f32 %v12965_v50, %v4181_v55 }
 0x3b9   : > { %10560 = vmatpush3.msra.mxu0 %v4219_v1  ;;  %10534 = vmatprep.mubr.f32.mxu0 %v4133_v39 }
 0x3ba   : > { %10561 = vmatprep.subr.mxu0 %v4226_v59  ;;  %v4222_v41 = vand.u32 4294901760, %v4221_v17  ;;  %v4228_v19 = vsub.f32 %v4226_v59, %v4227_v43  ;;  %v4183_v52 = vand.u32 4294901760, %v4182_v61  ;;  %v15058_v61 = vand.u32 4294901760, %v12943_v49 }
 0x3bb   : > { %10562 = vmatpush3.msra.mxu0 %v4226_v59 }
 0x3bc   : > { %10535 = vmatmul.mubr.f32.gmra.mxu0 %v4143_v28  ;;  %10543 = vmatprep.subr.mxu1 %v4222_v41  ;;  %v4229_v40 = vand.u32 4294901760, %v4228_v19  ;;  %v15054_v19 = vand.u32 4294901760, %v12907_v63 }
 0x3bd   : > { %10591 = vmatprep.subr.mxu0 %v4220_v26  ;;  %10544 = vmatpush3.msra.mxu1 %v4222_v41 }
 0x3be   : > { %10545 = vmatprep.subr.mxu1 %v4229_v40  ;;  %10537 = vmatprep.mubr.f32.mxu0 %v4153_v48 }
 0x3bf   : > { %10546 = vmatpush3.msra.mxu1 %v4229_v40 }
 0x3c0   : > { %10538 = vmatmul.mubr.f32.gmra.mxu0 %v4163_v24  ;;  %10548 = vmatmul.mubr.f32.vlgmr.msra.gmra.mxu1 %v12895_v46  ;;  %v15059_v24 = vand.u32 4294901760, %v12951_v6 }
 0x3c1   : > { %10575 = vmatprep.subr.mxu1 %v12953_v32  ;;  %10540 = vmatprep.mubr.f32.mxu0 %v4173_v31 }
 0x3c2   : > { %10576 = vmatpush3.msra.mxu1 %v12953_v32  ;;  %10550 = vmatprep.mubr.f32.mxu1 %v12901_v3 }
 0x3c3   : > { %10577 = vmatprep.subr.mxu1 %v12960_v18 }
 0x3c4   : > { %10578 = vmatpush3.msra.mxu1 %v12960_v18  ;;  %10541 = vmatmul.mubr.f32.gmra.mxu0 %v4183_v52 }
 0x3c5   : > { %10551 = vmatmul.mubr.f32.gmra.mxu1 %v12909_v21  ;;  %10607 = vmatprep.subr.mxu1 %v12953_v32 }
 0x3c6   : > { %10553 = vmatprep.mubr.f32.mxu1 %v12919_v54  ;;  %10563 = vmatprep.mubr.f32.mxu0 %v12803_v62  ;;  %v15056_v62 = vand.u32 4294901760, %v12927_v58 }
 0x3c8   : > { %10564 = vmatmul.mubr.f32.vlgmr.msra.gmra.mxu0 %v12907_v63  ;;  %v15057_v63 = vand.u32 4294901760, %v12936_v33 }
 0x3c9   : > { %10554 = vmatmul.mubr.f32.gmra.mxu1 %v12929_v5  ;;  %10592 = vmatpush3.msra.mxu0 %v4220_v26 }
 0x3ca   : > { %10593 = vmatprep.subr.mxu0 %v4227_v43  ;;  %10556 = vmatprep.mubr.f32.mxu1 %v12932_v25 }
 0x3cb   : > { %10594 = vmatpush3.msra.mxu0 %v4227_v43  ;;  %10566 = vmatprep.mubr.f32.mxu0 %v12916_v20  ;;  %v15055_v43 = vand.u32 4294901760, %v12916_v20 }
 0x3cc   : > { %10567 = vmatmul.mubr.f32.gmra.mxu0 %v12927_v58 }
 0x3cd   : > { %10557 = vmatmul.mubr.f32.gmra.mxu1 %v12945_v42  ;;  %10569 = vmatprep.mubr.f32.mxu0 %v12936_v33 }
 0x3ce   : > { %10579 = vmatprep.mubr.f32.mxu1 %v15053_v47 }
 0x3d0   : > { %10570 = vmatmul.mubr.f32.gmra.mxu0 %v12943_v49 }
 0x3d1   : > { %10580 = vmatmul.mubr.f32.vlgmr.msra.gmra.mxu1 %v15054_v19  ;;  %10572 = vmatprep.mubr.f32.mxu0 %v12951_v6  ;;  %v9672_v19 = vld [vmem:[%s14763_s5 + $0xa8] sm:$0xff] }
 0x3d2   : > { %10608 = vmatpush3.msra.mxu1 %v12953_v32  ;;  %10582 = vmatprep.mubr.f32.mxu1 %v15055_v43 }
 0x3d3   : > { %10609 = vmatprep.subr.mxu1 %v12960_v18 }
 0x3d4   : > { %10610 = vmatpush3.msra.mxu1 %v12960_v18  ;;  %10573 = vmatmul.mubr.f32.gmra.mxu0 %v12965_v50 }
 0x3d5   : > { %10583 = vmatmul.mubr.f32.gmra.mxu1 %v15056_v62  ;;  %10595 = vmatprep.mubr.f32.mxu0 %v12800_v23 }
 0x3d6   : > { %10585 = vmatprep.mubr.f32.mxu1 %v15057_v63  ;;  %v9670_v63 = vld [vmem:[%s14763_s5 + $0x98] sm:$0xff] }
 0x3d8   : > { %10596 = vmatmul.mubr.f32.vlgmr.msra.gmra.mxu0 %v12895_v46 }
 0x3d9   : > { %10586 = vmatmul.mubr.f32.gmra.mxu1 %v15058_v61  ;;  %10598 = vmatprep.mubr.f32.mxu0 %v12901_v3 }
 0x3da   : > { %10588 = vmatprep.mubr.f32.mxu1 %v15059_v24 }
 0x3dc   : > { %10599 = vmatmul.mubr.f32.gmra.mxu0 %v12909_v21 }
 0x3dd   : > { %10589 = vmatmul.mubr.f32.gmra.mxu1 %v4181_v55  ;;  %10601 = vmatprep.mubr.f32.mxu0 %v12919_v54 }
 0x3de   : > { %10611 = vmatprep.mubr.f32.mxu1 %v12800_v23 }
 0x3e0   : > { %10602 = vmatmul.mubr.f32.gmra.mxu0 %v12929_v5 }
 0x3e1   : > { %10612 = vmatmul.mubr.f32.vlgmr.msra.gmra.mxu1 %v12895_v46  ;;  %10604 = vmatprep.mubr.f32.mxu0 %v12932_v25 }
 0x3e2   : > { %10614 = vmatprep.mubr.f32.mxu1 %v12901_v3 }
 0x3e4   : > { %10605 = vmatmul.mubr.f32.gmra.mxu0 %v12945_v42 }
 0x3e5   : > { %10615 = vmatmul.mubr.f32.gmra.mxu1 %v12909_v21  ;;  %5048 = vmatprep.mubr.f32.mxu0 %v14910_v30 }
 0x3e6   : > { %10617 = vmatprep.mubr.f32.mxu1 %v12919_v54 }
 0x3e9   : > { %10618 = vmatmul.mubr.f32.gmra.mxu1 %v12929_v5 }
 0x3ea   : > { %10620 = vmatprep.mubr.f32.mxu1 %v12932_v25 }
 0x3ed   : > { %10621 = vmatmul.mubr.f32.gmra.mxu1 %v12945_v42 }
 0x3ee   : > { %5215 = vmatprep.mubr.f32.mxu1 %v14910_v30 }
 0x478   : > { %v10533_v33 = vpop.f32.mrf.mxu0 }
 0x479   : > { %v4126_v14 = vadd.f32 %v10533_v33, %v9668_v37 }
 0x47a   : > { %v13038_v46 = vpop.f32.mrf.mxu0 }
 0x47c   : > { %v10536_v3 = vpop.f32.mrf.mxu0 }
 0x47e   : > { %v13040_v23 = vpop.f32.mrf.mxu0 }
 0x480   : > { %v10539_v20 = vpop.f32.mrf.mxu0  ;;  %v10549_v21 = vpop.f32.mrf.mxu1 }
 0x481   : > { %v4166_v24 = vadd.f32 %v10539_v20, %v9672_v19  ;;  %v9673_v20 = vld [vmem:[%s14763_s5 + $0xb0] sm:$0xff] }
 0x482   : > { %v13042_v58 = vpop.f32.mrf.mxu0  ;;  %v13044_v49 = vpop.f32.mrf.mxu1 }
 0x483   : > { %15060 = vst [vmem:[#allocation137_spill] sm:$0xff] %v13044_v49 }
 0x484   : > { %v10542_v54 = vpop.f32.mrf.mxu0 }
 0x485   : > { %v10552_v5 = vpop.f32.mrf.mxu1 }
 0x486   : > { %v4175_v26 = vpop.f32.mrf.mxu0 }
 0x487   : > { %v13046_v25 = vpop.f32.mrf.mxu1  ;;  %v4176_v37 = vadd.f32 %v9673_v20, %v4175_v26 }
 0x488   : > { %v10565_v42 = vpop.f32.mrf.mxu0 }
 0x489   : > { %v10555_v6 = vpop.f32.mrf.mxu1 }
 0x48a   : > { %v13048_v32 = vpop.f32.mrf.mxu0  ;;  %v4297_v44 = vadd.f32 %v10555_v6, %v4166_v24  ;;  %v4273_v24 = vadd.f32 %v10549_v21, %v4126_v14 }
 0x48b   : > { %15061 = vst [vmem:[#allocation138_spill] sm:$0xff] %v13048_v32  ;;  %v13050_v41 = vpop.f32.mrf.mxu1  ;;  %v4186_v32 = vadd.f32 %v10542_v54, %v9674_v53  ;;  %v9671_v53 = vld [vmem:[%s14763_s5 + $0xa0] sm:$0xff] }
 0x48c   : > { %v10568_v1 = vpop.f32.mrf.mxu0  ;;  %v4156_v26 = vadd.f32 %v9671_v53, %v13042_v58 }
 0x48d   : > { %v10558_v18 = vpop.f32.mrf.mxu1 }
 0x48e   : > { %v13052_v28 = vpop.f32.mrf.mxu0  ;;  %v4309_v33 = vadd.f32 %v10558_v18, %v4186_v32  ;;  %v9649_v18 = vld [vmem:[%s14763_s5 + $0x50] sm:$0xff]  ;;  %v4291_v58 = vadd.f32 %v13050_v41, %v4156_v26  ;;  %v15074_v26 = vld [vmem:[#allocation136_spill] sm:$0xff] }
 0x48f   : > { %v4302_v50 = vpop.f32.mrf.mxu1 }
 0x490   : > { %v10571_v39 = vpop.f32.mrf.mxu0 }
 0x491   : > { %v10581_v38 = vpop.f32.mrf.mxu1 }
 0x492   : > { %v13054_v59 = vpop.f32.mrf.mxu0 }
 0x493   : > { %v13056_v45 = vpop.f32.mrf.mxu1 }
 0x494   : > { %15062 = vst [vmem:[#allocation139_spill] sm:$0xff] %v13056_v45  ;;  %v10574_v17 = vpop.f32.mrf.mxu0  ;;  %v4146_v45 = vadd.f32 %v10536_v3, %v9670_v63  ;;  %v2756_v63 = vadd.f32 %v9653_v35, %v12827_v15  ;;  %v9669_v35 = vld [vmem:[%s14763_s5 + $0x90] sm:$0xff] }
 0x495   : > { %v10584_v55 = vpop.f32.mrf.mxu1 }
 0x496   : > { %v4426_v48 = vpop.f32.mrf.mxu0  ;;  %v4285_v13 = vadd.f32 %v10552_v5, %v4146_v45  ;;  %v9651_v5 = vld [vmem:[%s14763_s5 + $0x60] sm:$0xff]  ;;  %v2883_v60 = vadd.f32 %v12840_v8, %v2756_v63 }
 0x497   : > { %v13058_v40 = vpop.f32.mrf.mxu1  ;;  %v15069_v63 = vld [vmem:[#allocation137_spill] sm:$0xff] }
 0x498   : > { %15063 = vst [vmem:[#allocation140_spill] sm:$0xff] %v13058_v40  ;;  %v13060_v31 = vpop.f32.mrf.mxu0  ;;  %v4420_v40 = vadd.f32 %v10571_v39, %v4297_v44  ;;  %v4406_v54 = vadd.f32 %v10568_v1, %v4285_v13  ;;  %v4303_v44 = vadd.f32 %v4302_v50, %v4176_v37  ;;  %v4434_v39 = vadd.f32 %v10574_v17, %v4309_v33 }
 0x499   : > { %v10587_v52 = vpop.f32.mrf.mxu1  ;;  %v4392_v13 = vadd.f32 %v10565_v42, %v4273_v24  ;;  %v3007_v8 = vadd.f32 %v12846_v36, %v2883_v60  ;;  %v2716_v60 = vadd.f32 %v9649_v18, %v12815_v10  ;;  %v9667_v36 = vld [vmem:[%s14763_s5 + $0x80] sm:$0xff]  ;;  %v15078_v18 = vld [vmem:[#allocation131_spill] sm:$0xff] }
 0x49a   : > { %v13062_v47 = vpop.f32.mrf.mxu0  ;;  %v4549_v6 = vadd.f32 %v10587_v52, %v4420_v40  ;;  %v4533_v45 = vadd.f32 %v10584_v55, %v4406_v54  ;;  %v4427_v15 = vadd.f32 %v4426_v48, %v4303_v44  ;;  %v9647_v10 = vld [vmem:[%s14763_s5 + $0x40] sm:$0xff] }
 0x49b   : > { %15064 = vst [vmem:[#allocation141_spill] sm:$0xff] %v13062_v47  ;;  %v13067_v43 = vpop.f32.mrf.mxu1  ;;  %v4517_v42 = vadd.f32 %v10581_v38, %v4392_v13  ;;  %v2859_v37 = vadd.f32 %v12832_v12, %v2716_v60 }
 0x49c   : > { %v10600_v62 = vpop.f32.mrf.mxu0 }
 0x49d   : > { %v10590_v61 = vpop.f32.mrf.mxu1  ;;  %v4660_v21 = vadd.f32 %v10600_v62, %v4533_v45  ;;  %v3137_v62 = vadd.f32 %v12856_v57, %v3007_v8  ;;  %v15073_v45 = vld [vmem:[#allocation129_spill] sm:$0xff]  ;;  %v15079_v8 = vld [vmem:[#allocation139_spill] sm:$0xff] }
 0x49e   : > { %v13072_v30 = vpop.f32.mrf.mxu0  ;;  %v4565_v14 = vadd.f32 %v10590_v61, %v4434_v39  ;;  %v4136_v61 = vadd.f32 %v9669_v35, %v13040_v23  ;;  %v15072_v39 = vld [vmem:[#allocation125_spill] sm:$0xff] }
 0x49f   : > { %15065 = vst [vmem:[#allocation142_spill] sm:$0xff] %v13072_v30  ;;  %v4556_v47 = vpop.f32.mrf.mxu1  ;;  %v3258_v57 = vadd.f32 %v12874_v11, %v3137_v62  ;;  %v4116_v11 = vadd.f32 %v9667_v36, %v13038_v46  ;;  %v15070_v24 = vld [vmem:[#allocation140_spill] sm:$0xff]  ;;  %v15083_v62 = vld [vmem:[#allocation130_spill] sm:$0xff] }
 0x4a0   : > { %v10603_v9 = vpop.f32.mrf.mxu0  ;;  %v4557_v55 = vadd.f32 %v4556_v47, %v4427_v15  ;;  %v15085_v36 = vld [vmem:[#allocation134_spill] sm:$0xff] }
 0x4a1   : > { %v10613_v7 = vpop.f32.mrf.mxu1  ;;  %v4672_v4 = vadd.f32 %v10603_v9, %v4549_v6  ;;  %v2736_v9 = vadd.f32 %v9651_v5, %v12820_v56  ;;  %v4413_v56 = vadd.f32 %v13054_v59, %v4291_v58  ;;  %v4267_v12 = vadd.f32 %v15069_v63, %v4116_v11  ;;  %v15071_v5 = vld [vmem:[#allocation132_spill] sm:$0xff]  ;;  %v15094_v11 = vld [vmem:[#allocation49_spill] sm:$0xff] }
 0x4a2   : > { %v13083_v19 = vpop.f32.mrf.mxu0  ;;  %v15099_v63 = vld [vmem:[#allocation36_spill] sm:$0xff] }
 0x4a3   : > { %v13085_v30 = vpop.f32.mrf.mxu1  ;;  %v4541_v23 = vadd.f32 %v13067_v43, %v4413_v56 }
 0x4a4   : > { %15066 = vst [vmem:[#allocation143_spill] sm:$0xff] %v13085_v30  ;;  %v10606_v49 = vpop.f32.mrf.mxu0 }
 0x4a5   : > { %v10616_v3 = vpop.f32.mrf.mxu1  ;;  %v4684_v40 = vadd.f32 %v10606_v49, %v4565_v14  ;;  %v4648_v49 = vadd.f32 %v13060_v31, %v4517_v42  ;;  %v4666_v33 = vadd.f32 %v13083_v19, %v4541_v23  ;;  %v15077_v14 = vld [vmem:[#allocation126_spill] sm:$0xff] }
 0x4a6   : > { %v4677_v50 = vpop.f32.mrf.mxu0  ;;  %v4775_v52 = vadd.f32 %v10616_v3, %v4660_v21  ;;  %v15076_v35 = vld [vmem:[#allocation142_spill] sm:$0xff] }
 0x4a7   : > { %v13094_v30 = vpop.f32.mrf.mxu1  ;;  %v4678_v41 = vadd.f32 %v4677_v50, %v4557_v55  ;;  %v4763_v47 = vadd.f32 %v10613_v7, %v4648_v49  ;;  %v2696_v7 = vadd.f32 %v9647_v10, %v12813_v27  ;;  %v15090_v10 = vld [vmem:[#allocation41_spill] sm:$0xff] }
 0x4a8   : > { %v4805_v3 = vadd.f32 %v4775_v52, %v12864_v0  ;;  %v15067_v0 = vld [vmem:[#allocation127_spill] sm:$0xff] }
 0x4a9   : > { %v10619_v32 = vpop.f32.mrf.mxu1  ;;  %v2979_v54 = vadd.f32 %v15067_v0, %v2859_v37  ;;  %v4803_v46 = vadd.f32 %v4763_v47, %v15071_v5  ;;  %v15093_v37 = vld [vmem:[#allocation53_spill] sm:$0xff] }
 0x4aa   : > { %v4787_v1 = vadd.f32 %v10619_v32, %v4672_v4  ;;  %v2871_v4 = vadd.f32 %v12836_v16, %v2736_v9  ;;  %v15075_v32 = vld [vmem:[#allocation138_spill] sm:$0xff]  ;;  %v15097_v0 = vld [vmem:[#allocation37_spill] sm:$0xff] }
 0x4ab   : > { %v4780_v17 = vpop.f32.mrf.mxu1  ;;  %v3105_v19 = vadd.f32 %v15073_v45, %v2979_v54  ;;  %v4385_v27 = vadd.f32 %v15075_v32, %v4267_v12  ;;  %v15084_v56 = vld [vmem:[#allocation143_spill] sm:$0xff]  ;;  %v15100_v12 = vld [vmem:[#allocation34_spill] sm:$0xff]  ;;  %v15105_v45 = vld [vmem:[#allocation45_spill] sm:$0xff] }
 0x4ac   : > { %v4807_v48 = vadd.f32 %v4787_v1, %v12868_v22  ;;  %v2993_v16 = vadd.f32 %v12842_v51, %v2871_v4  ;;  %v4279_v22 = vadd.f32 %v13046_v25, %v4136_v61  ;;  %v3373_v25 = vadd.f32 %v12876_v34, %v3258_v57  ;;  %v9678_v1 = vld [vmem:[%s14761_s3 + $0x38] sm:$0xff] }
 0x4ad   : > { %v10622_v20 = vpop.f32.mrf.mxu1  ;;  %v4781_v44 = vadd.f32 %v4780_v17, %v4666_v33  ;;  %v3234_v9 = vadd.f32 %v15078_v18, %v3105_v19  ;;  %v4509_v58 = vadd.f32 %v15079_v8, %v4385_v27  ;;  %v15080_v17 = vld [vmem:[#allocation128_spill] sm:$0xff]  ;;  %v15108_v27 = vld [vmem:[#allocation69_spill] sm:$0xff] }
 0x4ae   : > { %v4799_v38 = vadd.f32 %v10622_v20, %v4684_v40  ;;  %4837 = vperm.xlu0 %11086, %v4807_v48   ;;  %v3121_v51 = vadd.f32 %v12852_v29, %v2993_v16  ;;  %v4399_v43 = vadd.f32 %v13052_v28, %v4279_v22  ;;  %v2847_v28 = vadd.f32 %v15072_v39, %v2696_v7  ;;  %v15081_v40 = vld [vmem:[#allocation135_spill] sm:$0xff]  ;;  %v15082_v48 = vld [vmem:[#allocation141_spill] sm:$0xff]  ;;  %v15087_v16 = vld [vmem:[#allocation48_spill] sm:$0xff] }
 0x4af   : > { %v4792_v59 = vpop.f32.mrf.mxu1  ;;  %v3349_v52 = vadd.f32 %v15081_v40, %v3234_v9  ;;  %v4642_v4 = vadd.f32 %v15082_v48, %v4509_v58  ;;  %v15088_v22 = vld [vmem:[#allocation54_spill] sm:$0xff]  ;;  %v15096_v7 = vld [vmem:[#allocation33_spill] sm:$0xff]  ;;  %v15113_v58 = vld [vmem:[#allocation91_spill] sm:$0xff] }
 0x4b0   : > { %v4809_v31 = vadd.f32 %v4799_v38, %v12872_v2  ;;  %v4793_v53 = vadd.f32 %v4792_v59, %v4678_v41  ;;  %v15068_v2 = vld [vmem:[#allocation133_spill] sm:$0xff]  ;;  %v4525_v29 = vadd.f32 %v15070_v24, %v4399_v43  ;;  %v2965_v21 = vadd.f32 %v15077_v14, %v2847_v28  ;;  %v15086_v38 = vld [vmem:[#allocation32_spill] sm:$0xff]  ;;  %v15089_v59 = vld [vmem:[#allocation31_spill] sm:$0xff] }
 0x4b1   : > { %v3246_v6 = vadd.f32 %v15068_v2, %v3121_v51  ;;  %v4757_v20 = vadd.f32 %v15084_v56, %v4642_v4  ;;  %v1253_v57 = vadd.f32 %v15087_v16, %v15086_v38  ;;  %v1231_v47 = vadd.f32 %v15090_v10, %v15089_v59  ;;  %v15095_v43 = vld [vmem:[#allocation70_spill] sm:$0xff]  ;;  %v15104_v28 = vld [vmem:[#allocation35_spill] sm:$0xff] }
 0x4b2   : > { %4827 = vperm.xlu0 %11086, %v4805_v3   ;;  %4847 = vperm.xlu1 %11087, %v4809_v31   ;;  %v4808_v34 = vadd.f32 %v4793_v53, %v3373_v25  ;;  %v4654_v15 = vadd.f32 %v15076_v35, %v4525_v29  ;;  %v3089_v55 = vadd.f32 %v15080_v17, %v2965_v21  ;;  %v15091_v3 = vld [vmem:[#allocation65_spill] sm:$0xff]  ;;  %v15092_v53 = vld [vmem:[#allocation30_spill] sm:$0xff]  ;;  %v15110_v21 = vld [vmem:[#allocation40_spill] sm:$0xff] }
 0x4b3   : > { %v3361_v13 = vadd.f32 %v15074_v26, %v3246_v6  ;;  %v1402_v23 = vadd.f32 %v15088_v22, %v1253_v57  ;;  %v1275_v51 = vadd.f32 %v15093_v37, %v15092_v53  ;;  %v1388_v25 = vadd.f32 %v15094_v11, %v1231_v47  ;;  %v15098_v2 = vld [vmem:[#allocation58_spill] sm:$0xff]  ;;  %v15101_v29 = vld [vmem:[#allocation61_spill] sm:$0xff]  ;;  %v15122_v57 = vld [vmem:[#allocation63_spill] sm:$0xff] }
 0x4b4   : > { %v4769_v42 = vadd.f32 %v13094_v30, %v4654_v15  ;;  %v3222_v61 = vadd.f32 %v15083_v62, %v3089_v55  ;;  %v9677_v30 = vld [vmem:[%s14761_s3 + $0x30] sm:$0xff]  ;;  %v1209_v54 = vadd.f32 %v15097_v0, %v15096_v7  ;;  %v1198_v24 = vadd.f32 %v15100_v12, %v15099_v63  ;;  %v15106_v26 = vld [vmem:[#allocation29_spill] sm:$0xff]  ;;  %v15112_v9 = vld [vmem:[#allocation66_spill] sm:$0xff] }
 0x4b5   : > { %v4806_v50 = vadd.f32 %v4781_v44, %v3361_v13  ;;  %v1537_v31 = vadd.f32 %v15091_v3, %v1402_v23  ;;  %v1416_v6 = vadd.f32 %v15098_v2, %v1275_v51  ;;  %v1521_v5 = vadd.f32 %v15101_v29, %v1388_v25  ;;  %v15107_v13 = vld [vmem:[#allocation51_spill] sm:$0xff]  ;;  %v15115_v55 = vld [vmem:[#allocation56_spill] sm:$0xff]  ;;  %v15117_v4 = vld [vmem:[#allocation74_spill] sm:$0xff] }
 0x4b6   : > { %4817 = vperm.xlu0 %11086, %v4803_v46   ;;  %4842 = vperm.xlu1 %11087, %v4808_v34   ;;  %v4804_v60 = vadd.f32 %v4769_v42, %v3349_v52  ;;  %v3337_v49 = vadd.f32 %v15085_v36, %v3222_v61  ;;  %v15102_v46 = vld [vmem:[#allocation85_spill] sm:$0xff]  ;;  %v15103_v34 = vld [vmem:[#allocation42_spill] sm:$0xff]  ;;  %v1242_v19 = vadd.f32 %v15105_v45, %v15104_v28  ;;  %v15109_v15 = vld [vmem:[#allocation39_spill] sm:$0xff] }
 0x4b7   : > { %v1676_v33 = vadd.f32 %v15095_v43, %v1537_v31  ;;  %v1374_v39 = vadd.f32 %v15103_v34, %v1209_v54  ;;  %v1264_v32 = vadd.f32 %v15107_v13, %v15106_v26  ;;  %v1553_v35 = vadd.f32 %v15108_v27, %v1416_v6  ;;  %v15116_v52 = vld [vmem:[#allocation57_spill] sm:$0xff]  ;;  %v15118_v56 = vld [vmem:[#allocation46_spill] sm:$0xff]  ;;  %v15123_v23 = vld [vmem:[#allocation67_spill] sm:$0xff] }
 0x4b8   : > { %v4802_v41 = vadd.f32 %v4757_v20, %v3337_v49  ;;  %v1367_v14 = vadd.f32 %v15109_v15, %v1198_v24  ;;  %v1658_v8 = vadd.f32 %v15112_v9, %v1521_v5  ;;  %v15120_v49 = vld [vmem:[#allocation90_spill] sm:$0xff]  ;;  %v15124_v10 = vld [vmem:[#allocation95_spill] sm:$0xff]  ;;  %v15127_v25 = vld [vmem:[#allocation68_spill] sm:$0xff] }
 0x4b9   : > { %v1813_v44 = vadd.f32 %v15102_v46, %v1676_v33  ;;  %v1409_v40 = vadd.f32 %v15115_v55, %v1264_v32  ;;  %v1505_v48 = vadd.f32 %v15116_v52, %v1374_v39  ;;  %v1694_v62 = vadd.f32 %v15117_v4, %v1553_v35  ;;  %v15121_v38 = vld [vmem:[#allocation62_spill] sm:$0xff]  ;;  %v15125_v3 = vld [vmem:[#allocation59_spill] sm:$0xff]  ;;  %v15128_v33 = vld [vmem:[#allocation72_spill] sm:$0xff] }
 0x4ba   : > { %4959 = vperm.xlu0 %11086, %v9678_v1   ;;  %4832 = vperm.xlu1 %11087, %v4806_v50   ;;  %v15111_v1 = vld [vmem:[#allocation38_spill] sm:$0xff]  ;;  %v15114_v50 = vld [vmem:[#allocation52_spill] sm:$0xff]  ;;  %v15129_v0 = vld [vmem:[#allocation73_spill] sm:$0xff] }
 0x4bb   : > { %v1220_v18 = vadd.f32 %v15111_v1, %v15110_v21  ;;  %v1938_v42 = vadd.f32 %v15113_v58, %v1813_v44  ;;  %v1395_v17 = vadd.f32 %v15114_v50, %v1242_v19  ;;  %v1640_v16 = vadd.f32 %v15121_v38, %v1505_v48  ;;  %v15126_v53 = vld [vmem:[#allocation86_spill] sm:$0xff]  ;;  %v15130_v2 = vld [vmem:[#allocation96_spill] sm:$0xff]  ;;  %v9675_v24 = vld [vmem:[%s14760_s2 + $0x30] sm:$0xff] }
 0x4bc   : > { %v1545_v59 = vadd.f32 %v15123_v23, %v1409_v40  ;;  %v1827_v47 = vadd.f32 %v15124_v10, %v1694_v62  ;;  %v15131_v29 = vld [vmem:[#allocation84_spill] sm:$0xff]  ;;  %v15132_v44 = vld [vmem:[#allocation94_spill] sm:$0xff]  ;;  %v4963_v35 = vsel %vm332_vm0, %v9675_v24, 0  ;;  %v15137_v9 = vld [vmem:[#allocation93_spill] sm:$0xff] }
 0x4bd   : > { %v1381_v20 = vadd.f32 %v15118_v56, %v1220_v18  ;;  %v1529_v22 = vadd.f32 %v15122_v57, %v1395_v17  ;;  %v1785_v54 = vadd.f32 %v15129_v0, %v1640_v16  ;;  %v15133_v39 = vld [vmem:[#allocation80_spill] sm:$0xff]  ;;  %v15136_v1 = vld [vmem:[#allocation82_spill] sm:$0xff]  ;;  %v15140_v4 = vld [vmem:[#allocation89_spill] sm:$0xff]  ;;  %v13221_v56 = vand.u32 4294901760, %v4963_v35 }
 0x4be   : > { %4822 = vperm.xlu1 %11087, %v4804_v60   ;;  %v15119_v60 = vld [vmem:[#allocation79_spill] sm:$0xff]  ;;  %v1685_v7 = vadd.f32 %v15128_v33, %v1545_v59  ;;  %v1952_v6 = vadd.f32 %v15130_v2, %v1827_v47  ;;  %v15134_v45 = vld [vmem:[#allocation88_spill] sm:$0xff]  ;;  %v15138_v17 = vld [vmem:[#allocation78_spill] sm:$0xff] }
 0x4bf   : > { %v1799_v36 = vadd.f32 %v15119_v60, %v1658_v8  ;;  %v1513_v31 = vadd.f32 %v15125_v3, %v1381_v20  ;;  %v1667_v43 = vadd.f32 %v15127_v25, %v1529_v22  ;;  %v1910_v28 = vadd.f32 %v15133_v39, %v1785_v54  ;;  %v15135_v15 = vld [vmem:[#allocation64_spill] sm:$0xff]  ;;  %v15143_v23 = vld [vmem:[#allocation87_spill] sm:$0xff]  ;;  %v15148_v24 = vld [vmem:[#allocation77_spill] sm:$0xff] }
 0x4c0   : > { %v1820_v19 = vadd.f32 %v15134_v45, %v1685_v7  ;;  %v15139_v52 = vld [vmem:[#allocation92_spill] sm:$0xff]  ;;  %v15147_v7 = vld [vmem:[#allocation81_spill] sm:$0xff]  ;;  %v15149_v45 = vld [vmem:[#allocation75_spill] sm:$0xff] }
 0x4c1   : > { %v1924_v37 = vadd.f32 %v15126_v53, %v1799_v36  ;;  %v1649_v21 = vadd.f32 %v15135_v15, %v1513_v31  ;;  %v1806_v18 = vadd.f32 %v15136_v1, %v1667_v43  ;;  %v9676_v22 = vld [vmem:[%s14760_s2 + $0x38] sm:$0xff]  ;;  %v15145_v31 = vld [vmem:[#allocation83_spill] sm:$0xff] }
 0x4c2   : > { %4812 = vperm.xlu1 %11087, %v4802_v41   ;;  %v1945_v8 = vadd.f32 %v15137_v9, %v1820_v19  ;;  %v15144_v47 = vld [vmem:[#allocation60_spill] sm:$0xff]  ;;  %v15146_v43 = vld [vmem:[#allocation71_spill] sm:$0xff] }
 0x4c3   : > { %v1931_v62 = vadd.f32 %v15140_v4, %v1806_v18 }
 0x4c6   : > { %4954 = vperm.xlu1 %11087, %v9677_v30  }
 0x529   : > { %v4838_v61 = vpop.permute.xlu0 %4837 }
 0x52a   : > { %v4860_v41 = vadd.f32 %v4838_v61, %v15120_v49  ;;  %v4861_v30 = vadd.f32 %v4838_v61, %v1938_v42  ;;  %v15141_v49 = vld [vmem:[#allocation55_spill] sm:$0xff] }
 0x52c   : > { %v4876_v51 = vmul.f32 0.5, %v4860_v41  ;;  %v4877_v11 = vmul.f32 0.5, %v4861_v30  ;;  %v1497_v41 = vadd.f32 %v15141_v49, %v1367_v14  ;;  %v15142_v30 = vld [vmem:[#allocation76_spill] sm:$0xff]  ;;  %v13232_v14 = vsub.f32 %v4963_v35, %v13221_v56 }
 0x52d   : > { %v4828_v63 = vpop.permute.xlu0 %4827  ;;  %v4848_v12 = vpop.permute.xlu1 %4847  ;;  %v1792_v38 = vadd.f32 %v15142_v30, %v1649_v21  ;;  %v15150_v21 = vld [vmem:[#allocation10_spill] sm:$0xff] }
 0x52e   : > { %11088 = vtanh.f32 %v4876_v51  ;;  %v4856_v5 = vadd.f32 %v4828_v63, %v15131_v29  ;;  %v4857_v46 = vadd.f32 %v4828_v63, %v1924_v37  ;;  %v4864_v34 = vadd.f32 %v4848_v12, %v15132_v44 }
 0x52f   : > { %11090 = vtanh.f32 %v4877_v11  ;;  %v4865_v26 = vadd.f32 %v4848_v12, %v1952_v6  ;;  %v1631_v3 = vadd.f32 %v15144_v47, %v1497_v41  ;;  %v1917_v53 = vadd.f32 %v15145_v31, %v1792_v38 }
 0x530   : > { %v4872_v13 = vmul.f32 0.5, %v4856_v5  ;;  %v4873_v32 = vmul.f32 0.5, %v4857_v46  ;;  %v4880_v27 = vmul.f32 0.5, %v4864_v34  ;;  %v4966_v11 = vsel %vm332_vm0, %v9676_v22, 0 }
 0x531   : > { %v4881_v58 = vmul.f32 0.5, %v4865_v26  ;;  %v4818_v42 = vpop.permute.xlu0 %4817  ;;  %v4843_v50 = vpop.permute.xlu1 %4842  ;;  %v1778_v33 = vadd.f32 %v15146_v43, %v1631_v3  ;;  %v14877_v6 = vand.u32 4294901760, %v13232_v14  ;;  %v13238_v63 = vand.u32 4294901760, %v4966_v11  ;;  %v15154_v3 = vld [vmem:[#allocation6_spill] sm:$0xff] }
 0x532   : > { %11092 = vtanh.f32 %v4872_v13  ;;  %v4852_v55 = vadd.f32 %v4818_v42, %v15138_v17  ;;  %v4853_v40 = vadd.f32 %v4818_v42, %v1910_v28  ;;  %v4862_v48 = vadd.f32 %v4843_v50, %v15139_v52  ;;  %v15151_v42 = vld [vmem:[#allocation9_spill] sm:$0xff] }
 0x533   : > { %11094 = vtanh.f32 %v4873_v32  ;;  %v4863_v61 = vadd.f32 %v4843_v50, %v1945_v8  ;;  %v1903_v29 = vadd.f32 %v15148_v24, %v1778_v33  ;;  %v13248_v35 = vsub.f32 %v4966_v11, %v13238_v63 }
 0x534   : > { %11096 = vtanh.f32 %v4880_v27  ;;  %v4868_v20 = vmul.f32 0.5, %v4852_v55  ;;  %v4869_v60 = vmul.f32 0.5, %v4853_v40  ;;  %v4878_v36 = vmul.f32 0.5, %v4862_v48 }
 0x535   : > { %11098 = vtanh.f32 %v4881_v58  ;;  %v4879_v16 = vmul.f32 0.5, %v4863_v61  ;;  %v4833_v57 = vpop.permute.xlu1 %4832  ;;  %v13245_v27 = vsub.f32 %v13232_v14, %v14877_v6 }
 0x536   : > { %11100 = vtanh.f32 %v4868_v20  ;;  %v4858_v59 = vadd.f32 %v4833_v57, %v15143_v23  ;;  %v4859_v10 = vadd.f32 %v4833_v57, %v1931_v62  ;;  %v15153_v57 = vld [vmem:[#allocation13_spill] sm:$0xff]  ;;  %v15165_v20 = vld [vmem:[#allocation19_spill] sm:$0xff] }
 0x537   : > { %11102 = vtanh.f32 %v4869_v60 }
 0x538   : > { %11104 = vtanh.f32 %v4878_v36  ;;  %v4874_v37 = vmul.f32 0.5, %v4858_v59  ;;  %v4875_v51 = vmul.f32 0.5, %v4859_v10  ;;  %v15152_v36 = vld [vmem:[#allocation14_spill] sm:$0xff] }
 0x539   : > { %11106 = vtanh.f32 %v4879_v16  ;;  %v4823_v25 = vpop.permute.xlu1 %4822 }
 0x53a   : > { %11108 = vtanh.f32 %v4874_v37  ;;  %v4854_v0 = vadd.f32 %v4823_v25, %v15147_v7  ;;  %v4855_v54 = vadd.f32 %v4823_v25, %v1917_v53  ;;  %v15155_v25 = vld [vmem:[#allocation5_spill] sm:$0xff] }
 0x53b   : > { %v11089_v2 = vpop.eup %11088  ;;  %11110 = vtanh.f32 %v4875_v51 }
 0x53c   : > { %v11091_v12 = vpop.eup %11090  ;;  %v4908_v5 = vmul.f32 0.5, %v11089_v2  ;;  %v4870_v46 = vmul.f32 0.5, %v4854_v0  ;;  %v4871_v44 = vmul.f32 0.5, %v4855_v54 }
 0x53d   : > { %v4909_v34 = vmul.f32 0.5, %v11091_v12  ;;  %v4813_v39 = vpop.permute.xlu1 %4812 }
 0x53e   : > { %v4924_v28 = vadd.f32 0.5, %v4908_v5  ;;  %11112 = vtanh.f32 %v4870_v46  ;;  %v4850_v19 = vadd.f32 %v4813_v39, %v15149_v45  ;;  %v4851_v26 = vadd.f32 %v4813_v39, %v1903_v29  ;;  %v15156_v39 = vld [vmem:[#allocation8_spill] sm:$0xff] }
 0x53f   : > { %v11093_v13 = vpop.eup %11092  ;;  %v4925_v32 = vadd.f32 0.5, %v4909_v34  ;;  %11114 = vtanh.f32 %v4871_v44 }
 0x540   : > { %v11095_v15 = vpop.eup %11094  ;;  %v13251_v1 = vmul.f32 %v4924_v28, %v15150_v21  ;;  %v4904_v18 = vmul.f32 0.5, %v11093_v13  ;;  %v4866_v9 = vmul.f32 0.5, %v4850_v19  ;;  %v4867_v8 = vmul.f32 0.5, %v4851_v26 }
 0x541   : > { %v11097_v58 = vpop.eup %11096  ;;  %v13254_v50 = vmul.f32 %v4925_v32, %v15151_v42  ;;  %v4905_v17 = vmul.f32 0.5, %v11095_v15  ;;  %v15157_v32 = vld [vmem:[#allocation18_spill] sm:$0xff] }
 0x542   : > { %v11099_v55 = vpop.eup %11098  ;;  %v4920_v40 = vadd.f32 0.5, %v4904_v18  ;;  %v4912_v52 = vmul.f32 0.5, %v11097_v58  ;;  %11116 = vtanh.f32 %v4866_v9  ;;  %v13257_v48 = vand.u32 4294901760, %v13251_v1  ;;  %v15158_v18 = vld [vmem:[#allocation7_spill] sm:$0xff] }
 0x543   : > { %v11101_v4 = vpop.eup %11100  ;;  %v4921_v62 = vadd.f32 0.5, %v4905_v17  ;;  %v4913_v61 = vmul.f32 0.5, %v11099_v55  ;;  %11118 = vtanh.f32 %v4867_v8  ;;  %v6599_v10 = vadd.f32 %v13254_v50, %v13251_v1  ;;  %v15159_v55 = vld [vmem:[#allocation12_spill] sm:$0xff] }
 0x544   : > { %v11103_v60 = vpop.eup %11102  ;;  %v13261_v49 = vmul.f32 %v4920_v40, %v15152_v36  ;;  %v4928_v41 = vadd.f32 0.5, %v4912_v52  ;;  %v4900_v30 = vmul.f32 0.5, %v11101_v4  ;;  %v13273_v37 = vand.u32 4294901760, %v13254_v50 }
 0x545   : > { %v11105_v16 = vpop.eup %11104  ;;  %v13265_v22 = vmul.f32 %v4921_v62, %v15153_v57  ;;  %v4929_v23 = vadd.f32 0.5, %v4913_v61  ;;  %v4901_v59 = vmul.f32 0.5, %v11103_v60  ;;  %v13277_v51 = vsub.f32 %v13251_v1, %v13257_v48  ;;  %v15160_v61 = vld [vmem:[#allocation11_spill] sm:$0xff] }
 0x546   : > { %v11107_v47 = vpop.eup %11106  ;;  %v13270_v31 = vmul.f32 %v4928_v41, %v15154_v3  ;;  %v4910_v53 = vmul.f32 0.5, %v11105_v16  ;;  %v4916_v33 = vadd.f32 0.5, %v4900_v30  ;;  %v13283_v0 = vand.u32 4294901760, %v13261_v49 }
 0x547   : > { %v11109_v11 = vpop.eup %11108  ;;  %v13280_v43 = vmul.f32 %v4929_v23, %v15155_v25  ;;  %v4911_v7 = vmul.f32 0.5, %v11107_v47  ;;  %v4917_v2 = vadd.f32 0.5, %v4901_v59  ;;  %v6593_v34 = vadd.f32 %v13265_v22, %v13261_v49  ;;  %v15161_v23 = vld [vmem:[#allocation17_spill] sm:$0xff] }
 0x548   : > { %v11111_v54 = vpop.eup %11110  ;;  %v4926_v12 = vadd.f32 0.5, %v4910_v53  ;;  %v4906_v24 = vmul.f32 0.5, %v11109_v11  ;;  %v13286_v29 = vand.u32 4294901760, %v13270_v31  ;;  %v13303_v15 = vmul.f32 %v4916_v33, %v15157_v32 }
 0x549   : > { %v4927_v5 = vadd.f32 0.5, %v4911_v7  ;;  %v4907_v46 = vmul.f32 0.5, %v11111_v54  ;;  %v13289_v44 = vand.u32 4294901760, %v13280_v43  ;;  %v6605_v19 = vadd.f32 %v13280_v43, %v13270_v31 }
 0x54a   : > { %v13294_v28 = vmul.f32 %v4926_v12, %v15156_v39  ;;  %v4922_v45 = vadd.f32 0.5, %v4906_v24  ;;  %v13300_v26 = vsub.f32 %v13270_v31, %v13286_v29  ;;  %v13330_v59 = vmul.f32 %v4917_v2, %v15161_v23 }
 0x54b   : > { %v11113_v13 = vpop.eup %11112  ;;  %v13306_v9 = vmul.f32 %v4927_v5, %v15158_v18  ;;  %v4923_v8 = vadd.f32 0.5, %v4907_v46  ;;  %4985 = vmatprep.subr.mxu0 %v13289_v44  ;;  %v13311_v58 = vsub.f32 %v13280_v43, %v13289_v44  ;;  %6606 = vadd.xlane.f32.xlu0 %v6605_v19  ;;  %v15162_v5 = vld [vmem:[#allocation16_spill] sm:$0xff]  ;;  %v7979_v39 = vmax.f32 %v13270_v31, %v13280_v43 }
 0x54c   : > { %v11115_v17 = vpop.eup %11114  ;;  %v13314_v40 = vmul.f32 %v4922_v45, %v15159_v55  ;;  %v4902_v52 = vmul.f32 0.5, %v11113_v13  ;;  %4987 = vmatpush1.msra.mxu0 %v13286_v29  ;;  %v13318_v4 = vand.u32 4294901760, %v13294_v28  ;;  %v14878_v62 = vand.u32 4294901760, %v13300_v26 }
 0x54d   : > { %v13322_v60 = vmul.f32 %v4923_v8, %v15160_v61  ;;  %v4903_v41 = vmul.f32 0.5, %v11115_v17  ;;  %v13325_v30 = vand.u32 4294901760, %v13306_v9  ;;  %v6602_v16 = vadd.f32 %v13306_v9, %v13294_v28  ;;  %v15163_v8 = vld [vmem:[#allocation15_spill] sm:$0xff] }
 0x54e   : > { %v4918_v47 = vadd.f32 0.5, %v4902_v52  ;;  %v14879_v53 = vand.u32 4294901760, %v13311_v58  ;;  %v5096_v11 = vsub.f32 %v13300_v26, %v14878_v62  ;;  %v13341_v12 = vand.u32 4294901760, %v13314_v40 }
 0x54f   : > { %v11117_v33 = vpop.eup %11116  ;;  %v4919_v7 = vadd.f32 0.5, %v4903_v41  ;;  %4989 = vmatprep.subr.mxu0 %v13325_v30  ;;  %6603 = vadd.xlane.f32.xlu1 %v6602_v16  ;;  %v13338_v54 = vand.u32 4294901760, %v13322_v60  ;;  %v13345_v2 = vsub.f32 %v13306_v9, %v13325_v30  ;;  %v6596_v13 = vadd.f32 %v13322_v60, %v13314_v40 }
 0x550   : > { %v11119_v24 = vpop.eup %11118  ;;  %v13348_v46 = vmul.f32 %v4918_v47, %v15162_v5  ;;  %v4898_v45 = vmul.f32 0.5, %v11117_v33  ;;  %6600 = vadd.xlane.f32.xlu0 %v6599_v10  ;;  %4991 = vmatpush1.msra.mxu0 %v13318_v4  ;;  %v5090_v19 = vsub.f32 %v13311_v58, %v14879_v53  ;;  %v5097_v41 = vand.u32 4294901760, %v5096_v11 }
 0x551   : > { %v13357_v17 = vmul.f32 %v4919_v7, %v15163_v8  ;;  %v4899_v52 = vmul.f32 0.5, %v11119_v24  ;;  %4993 = vmatprep.subr.mxu0 %v13273_v37  ;;  %v14880_v16 = vand.u32 4294901760, %v13345_v2  ;;  %v13363_v33 = vand.u32 4294901760, %v13265_v22 }
 0x552   : > { %v4914_v47 = vadd.f32 0.5, %v4898_v45  ;;  %4995 = vmatpush1.msra.mxu0 %v13257_v48  ;;  %v5091_v10 = vand.u32 4294901760, %v5090_v19  ;;  %v13367_v6 = vsub.f32 %v13294_v28, %v13318_v4  ;;  %v6587_v24 = vadd.f32 %v13330_v59, %v13303_v15  ;;  %v15164_v45 = vld [vmem:[#allocation20_spill] sm:$0xff] }
 0x553   : > { %v4915_v62 = vadd.f32 0.5, %v4899_v52  ;;  %4997 = vmatprep.subr.mxu0 %v13338_v54  ;;  %6594 = vadd.xlane.f32.xlu1 %v6593_v34  ;;  %v13371_v7 = vand.u32 4294901760, %v13357_v17  ;;  %v5102_v11 = vsub.f32 %v13345_v2, %v14880_v16  ;;  %v6590_v52 = vadd.f32 %v13357_v17, %v13348_v46 }
 0x554   : > { %v13379_v19 = vmul.f32 %v4914_v47, %v15164_v45  ;;  %5092 = vmatprep.subr.mxu1 %v5091_v10  ;;  %6597 = vadd.xlane.f32.xlu0 %v6596_v13  ;;  %v14881_v34 = vand.u32 4294901760, %v13367_v6  ;;  %v13386_v53 = vsub.f32 %v13254_v50, %v13273_v37  ;;  %v13393_v47 = vand.u32 4294901760, %v13348_v46 }
 0x555   : > { %v13389_v38 = vmul.f32 %v4915_v62, %v15165_v20  ;;  %4999 = vmatpush1.msra.mxu0 %v13341_v12  ;;  %5098 = vmatpush1.msra.mxu1 %v5097_v41  ;;  %v5103_v16 = vand.u32 4294901760, %v5102_v11  ;;  %v14882_v13 = vand.u32 4294901760, %v13277_v51  ;;  %v13401_v18 = vand.u32 4294901760, %v13330_v59 }
 0x556   : > { %5001 = vmatprep.subr.mxu0 %v13363_v33  ;;  %v5108_v10 = vsub.f32 %v13367_v6, %v14881_v34  ;;  %v13406_v41 = vsub.f32 %v13322_v60, %v13338_v54  ;;  %v15166_v3 = vand.u32 4294901760, %v13386_v53  ;;  %v13430_v31 = vand.u32 4294901760, %v13303_v15 }
 0x557   : > { %5003 = vmatpush1.msra.mxu0 %v13283_v0  ;;  %5104 = vmatprep.subr.mxu1 %v5103_v16  ;;  %v5120_v11 = vsub.f32 %v13277_v51, %v14882_v13  ;;  %v13415_v34 = vand.u32 4294901760, %v13389_v38  ;;  %v6584_v62 = vadd.f32 %v13389_v38, %v13379_v19  ;;  %v13426_v13 = vsub.f32 %v13314_v40, %v13341_v12 }
 0x558   : > { %5005 = vmatprep.subr.mxu0 %v13371_v7  ;;  %6591 = vadd.xlane.f32.xlu0 %v6590_v52  ;;  %v5109_v25 = vand.u32 4294901760, %v5108_v10  ;;  %v5114_v16 = vsub.f32 %v13386_v53, %v15166_v3  ;;  %v14883_v61 = vand.u32 4294901760, %v13406_v41  ;;  %v13434_v43 = vsub.f32 %v13265_v22, %v13363_v33 }
 0x559   : > { %6588 = vadd.xlane.f32.xlu1 %v6587_v24  ;;  %5007 = vmatpush1.msra.mxu0 %v13393_v47  ;;  %v13438_v52 = vsub.f32 %v13261_v49, %v13283_v0  ;;  %v13442_v3 = vsub.f32 %v13357_v17, %v13371_v7  ;;  %v13449_v55 = vand.u32 4294901760, %v13379_v19  ;;  %v14884_v42 = vand.u32 4294901760, %v13426_v13 }
 0x55a   : > { %5110 = vmatpush1.msra.mxu1 %v5109_v25  ;;  %5009 = vmatprep.subr.mxu0 %v13401_v18  ;;  %v5115_v24 = vand.u32 4294901760, %v5114_v16  ;;  %v5126_v10 = vsub.f32 %v13406_v41, %v14883_v61  ;;  %v5121_v21 = vand.u32 4294901760, %v5120_v11  ;;  %v14885_v8 = vand.u32 4294901760, %v13434_v43 }
 0x55b   : > { %5011 = vmatpush1.msra.mxu0 %v13430_v31  ;;  %v14886_v5 = vand.u32 4294901760, %v13438_v52  ;;  %v14887_v25 = vand.u32 4294901760, %v13442_v3  ;;  %v5132_v61 = vsub.f32 %v13426_v13, %v14884_v42  ;;  %v13462_v57 = vsub.f32 %v13348_v46, %v13393_v47 }
 0x55c   : > { %5116 = vmatprep.subr.mxu1 %v5115_v24  ;;  %v5127_v16 = vand.u32 4294901760, %v5126_v10  ;;  %5013 = vmatprep.subr.mxu0 %v13415_v34  ;;  %v13466_v11 = vsub.f32 %v13330_v59, %v13401_v18  ;;  %v5138_v24 = vsub.f32 %v13434_v43, %v14885_v8  ;;  %v15167_v23 = vand.u32 4294901760, %v13248_v35 }
 0x55d   : > { %5122 = vmatpush1.msra.mxu1 %v5121_v21  ;;  %7980 = vmax.xlane.f32.xlu1 %v7979_v39  ;;  %v5144_v10 = vsub.f32 %v13438_v52, %v14886_v5  ;;  %v5150_v42 = vsub.f32 %v13442_v3, %v14887_v25  ;;  %v5133_v36 = vand.u32 4294901760, %v5132_v61  ;;  %v5155_v20 = vand.u32 4294901760, %v13462_v57 }
 0x55e   : > { %5128 = vmatprep.subr.mxu1 %v5127_v16  ;;  %6585 = vadd.xlane.f32.xlu0 %v6584_v62  ;;  %v5161_v21 = vand.u32 4294901760, %v13466_v11  ;;  %v13481_v39 = vsub.f32 %v13303_v15, %v13430_v31  ;;  %v5139_v8 = vand.u32 4294901760, %v5138_v24  ;;  %v5063_v25 = vsub.f32 %v13248_v35, %v15167_v23 }
 0x55f   : > { %5015 = vmatpush1.msra.mxu0 %v13449_v55  ;;  %v5145_v45 = vand.u32 4294901760, %v5144_v10  ;;  %v5151_v5 = vand.u32 4294901760, %v5150_v42  ;;  %5134 = vmatpush1.msra.mxu1 %v5133_v36  ;;  %v15168_v61 = vand.u32 4294901760, %v13245_v27  ;;  %v5156_v62 = vsub.f32 %v13462_v57, %v5155_v20 }
 0x560   : > { %v5162_v16 = vsub.f32 %v13466_v11, %v5161_v21  ;;  %v5167_v24 = vand.u32 4294901760, %v13481_v39  ;;  %v13498_v42 = vsub.f32 %v13389_v38, %v13415_v34  ;;  %5140 = vmatprep.subr.mxu1 %v5139_v8  ;;  %5248 = vmatprep.subr.mxu0 %v13311_v58  ;;  %v7973_v27 = vmax.f32 %v13251_v1, %v13254_v50 }
 0x561   : > { %5054 = vmatmul.mubr.f32.vlgmr.msra.gmra.mxu0 %v15168_v61  ;;  %v13505_v36 = vsub.f32 %v13379_v19, %v13449_v55  ;;  %5146 = vmatpush1.msra.mxu1 %v5145_v45  ;;  %v7976_v23 = vmax.f32 %v13294_v28, %v13306_v9  ;;  %v5157_v10 = vand.u32 4294901760, %v5156_v62  ;;  %v5064_v1 = vand.u32 4294901760, %v5063_v25 }
 0x562   : > { %5251 = vmatpush1.msra.mxu0 %v13300_v26  ;;  %v5168_v8 = vsub.f32 %v13481_v39, %v5167_v24  ;;  %v5173_v61 = vand.u32 4294901760, %v13498_v42  ;;  %5152 = vmatprep.subr.mxu1 %v5151_v5  ;;  %v5163_v45 = vand.u32 4294901760, %v5162_v16  ;;  %v15169_v9 = vmov 0.0  }
 0x563   : > { %7974 = vmax.xlane.f32.xlu1 %v7973_v27  ;;  %v5179_v50 = vand.u32 4294901760, %v13505_v36  ;;  %7977 = vmax.xlane.f32.xlu0 %v7976_v23  ;;  %v7967_v16 = vmax.f32 %v13261_v49, %v13265_v22  ;;  %v7970_v23 = vmax.f32 %v13314_v40, %v13322_v60  ;;  %v7961_v49 = vmax.f32 %v13303_v15, %v13330_v59 }
 0x564   : > { %5254 = vmatprep.subr.mxu0 %v13345_v2  ;;  %v5174_v28 = vsub.f32 %v13498_v42, %v5173_v61  ;;  %5059 = vmatprep.mubr.f32.mxu0 %v15169_v9  ;;  %v5169_v5 = vand.u32 4294901760, %v5168_v8  ;;  %v7964_v22 = vmax.f32 %v13348_v46, %v13357_v17  ;;  %v7958_v15 = vmax.f32 %v13379_v19, %v13389_v38 }
 0x565   : > { %5158 = vmatpush1.msra.mxu1 %v5157_v10  ;;  %v5180_v62 = vsub.f32 %v13505_v36, %v5179_v50  ;;  %5257 = vmatpush1.msra.mxu0 %v13367_v6  ;;  %v15170_v38 = vand.u32 4294901760, %v13311_v58  ;;  %v15171_v40 = vand.u32 4294901760, %v13300_v26  ;;  %v15172_v60 = vand.u32 4294901760, %v13345_v2 }
 0x566   : > { %5164 = vmatprep.subr.mxu1 %v5163_v45  ;;  %v5175_v25 = vand.u32 4294901760, %v5174_v28  ;;  %5065 = vmatmul.mubr.f32.gmra.mxu0 %v5064_v1  ;;  %v15173_v59 = vand.u32 4294901760, %v13367_v6  ;;  %v15174_v58 = vand.u32 4294901760, %v13386_v53  ;;  %v15175_v26 = vand.u32 4294901760, %v13277_v51 }
 0x567   : > { %5260 = vmatprep.subr.mxu0 %v13386_v53  ;;  %v5181_v27 = vand.u32 4294901760, %v5180_v62  ;;  %5170 = vmatpush1.msra.mxu1 %v5169_v5  ;;  %v15176_v2 = vand.u32 4294901760, %v13406_v41  ;;  %v15177_v6 = vand.u32 4294901760, %v13426_v13  ;;  %v15178_v53 = vand.u32 4294901760, %v13232_v14 }
 0x568   : > { %5263 = vmatpush1.msra.mxu0 %v13277_v51  ;;  %7968 = vmax.xlane.f32.xlu1 %v7967_v16  ;;  %v15179_v46 = vand.u32 4294901760, %v13434_v43  ;;  %v9687_v51 = vld [vmem:[%s14763_s5 + $0xc0] sm:$0xff]  ;;  %v15180_v17 = vand.u32 4294901760, %v13438_v52  ;;  %v15181_v19 = vand.u32 4294901760, %v13442_v3 }
 0x569   : > { %5176 = vmatprep.subr.mxu1 %v5175_v25  ;;  %7971 = vmax.xlane.f32.xlu0 %v7970_v23  ;;  %v9681_v25 = vld [vmem:[%s14762_s4 + $0xd0] sm:$0xff] }
 0x56a   : > { %5266 = vmatprep.subr.mxu0 %v13406_v41  ;;  %5182 = vmatpush1.msra.mxu1 %v5181_v27  ;;  %v4955_v41 = vpop.permute.xlu1 %4954 }
 0x56b   : > { %5269 = vmatpush1.msra.mxu0 %v13426_v13  ;;  %5217 = vmatmul.mubr.f32.vlgmr.msra.gmra.mxu1 %v13221_v56 }
 0x56c   : > { %5272 = vmatprep.subr.mxu0 %v13434_v43  ;;  %5360 = vmatprep.subr.mxu1 %v13289_v44 }
 0x56d   : > { %5275 = vmatpush1.msra.mxu0 %v13438_v52  ;;  %5362 = vmatpush1.msra.mxu1 %v13286_v29 }
 0x56e   : > { %7962 = vmax.xlane.f32.xlu1 %v7961_v49  ;;  %7965 = vmax.xlane.f32.xlu0 %v7964_v22 }
 0x56f   : > { %5278 = vmatprep.subr.mxu0 %v13442_v3  ;;  %5364 = vmatprep.subr.mxu1 %v13325_v30  ;;  %v4960_v3 = vpop.permute.xlu0 %4959 }
 0x570   : > { %5222 = vmatprep.mubr.f32.mxu1 %v15169_v9  ;;  %5281 = vmatpush1.msra.mxu0 %v13462_v57  ;;  %v9691_v57 = vld [vmem:[%s14763_s5 + $0xe0] sm:$0xff] }
 0x571   : > { %5366 = vmatpush1.msra.mxu1 %v13318_v4  ;;  %5284 = vmatprep.subr.mxu0 %v13466_v11 }
 0x572   : > { %5224 = vmatmul.mubr.f32.gmra.mxu1 %v13238_v63  ;;  %5368 = vmatprep.subr.mxu1 %v13273_v37 }
 0x573   : > { %5287 = vmatpush1.msra.mxu0 %v13481_v39  ;;  %5370 = vmatpush1.msra.mxu1 %v13257_v48 }
 0x574   : > { %7959 = vmax.xlane.f32.xlu0 %v7958_v15  ;;  %5290 = vmatprep.subr.mxu0 %v13498_v42 }
 0x575   : > { %5372 = vmatprep.subr.mxu1 %v13338_v54  ;;  %5293 = vmatpush1.msra.mxu0 %v13505_v36 }
 0x576   : > { %5326 = vmatprep.mubr.f32.mxu0 %v15169_v9  ;;  %5374 = vmatpush1.msra.mxu1 %v13341_v12 }
 0x577   : > { %5329 = vmatmul.mubr.f32.vlgmr.msra.gmra.mxu0 %v13232_v14  ;;  %5376 = vmatprep.subr.mxu1 %v13363_v33  ;;  %v15182_v14 = vand.u32 4294901760, %v13248_v35 }
 0x578   : > { %5461 = vmatprep.subr.mxu0 %v15170_v38  ;;  %5378 = vmatpush1.msra.mxu1 %v13283_v0 }
 0x579   : > { %5465 = vmatpush1.msra.mxu0 %v15171_v40  ;;  %5380 = vmatprep.subr.mxu1 %v13371_v7 }
 0x57a   : > { %5469 = vmatprep.subr.mxu0 %v15172_v60  ;;  %5334 = vmatprep.mubr.f32.mxu0 %v15169_v9 }
 0x57b   : > { %5382 = vmatpush1.msra.mxu1 %v13393_v47  ;;  %5473 = vmatpush1.msra.mxu0 %v15173_v59  ;;  %v5733_v59 = vsel %vm1095_vm1, %v9681_v25, 0 }
 0x57c   : > { %5384 = vmatprep.subr.mxu1 %v13401_v18  ;;  %5337 = vmatmul.mubr.f32.gmra.mxu0 %v13248_v35  ;;  %v9690_v35 = vld [vmem:[%s14763_s5 + $0xd8] sm:$0xff] }
 0x57d   : > { %5477 = vmatprep.subr.mxu0 %v15174_v58  ;;  %5386 = vmatpush1.msra.mxu1 %v13430_v31 }
 0x57e   : > { %5481 = vmatpush1.msra.mxu0 %v15175_v26  ;;  %5388 = vmatprep.subr.mxu1 %v13415_v34 }
 0x57f   : > { %5485 = vmatprep.subr.mxu0 %v15176_v2  ;;  %5390 = vmatpush1.msra.mxu1 %v13449_v55 }
 0x580   : > { %5423 = vmatprep.mubr.f32.mxu1 %v15169_v9  ;;  %5489 = vmatpush1.msra.mxu0 %v15177_v6 }
 0x581   : > { %5427 = vmatmul.mubr.f32.vlgmr.msra.gmra.mxu1 %v15178_v53  ;;  %5493 = vmatprep.subr.mxu0 %v15179_v46 }
 0x582   : > { %5586 = vmatprep.subr.mxu1 %v13289_v44  ;;  %5497 = vmatpush1.msra.mxu0 %v15180_v17 }
 0x583   : > { %5588 = vmatpush1.msra.mxu1 %v13286_v29  ;;  %5501 = vmatprep.subr.mxu0 %v15181_v19  ;;  %v9689_v29 = vld [vmem:[%s14763_s5 + $0xd0] sm:$0xff] }
 0x584   : > { %5590 = vmatprep.subr.mxu1 %v13325_v30  ;;  %5688 = vperm.xlu1 %11087, %v9687_v51   ;;  %v9682_v51 = vld [vmem:[%s14762_s4 + $0xd8] sm:$0xff] }
 0x585   : > { %5432 = vmatprep.mubr.f32.mxu1 %v15169_v9  ;;  %5505 = vmatpush1.msra.mxu0 %v5155_v20  ;;  %v9692_v20 = vld [vmem:[%s14763_s5 + $0xe8] sm:$0xff] }
 0x586   : > { %5592 = vmatpush1.msra.mxu1 %v13318_v4  ;;  %5509 = vmatprep.subr.mxu0 %v5161_v21 }
 0x587   : > { %5436 = vmatmul.mubr.f32.gmra.mxu1 %v15182_v14  ;;  %5594 = vmatprep.subr.mxu1 %v13273_v37  ;;  %v9694_v37 = vld [vmem:[%s14763_s5 + $0xf8] sm:$0xff] }
 0x588   : > { %5513 = vmatpush1.msra.mxu0 %v5167_v24  ;;  %5596 = vmatpush1.msra.mxu1 %v13257_v48  ;;  %v9688_v48 = vld [vmem:[%s14763_s5 + $0xc8] sm:$0xff] }
 0x589   : > { %5517 = vmatprep.subr.mxu0 %v5173_v61  ;;  %5598 = vmatprep.subr.mxu1 %v13338_v54  ;;  %v9680_v24 = vld [vmem:[%s14762_s4 + $0xc8] sm:$0xff] }
 0x58a   : > { %5698 = vperm.xlu1 %11087, %v9689_v29   ;;  %5521 = vmatpush1.msra.mxu0 %v5179_v50  ;;  %v5730_v50 = vsel %vm1095_vm1, %v9680_v24, 0 }
 0x58b   : > { %5554 = vmatprep.mubr.f32.mxu0 %v15169_v9  ;;  %5600 = vmatpush1.msra.mxu1 %v13341_v12  ;;  %v13673_v60 = vand.u32 4294901760, %v5730_v50 }
 0x58c   : > { %5556 = vmatmul.mubr.f32.vlgmr.msra.gmra.mxu0 %v13221_v56  ;;  %5602 = vmatprep.subr.mxu1 %v13363_v33 }
 0x58d   : > { %5561 = vmatprep.mubr.f32.mxu0 %v15169_v9  ;;  %5604 = vmatpush1.msra.mxu1 %v13283_v0  ;;  %v9693_v0 = vld [vmem:[%s14763_s5 + $0xf0] sm:$0xff] }
 0x58e   : > { %5703 = vperm.xlu1 %11087, %v9690_v35   ;;  %5606 = vmatprep.subr.mxu1 %v13371_v7 }
 0x58f   : > { %5693 = vperm.xlu0 %11086, %v9688_v48   ;;  %5608 = vmatpush1.msra.mxu1 %v13393_v47 }
 0x590   : > { %5563 = vmatmul.mubr.f32.gmra.mxu0 %v13238_v63  ;;  %5610 = vmatprep.subr.mxu1 %v13401_v18 }
 0x591   : > { %5649 = vmatprep.mubr.f32.mxu1 %v15169_v9  ;;  %5612 = vmatpush1.msra.mxu1 %v13430_v31 }
 0x592   : > { %5713 = vperm.xlu1 %11087, %v9692_v20   ;;  %5614 = vmatprep.subr.mxu1 %v13415_v34  ;;  %v13681_v20 = vsub.f32 %v5730_v50, %v13673_v60 }
 0x593   : > { %5708 = vperm.xlu0 %11086, %v9691_v57   ;;  %5616 = vmatpush1.msra.mxu1 %v13449_v55  ;;  %v13683_v57 = vand.u32 4294901760, %v5733_v59 }
 0x594   : > { %5818 = vmatprep.mubr.f32.mxu0 %v15169_v9  ;;  %5651 = vmatmul.mubr.f32.vlgmr.msra.gmra.mxu1 %v13221_v56 }
 0x595   : > { %5656 = vmatprep.mubr.f32.mxu1 %v15169_v9 }
 0x596   : > { %5723 = vperm.xlu1 %11087, %v9694_v37  }
 0x597   : > { %5718 = vperm.xlu0 %11086, %v9693_v0  }
 0x598   : > { %5658 = vmatmul.mubr.f32.gmra.mxu1 %v13238_v63  ;;  %v9679_v63 = vld [vmem:[%s14762_s4 + $0xc0] sm:$0xff] }
 0x599   : > { %5991 = vmatprep.mubr.f32.mxu1 %v15169_v9  ;;  %v5727_v39 = vsel %vm1095_vm1, %v9679_v63, 0 }
 0x59a   : > { %v13664_v1 = vand.u32 4294901760, %v5727_v39 }
 0x59c   : > { %v13671_v40 = vsub.f32 %v5727_v39, %v13664_v1 }
 0x59e   : > { %v5821_v48 = vand.u32 4294901760, %v13671_v40 }
 0x621   : > { %v5055_v44 = vpop.f32.mrf.mxu0 }
 0x622   : > { %v5056_v43 = vadd.f32 %v5055_v44, %v4955_v41 }
 0x623   : > { %v5057_v18 = vpop.f32.mrf.mxu0 }
 0x624   : > { %v5058_v11 = vadd.f32 %v5057_v18, %v4955_v41  ;;  %v5736_v18 = vsel %vm1095_vm1, %v9682_v51, 0 }
 0x626   : > { %v5066_v4 = vpop.f32.mrf.mxu0 }
 0x627   : > { %v5067_v10 = vadd.f32 %v5066_v4, %v4960_v3 }
 0x628   : > { %v5068_v30 = vpop.f32.mrf.mxu0 }
 0x629   : > { %v5069_v45 = vadd.f32 %v5068_v30, %v4960_v3 }
 0x62b   : > { %v5218_v55 = vpop.f32.mrf.mxu1 }
 0x62c   : > { %v5219_v21 = vadd.f32 %v5218_v55, %v5056_v43 }
 0x62d   : > { %v5220_v54 = vpop.f32.mrf.mxu1 }
 0x62e   : > { %v5221_v8 = vadd.f32 %v5220_v54, %v5058_v11  ;;  %v9684_v11 = vld [vmem:[%s14762_s4 + $0xe8] sm:$0xff] }
 0x632   : > { %v5225_v33 = vpop.f32.mrf.mxu1 }
 0x633   : > { %v5226_v28 = vadd.f32 %v5225_v33, %v5067_v10  ;;  %v9683_v33 = vld [vmem:[%s14762_s4 + $0xe0] sm:$0xff] }
 0x634   : > { %v5227_v34 = vpop.f32.mrf.mxu1  ;;  %v5739_v43 = vsel %vm1095_vm1, %v9683_v33, 0 }
 0x635   : > { %v5228_v23 = vadd.f32 %v5227_v34, %v5069_v45  ;;  %v5832_v34 = vand.u32 4294901760, %v13681_v20  ;;  %v5742_v45 = vsel %vm1095_vm1, %v9684_v11, 0  ;;  %v6607_v11 = vpop.xlane.xlu0 %6606 }
 0x637   : > { %v5330_v12 = vpop.f32.mrf.mxu0  ;;  %v5833_v39 = vsub.f32 %v13681_v20, %v5832_v34 }
 0x638   : > { %v5331_v61 = vadd.f32 %v5330_v12, %v5219_v21 }
 0x639   : > { %v5332_v7 = vpop.f32.mrf.mxu0  ;;  %v5834_v25 = vand.u32 4294901760, %v5833_v39  ;;  %v6615_v39 = vmul.f32 0.00390625, %v6607_v11 }
 0x63a   : > { %v5333_v62 = vadd.f32 %v5332_v7, %v5221_v8  ;;  %v5822_v7 = vsub.f32 %v13671_v40, %v5821_v48 }
 0x63c   : > { %v5338_v47 = vpop.f32.mrf.mxu0  ;;  %v5823_v21 = vand.u32 4294901760, %v5822_v7 }
 0x63d   : > { %v5339_v49 = vadd.f32 %v5338_v47, %v5226_v28  ;;  %v13698_v47 = vsub.f32 %v5733_v59, %v13683_v57 }
 0x63e   : > { %v5340_v13 = vpop.f32.mrf.mxu0 }
 0x63f   : > { %v5341_v58 = vadd.f32 %v5340_v13, %v5228_v23  ;;  %v5843_v24 = vand.u32 4294901760, %v13698_v47 }
 0x641   : > { %v5428_v56 = vpop.f32.mrf.mxu1 }
 0x642   : > { %v5429_v5 = vadd.f32 %v5428_v56, %v5331_v61  ;;  %v13700_v56 = vand.u32 4294901760, %v5736_v18  ;;  %v13730_v61 = vand.u32 4294901760, %v5739_v43 }
 0x643   : > { %v5430_v31 = vpop.f32.mrf.mxu1 }
 0x644   : > { %v5431_v22 = vadd.f32 %v5430_v31, %v5333_v62  ;;  %v9685_v62 = vld [vmem:[%s14762_s4 + $0xf0] sm:$0xff] }
 0x645   : > { %v5745_v59 = vsel %vm1095_vm1, %v9685_v62, 0 }
 0x647   : > { %v5437_v42 = vpop.f32.mrf.mxu1 }
 0x648   : > { %v5438_v26 = vadd.f32 %v5437_v42, %v5339_v49  ;;  %v13724_v42 = vsub.f32 %v5736_v18, %v13700_v56 }
 0x649   : > { %v5439_v16 = vpop.f32.mrf.mxu1 }
 0x64a   : > { %v5440_v17 = vadd.f32 %v5439_v16, %v5341_v58  ;;  %v5844_v16 = vsub.f32 %v13698_v47, %v5843_v24 }
 0x64c   : > { %v5557_v52 = vpop.f32.mrf.mxu0 }
 0x64d   : > { %v5558_v15 = vadd.f32 %v5557_v52, %v5429_v5 }
 0x64e   : > { %v5559_v36 = vpop.f32.mrf.mxu0 }
 0x64f   : > { %v5560_v2 = vadd.f32 %v5559_v36, %v5431_v22  ;;  %v13751_v22 = vsub.f32 %v5739_v43, %v13730_v61 }
 0x650   : > { %v5564_v27 = vpop.f32.mrf.mxu0 }
 0x651   : > { %v5565_v19 = vadd.f32 %v5564_v27, %v5438_v26  ;;  %v5854_v27 = vand.u32 4294901760, %v13724_v42  ;;  %v9686_v26 = vld [vmem:[%s14762_s4 + $0xf8] sm:$0xff]  ;;  %v5865_v51 = vand.u32 4294901760, %v13751_v22 }
 0x652   : > { %v5566_v53 = vpop.f32.mrf.mxu0 }
 0x653   : > { %v5567_v37 = vadd.f32 %v5566_v53, %v5440_v17  ;;  %v5855_v53 = vsub.f32 %v13724_v42, %v5854_v27 }
 0x654   : > { %v5652_v38 = vpop.f32.mrf.mxu1 }
 0x655   : > { %v5653_v6 = vadd.f32 %v5652_v38, %v5558_v15  ;;  %v13753_v15 = vand.u32 4294901760, %v5742_v45 }
 0x656   : > { %v5654_v46 = vpop.f32.mrf.mxu1 }
 0x657   : > { %v5664_v14 = vmax.f32 %v5653_v6, 0.0  ;;  %v5655_v29 = vadd.f32 %v5654_v46, %v5560_v2  ;;  %v5845_v6 = vand.u32 4294901760, %v5844_v16  ;;  %v13771_v17 = vsub.f32 %v5742_v45, %v13753_v15 }
 0x658   : > { %v5659_v35 = vpop.f32.mrf.mxu1  ;;  %v13820_v45 = vand.u32 4294901760, %v6615_v39 }
 0x659   : > { %v5665_v0 = vmax.f32 %v5655_v29, 0.0  ;;  %v5660_v44 = vadd.f32 %v5659_v35, %v5565_v19  ;;  %v13686_v4 = vand.u32 4294901760, %v5664_v14  ;;  %v13773_v19 = vand.u32 4294901760, %v5745_v59 }
 0x65a   : > { %v5661_v55 = vpop.f32.mrf.mxu1  ;;  %v5748_v29 = vsel %vm1095_vm1, %v9686_v26, 0  ;;  %v5856_v35 = vand.u32 4294901760, %v5855_v53 }
 0x65b   : > { %v13688_v30 = vand.u32 4294901760, %v5665_v0  ;;  %v5666_v54 = vmax.f32 %v5660_v44, 0.0  ;;  %v5662_v12 = vadd.f32 %v5661_v55, %v5567_v37  ;;  %v13708_v63 = vsub.f32 %v5664_v14, %v13686_v4 }
 0x65c   : > { %v5866_v37 = vsub.f32 %v13751_v22, %v5865_v51  ;;  %v13783_v44 = vsub.f32 %v5745_v59, %v13773_v19  ;;  %v13785_v18 = vand.u32 4294901760, %v5748_v29 }
 0x65d   : > { %v13703_v13 = vsub.f32 %v5665_v0, %v13688_v30  ;;  %v13705_v41 = vand.u32 4294901760, %v5666_v54  ;;  %v5667_v31 = vmax.f32 %v5662_v12, 0.0  ;;  %v5955_v50 = vand.u32 4294901760, %v13708_v63 }
 0x65e   : > { %v5876_v0 = vand.u32 4294901760, %v13771_v17  ;;  %v5867_v55 = vand.u32 4294901760, %v5866_v37  ;;  %v5887_v12 = vand.u32 4294901760, %v13783_v44  ;;  %v13798_v33 = vsub.f32 %v5748_v29, %v13785_v18 }
 0x65f   : > { %v13712_v52 = vsub.f32 %v5666_v54, %v13705_v41  ;;  %v13714_v3 = vand.u32 4294901760, %v5667_v31  ;;  %v5949_v8 = vand.u32 4294901760, %v13703_v13  ;;  %v5956_v38 = vsub.f32 %v13708_v63, %v5955_v50 }
 0x660   : > { %v5877_v54 = vsub.f32 %v13771_v17, %v5876_v0  ;;  %v5898_v43 = vand.u32 4294901760, %v13798_v33 }
 0x661   : > { %v5943_v36 = vand.u32 4294901760, %v13712_v52  ;;  %v5936_v10 = vsub.f32 %v5667_v31, %v13714_v3  ;;  %5779 = vmatprep.subr.mxu0 %v13714_v3  ;;  %v5950_v49 = vsub.f32 %v13703_v13, %v5949_v8  ;;  %v5957_v14 = vand.u32 4294901760, %v5956_v38 }
 0x662   : > { %5781 = vmatpush1.msra.mxu0 %v13705_v41  ;;  %v5878_v7 = vand.u32 4294901760, %v5877_v54  ;;  %v5888_v31 = vsub.f32 %v13783_v44, %v5887_v12 }
 0x663   : > { %5783 = vmatprep.subr.mxu0 %v13688_v30  ;;  %v5937_v28 = vand.u32 4294901760, %v5936_v10  ;;  %v5944_v5 = vsub.f32 %v13712_v52, %v5943_v36  ;;  %v5951_v46 = vand.u32 4294901760, %v5950_v49 }
 0x664   : > { %5785 = vmatpush1.msra.mxu0 %v13686_v4 }
 0x665   : > { %5824 = vmatmul.mubr.f32.vlgmr.msra.gmra.mxu0 %v5823_v21  ;;  %6078 = vmatprep.subr.mxu0 %v5936_v10  ;;  %v5938_v23 = vsub.f32 %v5936_v10, %v5937_v28  ;;  %v5945_v2 = vand.u32 4294901760, %v5944_v5  ;;  %v5899_v21 = vsub.f32 %v13798_v33, %v5898_v43 }
 0x666   : > { %6081 = vmatpush1.msra.mxu0 %v13712_v52  ;;  %5829 = vmatprep.mubr.f32.mxu0 %v15169_v9 }
 0x667   : > { %6084 = vmatprep.subr.mxu0 %v13703_v13  ;;  %v5939_v58 = vand.u32 4294901760, %v5938_v23  ;;  %v5900_v10 = vand.u32 4294901760, %v5899_v21 }
 0x668   : > { %6087 = vmatpush1.msra.mxu0 %v13708_v63 }
 0x669   : > { %5835 = vmatmul.mubr.f32.gmra.mxu0 %v5834_v25  ;;  %5940 = vmatprep.subr.mxu1 %v5939_v58 }
 0x66a   : > { %6357 = vmatprep.subr.mxu0 %v5937_v28  ;;  %5946 = vmatpush1.msra.mxu1 %v5945_v2  ;;  %v13826_v28 = vsub.f32 %v6615_v39, %v13820_v45  ;;  %v15190_v39 = vld [vmem:[#allocation26_spill] sm:$0xff] }
 0x66b   : > { %5952 = vmatprep.subr.mxu1 %v5951_v46  ;;  %5840 = vmatprep.mubr.f32.mxu0 %v15169_v9 }
 0x66c   : > { %5958 = vmatpush1.msra.mxu1 %v5957_v14  ;;  %v13839_v62 = vand.u32 4294901760, %v13826_v28 }
 0x66d   : > { %5846 = vmatmul.mubr.f32.gmra.mxu0 %v5845_v6  ;;  %5993 = vmatmul.mubr.f32.vlgmr.msra.gmra.mxu1 %v13664_v1 }
 0x66e   : > { %6214 = vmatprep.subr.mxu1 %v13714_v3  ;;  %5851 = vmatprep.mubr.f32.mxu0 %v15169_v9  ;;  %v6729_v13 = vsub.f32 %v13826_v28, %v13839_v62 }
 0x66f   : > { %6216 = vmatpush1.msra.mxu1 %v13705_v41  ;;  %5998 = vmatprep.mubr.f32.mxu1 %v15169_v9 }
 0x670   : > { %6218 = vmatprep.subr.mxu1 %v13688_v30  ;;  %v13855_v63 = vand.u32 4294901760, %v6729_v13 }
 0x671   : > { %6220 = vmatpush1.msra.mxu1 %v13686_v4  ;;  %5857 = vmatmul.mubr.f32.gmra.mxu0 %v5856_v35 }
 0x672   : > { %6000 = vmatmul.mubr.f32.gmra.mxu1 %v13673_v60  ;;  %6488 = vmatprep.subr.mxu1 %v13714_v3  ;;  %v5889_v3 = vand.u32 4294901760, %v5888_v31 }
 0x673   : > { %5862 = vmatprep.mubr.f32.mxu0 %v15169_v9  ;;  %6005 = vmatprep.mubr.f32.mxu1 %v15169_v9 }
 0x675   : > { %5868 = vmatmul.mubr.f32.gmra.mxu0 %v5867_v55 }
 0x676   : > { %6007 = vmatmul.mubr.f32.gmra.mxu1 %v13683_v57  ;;  %5873 = vmatprep.mubr.f32.mxu0 %v15169_v9 }
 0x677   : > { %6012 = vmatprep.mubr.f32.mxu1 %v15169_v9 }
 0x679   : > { %5879 = vmatmul.mubr.f32.gmra.mxu0 %v5878_v7 }
 0x67a   : > { %6014 = vmatmul.mubr.f32.gmra.mxu1 %v13700_v56  ;;  %5884 = vmatprep.mubr.f32.mxu0 %v15169_v9 }
 0x67b   : > { %6019 = vmatprep.mubr.f32.mxu1 %v15169_v9 }
 0x67d   : > { %5890 = vmatmul.mubr.f32.gmra.mxu0 %v5889_v3 }
 0x67e   : > { %6021 = vmatmul.mubr.f32.gmra.mxu1 %v13730_v61  ;;  %5895 = vmatprep.mubr.f32.mxu0 %v15169_v9 }
 0x67f   : > { %6026 = vmatprep.mubr.f32.mxu1 %v15169_v9 }
 0x681   : > { %5901 = vmatmul.mubr.f32.gmra.mxu0 %v5900_v10  ;;  %v15191_v10 = vld [vmem:[#allocation50_spill] sm:$0xff] }
 0x682   : > { %6028 = vmatmul.mubr.f32.gmra.mxu1 %v13753_v15  ;;  %6120 = vmatprep.mubr.f32.mxu0 %v15169_v9 }
 0x683   : > { %6033 = vmatprep.mubr.f32.mxu1 %v15169_v9 }
 0x685   : > { %6123 = vmatmul.mubr.f32.vlgmr.msra.gmra.mxu0 %v13671_v40  ;;  %v6601_v40 = vpop.xlane.xlu0 %6600 }
 0x686   : > { %6035 = vmatmul.mubr.f32.gmra.mxu1 %v13773_v19  ;;  %6361 = vmatpush1.msra.mxu0 %v5943_v36 }
 0x687   : > { %6365 = vmatprep.subr.mxu0 %v5949_v8  ;;  %6040 = vmatprep.mubr.f32.mxu1 %v15169_v9 }
 0x688   : > { %6369 = vmatpush1.msra.mxu0 %v5955_v50  ;;  %6128 = vmatprep.mubr.f32.mxu0 %v15169_v9 }
 0x689   : > { %10623 = vmatprep.subr.mxu0 %v13820_v45  ;;  %6131 = vmatmul.mubr.f32.gmra.mxu0 %v13681_v20  ;;  %v6598_v20 = vpop.xlane.xlu0 %6597 }
 0x68a   : > { %6042 = vmatmul.mubr.f32.gmra.mxu1 %v13785_v18  ;;  %6136 = vmatprep.mubr.f32.mxu0 %v15169_v9 }
 0x68b   : > { %6253 = vmatprep.mubr.f32.mxu1 %v15169_v9 }
 0x68d   : > { %6139 = vmatmul.mubr.f32.gmra.mxu0 %v13698_v47 }
 0x68e   : > { %6257 = vmatmul.mubr.f32.vlgmr.msra.gmra.mxu1 %v5821_v48  ;;  %6144 = vmatprep.mubr.f32.mxu0 %v15169_v9  ;;  %v6604_v48 = vpop.xlane.xlu1 %6603 }
 0x68f   : > { %6490 = vmatpush1.msra.mxu1 %v13705_v41  ;;  %6262 = vmatprep.mubr.f32.mxu1 %v15169_v9  ;;  %v6612_v41 = vmul.f32 0.00390625, %v6598_v20 }
 0x690   : > { %6492 = vmatprep.subr.mxu1 %v13688_v30  ;;  %v6613_v30 = vmul.f32 0.00390625, %v6601_v40 }
 0x691   : > { %6494 = vmatpush1.msra.mxu1 %v13686_v4  ;;  %6147 = vmatmul.mubr.f32.gmra.mxu0 %v13724_v42  ;;  %v6614_v4 = vmul.f32 0.00390625, %v6604_v48  ;;  %v13891_v8 = vand.u32 4294901760, %v6612_v41 }
 0x692   : > { %10642 = vmatprep.subr.mxu1 %v13855_v63  ;;  %6266 = vmatmul.mubr.f32.gmra.mxu1 %v5832_v34  ;;  %v6595_v47 = vpop.xlane.xlu1 %6594  ;;  %v13881_v52 = vand.u32 4294901760, %v6613_v30 }
 0x693   : > { %6152 = vmatprep.mubr.f32.mxu0 %v15169_v9  ;;  %6271 = vmatprep.mubr.f32.mxu1 %v15169_v9  ;;  %v13875_v34 = vand.u32 4294901760, %v6614_v4  ;;  %v6611_v36 = vmul.f32 0.00390625, %v6595_v47  ;;  %v13908_v49 = vsub.f32 %v6612_v41, %v13891_v8 }
 0x694   : > { %v13894_v50 = vsub.f32 %v6613_v30, %v13881_v52 }
 0x695   : > { %6155 = vmatmul.mubr.f32.gmra.mxu0 %v13751_v22  ;;  %v13885_v42 = vsub.f32 %v6614_v4, %v13875_v34  ;;  %v13897_v25 = vand.u32 4294901760, %v6611_v36  ;;  %v13934_v53 = vand.u32 4294901760, %v13908_v49 }
 0x696   : > { %6275 = vmatmul.mubr.f32.gmra.mxu1 %v5843_v24  ;;  %6160 = vmatprep.mubr.f32.mxu0 %v15169_v9  ;;  %v6592_v24 = vpop.xlane.xlu0 %6591  ;;  %v6589_v5 = vpop.xlane.xlu1 %6588  ;;  %v13915_v38 = vand.u32 4294901760, %v13894_v50 }
 0x697   : > { %6280 = vmatprep.mubr.f32.mxu1 %v15169_v9  ;;  %v6610_v16 = vmul.f32 0.00390625, %v6592_v24  ;;  %v6609_v22 = vmul.f32 0.00390625, %v6589_v5  ;;  %v13918_v59 = vsub.f32 %v6611_v36, %v13897_v25  ;;  %v6750_v37 = vsub.f32 %v13908_v49, %v13934_v53 }
 0x698   : > { %v6743_v46 = vsub.f32 %v13894_v50, %v13915_v38 }
 0x699   : > { %6163 = vmatmul.mubr.f32.gmra.mxu0 %v13771_v17  ;;  %v13920_v58 = vand.u32 4294901760, %v6610_v16  ;;  %v13929_v6 = vand.u32 4294901760, %v6609_v22  ;;  %v13948_v29 = vand.u32 4294901760, %v13918_v59  ;;  %v6751_v54 = vand.u32 4294901760, %v6750_v37 }
 0x69a   : > { %6284 = vmatmul.mubr.f32.gmra.mxu1 %v5854_v27  ;;  %6168 = vmatprep.mubr.f32.mxu0 %v15169_v9  ;;  %v13903_v27 = vand.u32 4294901760, %v13885_v42  ;;  %v6586_v23 = vpop.xlane.xlu0 %6585 }
 0x69b   : > { %6289 = vmatprep.mubr.f32.mxu1 %v15169_v9  ;;  %v6608_v26 = vmul.f32 0.00390625, %v6586_v23  ;;  %v13953_v35 = vsub.f32 %v6609_v22, %v13929_v6 }
 0x69c   : > { %v6736_v2 = vsub.f32 %v13885_v42, %v13903_v27 }
 0x69d   : > { %6171 = vmatmul.mubr.f32.gmra.mxu0 %v13783_v44  ;;  %v13943_v17 = vand.u32 4294901760, %v6608_v26  ;;  %v6757_v44 = vsub.f32 %v13918_v59, %v13948_v29 }
 0x69e   : > { %6293 = vmatmul.mubr.f32.gmra.mxu1 %v5865_v51  ;;  %6176 = vmatprep.mubr.f32.mxu0 %v15169_v9  ;;  %v13941_v51 = vsub.f32 %v6610_v16, %v13920_v58  ;;  %v6737_v14 = vand.u32 4294901760, %v6736_v2  ;;  %v14088_v13 = vpop.xlane.xlu0 %7977 }
 0x69f   : > { %6298 = vmatprep.mubr.f32.mxu1 %v15169_v9 }
 0x6a0   : > { %v13967_v55 = vand.u32 4294901760, %v13941_v51 }
 0x6a1   : > { %6179 = vmatmul.mubr.f32.gmra.mxu0 %v13798_v33  ;;  %v6758_v33 = vand.u32 4294901760, %v6757_v44 }
 0x6a2   : > { %6302 = vmatmul.mubr.f32.gmra.mxu1 %v5876_v0  ;;  %6402 = vmatprep.mubr.f32.mxu0 %v15169_v9  ;;  %v13960_v0 = vsub.f32 %v6608_v26, %v13943_v17  ;;  %v6764_v7 = vsub.f32 %v13941_v51, %v13967_v55  ;;  %v14092_v40 = vpop.xlane.xlu0 %7971 }
 0x6a3   : > { %6307 = vmatprep.mubr.f32.mxu1 %v15169_v9 }
 0x6a4   : > { %v13980_v31 = vand.u32 4294901760, %v13960_v0 }
 0x6a5   : > { %6404 = vmatmul.mubr.f32.vlgmr.msra.gmra.mxu0 %v13664_v1 }
 0x6a6   : > { %6311 = vmatmul.mubr.f32.gmra.mxu1 %v5887_v12  ;;  %10624 = vmatpush3.msra.mxu0 %v13820_v45  ;;  %v13973_v12 = vand.u32 4294901760, %v13953_v35  ;;  %v6778_v11 = vsub.f32 %v13960_v0, %v13980_v31  ;;  %v14096_v20 = vpop.xlane.xlu0 %7965 }
 0x6a7   : > { %10625 = vmatprep.subr.mxu0 %v13875_v34  ;;  %6316 = vmatprep.mubr.f32.mxu1 %v15169_v9 }
 0x6a8   : > { %10626 = vmatpush3.msra.mxu0 %v13875_v34  ;;  %6409 = vmatprep.mubr.f32.mxu0 %v15169_v9  ;;  %v6779_v21 = vand.u32 4294901760, %v6778_v11 }
 0x6a9   : > { %10627 = vmatprep.subr.mxu0 %v13881_v52  ;;  %6411 = vmatmul.mubr.f32.gmra.mxu0 %v13673_v60 }
 0x6aa   : > { %6320 = vmatmul.mubr.f32.gmra.mxu1 %v5898_v43  ;;  %10628 = vmatpush3.msra.mxu0 %v13881_v52  ;;  %v6765_v43 = vand.u32 4294901760, %v6764_v7 }
 0x6ab   : > { %10629 = vmatprep.subr.mxu0 %v13891_v8  ;;  %6416 = vmatprep.mubr.f32.mxu0 %v15169_v9 }
 0x6ac   : > { %10630 = vmatpush3.msra.mxu0 %v13891_v8  ;;  %6527 = vmatprep.mubr.f32.mxu1 %v15169_v9 }
 0x6ad   : > { %10631 = vmatprep.subr.mxu0 %v13897_v25  ;;  %6418 = vmatmul.mubr.f32.gmra.mxu0 %v13683_v57 }
 0x6ae   : > { %6529 = vmatmul.mubr.f32.vlgmr.msra.gmra.mxu1 %v13664_v1  ;;  %10632 = vmatpush3.msra.mxu0 %v13897_v25  ;;  %v6744_v1 = vand.u32 4294901760, %v6743_v46 }
 0x6af   : > { %10643 = vmatpush3.msra.mxu1 %v13855_v63  ;;  %10633 = vmatprep.subr.mxu0 %v13920_v58 }
 0x6b0   : > { %10644 = vmatprep.subr.mxu1 %v6737_v14  ;;  %10634 = vmatpush3.msra.mxu0 %v13920_v58 }
 0x6b1   : > { %10645 = vmatpush3.msra.mxu1 %v6737_v14  ;;  %6423 = vmatprep.mubr.f32.mxu0 %v15169_v9 }
 0x6b2   : > { %6534 = vmatprep.mubr.f32.mxu1 %v15169_v9  ;;  %10635 = vmatprep.subr.mxu0 %v13929_v6 }
 0x6b3   : > { %10646 = vmatprep.subr.mxu1 %v6744_v1  ;;  %6425 = vmatmul.mubr.f32.gmra.mxu0 %v13700_v56 }
 0x6b4   : > { %6536 = vmatmul.mubr.f32.gmra.mxu1 %v13673_v60  ;;  %10636 = vmatpush3.msra.mxu0 %v13929_v6  ;;  %v6771_v60 = vsub.f32 %v13953_v35, %v13973_v12 }
 0x6b5   : > { %10647 = vmatpush3.msra.mxu1 %v6744_v1  ;;  %10637 = vmatprep.subr.mxu0 %v13943_v17 }
 0x6b6   : > { %10648 = vmatprep.subr.mxu1 %v6751_v54  ;;  %10638 = vmatpush3.msra.mxu0 %v13943_v17  ;;  %v6772_v3 = vand.u32 4294901760, %v6771_v60 }
 0x6b7   : > { %10649 = vmatpush3.msra.mxu1 %v6751_v54  ;;  %6430 = vmatprep.mubr.f32.mxu0 %v15169_v9 }
 0x6b8   : > { %6541 = vmatprep.mubr.f32.mxu1 %v15169_v9  ;;  %10650 = vmatprep.subr.mxu1 %v6758_v33 }
 0x6b9   : > { %10661 = vmatprep.subr.mxu0 %v13826_v28  ;;  %6432 = vmatmul.mubr.f32.gmra.mxu0 %v13730_v61 }
 0x6ba   : > { %6543 = vmatmul.mubr.f32.gmra.mxu1 %v13683_v57  ;;  %6437 = vmatprep.mubr.f32.mxu0 %v15169_v9  ;;  %v15183_v57 = vld [vmem:[#allocation27_spill] sm:$0xff] }
 0x6bb   : > { %10651 = vmatpush3.msra.mxu1 %v6758_v33  ;;  %6548 = vmatprep.mubr.f32.mxu1 %v15169_v9 }
 0x6bc   : > { %10652 = vmatprep.subr.mxu1 %v6765_v43 }
 0x6bd   : > { %10653 = vmatpush3.msra.mxu1 %v6765_v43  ;;  %6439 = vmatmul.mubr.f32.gmra.mxu0 %v13753_v15 }
 0x6be   : > { %10654 = vmatprep.subr.mxu1 %v6772_v3  ;;  %6550 = vmatmul.mubr.f32.gmra.mxu1 %v13700_v56  ;;  %v15184_v56 = vld [vmem:[#allocation28_spill] sm:$0xff] }
 0x6bf   : > { %10655 = vmatpush3.msra.mxu1 %v6772_v3  ;;  %6444 = vmatprep.mubr.f32.mxu0 %v15169_v9 }
 0x6c0   : > { %10656 = vmatprep.subr.mxu1 %v6779_v21  ;;  %6555 = vmatprep.mubr.f32.mxu1 %v15169_v9 }
 0x6c1   : > { %10657 = vmatpush3.msra.mxu1 %v6779_v21  ;;  %6446 = vmatmul.mubr.f32.gmra.mxu0 %v13773_v19 }
 0x6c2   : > { %10680 = vmatprep.subr.mxu1 %v13820_v45  ;;  %6557 = vmatmul.mubr.f32.gmra.mxu1 %v13730_v61  ;;  %v15185_v61 = vld [vmem:[#allocation23_spill] sm:$0xff] }
 0x6c3   : > { %6451 = vmatprep.mubr.f32.mxu0 %v15169_v9  ;;  %6562 = vmatprep.mubr.f32.mxu1 %v15169_v9 }
 0x6c5   : > { %6453 = vmatmul.mubr.f32.gmra.mxu0 %v13785_v18 }
 0x6c6   : > { %6564 = vmatmul.mubr.f32.gmra.mxu1 %v13753_v15  ;;  %10639 = vmatprep.mubr.f32.mxu0 %v15183_v57  ;;  %v15186_v15 = vld [vmem:[#allocation21_spill] sm:$0xff] }
 0x6c7   : > { %6569 = vmatprep.mubr.f32.mxu1 %v15169_v9 }
 0x6c9   : > { %10640 = vmatmul.mubr.f32.vlgmr.msra.gmra.mxu0 %v15184_v56 }
 0x6ca   : > { %6571 = vmatmul.mubr.f32.gmra.mxu1 %v13773_v19  ;;  %10662 = vmatpush3.msra.mxu0 %v13826_v28  ;;  %v15187_v19 = vld [vmem:[#allocation22_spill] sm:$0xff]  ;;  %v14084_v28 = vpop.xlane.xlu1 %7980 }
 0x6cb   : > { %10663 = vmatprep.subr.mxu0 %v13885_v42  ;;  %6576 = vmatprep.mubr.f32.mxu1 %v15169_v9  ;;  %v15188_v9 = vld [vmem:[#allocation24_spill] sm:$0xff] }
 0x6cc   : > { %10664 = vmatpush3.msra.mxu0 %v13885_v42  ;;  %10677 = vmatprep.mubr.f32.mxu0 %v15185_v61 }
 0x6cd   : > { %10665 = vmatprep.subr.mxu0 %v13894_v50 }
 0x6ce   : > { %6578 = vmatmul.mubr.f32.gmra.mxu1 %v13785_v18  ;;  %10666 = vmatpush3.msra.mxu0 %v13894_v50  ;;  %v15189_v18 = vld [vmem:[#allocation25_spill] sm:$0xff] }
 0x6cf   : > { %10667 = vmatprep.subr.mxu0 %v13908_v49  ;;  %10658 = vmatprep.mubr.f32.mxu1 %v15186_v15 }
 0x6d0   : > { %10668 = vmatpush3.msra.mxu0 %v13908_v49 }
 0x6d1   : > { %10669 = vmatprep.subr.mxu0 %v13918_v59 }
 0x6d2   : > { %10659 = vmatmul.mubr.f32.vlgmr.msra.gmra.mxu1 %v15187_v19  ;;  %10670 = vmatpush3.msra.mxu0 %v13918_v59 }
 0x6d3   : > { %10681 = vmatpush3.msra.mxu1 %v13820_v45  ;;  %10671 = vmatprep.subr.mxu0 %v13941_v51 }
 0x6d4   : > { %10682 = vmatprep.subr.mxu1 %v13875_v34  ;;  %10672 = vmatpush3.msra.mxu0 %v13941_v51 }
 0x6d5   : > { %10683 = vmatpush3.msra.mxu1 %v13875_v34  ;;  %10673 = vmatprep.subr.mxu0 %v13953_v35 }
 0x6d6   : > { %10684 = vmatprep.subr.mxu1 %v13881_v52  ;;  %10674 = vmatpush3.msra.mxu0 %v13953_v35 }
 0x6d7   : > { %10685 = vmatpush3.msra.mxu1 %v13881_v52  ;;  %10675 = vmatprep.subr.mxu0 %v13960_v0 }
 0x6d8   : > { %10686 = vmatprep.subr.mxu1 %v13891_v8  ;;  %10676 = vmatpush3.msra.mxu0 %v13960_v0 }
 0x6d9   : > { %10687 = vmatpush3.msra.mxu1 %v13891_v8  ;;  %10678 = vmatmul.mubr.f32.vlgmr.msra.gmra.mxu0 %v15188_v9 }
 0x6da   : > { %10688 = vmatprep.subr.mxu1 %v13897_v25  ;;  %10699 = vmatprep.subr.mxu0 %v13839_v62 }
 0x6db   : > { %10689 = vmatpush3.msra.mxu1 %v13897_v25  ;;  %10700 = vmatpush3.msra.mxu0 %v13839_v62  ;;  %v14086_v62 = vpop.xlane.xlu1 %7974 }
 0x6dc   : > { %10690 = vmatprep.subr.mxu1 %v13920_v58  ;;  %10701 = vmatprep.subr.mxu0 %v13903_v27 }
 0x6dd   : > { %10691 = vmatpush3.msra.mxu1 %v13920_v58  ;;  %10702 = vmatpush3.msra.mxu0 %v13903_v27 }
 0x6de   : > { %10692 = vmatprep.subr.mxu1 %v13929_v6  ;;  %10703 = vmatprep.subr.mxu0 %v13915_v38 }
 0x6df   : > { %10693 = vmatpush3.msra.mxu1 %v13929_v6  ;;  %10704 = vmatpush3.msra.mxu0 %v13915_v38  ;;  %v14090_v63 = vpop.xlane.xlu1 %7968 }
 0x6e0   : > { %10694 = vmatprep.subr.mxu1 %v13943_v17  ;;  %10705 = vmatprep.subr.mxu0 %v13934_v53 }
 0x6e1   : > { %10695 = vmatpush3.msra.mxu1 %v13943_v17  ;;  %10696 = vmatprep.mubr.f32.mxu1 %v15189_v18 }
 0x6e2   : > { %10706 = vmatpush3.msra.mxu0 %v13934_v53  ;;  %10697 = vmatmul.mubr.f32.vlgmr.msra.gmra.mxu1 %v15190_v39 }
 0x6e3   : > { %10707 = vmatprep.subr.mxu0 %v13948_v29  ;;  %10718 = vmatprep.subr.mxu1 %v13820_v45  ;;  %v14094_v48 = vpop.xlane.xlu1 %7962 }
 0x6e4   : > { %10708 = vmatpush3.msra.mxu0 %v13948_v29  ;;  %10719 = vmatpush3.msra.mxu1 %v13820_v45  ;;  %v15192_v45 = vld [vmem:[#allocation43_spill] sm:$0xff] }
 0x6e5   : > { %10709 = vmatprep.subr.mxu0 %v13967_v55  ;;  %10720 = vmatprep.subr.mxu1 %v13875_v34 }
 0x6e6   : > { %10710 = vmatpush3.msra.mxu0 %v13967_v55  ;;  %10721 = vmatpush3.msra.mxu1 %v13875_v34 }
 0x6e7   : > { %10711 = vmatprep.subr.mxu0 %v13973_v12  ;;  %10722 = vmatprep.subr.mxu1 %v13881_v52  ;;  %v5689_v47 = vpop.permute.xlu1 %5688 }
 0x6e8   : > { %10712 = vmatpush3.msra.mxu0 %v13973_v12  ;;  %10723 = vmatpush3.msra.mxu1 %v13881_v52  ;;  %v14098_v52 = vpop.xlane.xlu0 %7959 }
 0x6e9   : > { %10713 = vmatprep.subr.mxu0 %v13980_v31  ;;  %10724 = vmatprep.subr.mxu1 %v13891_v8 }
 0x6ea   : > { %10714 = vmatpush3.msra.mxu0 %v13980_v31  ;;  %10715 = vmatprep.mubr.f32.mxu0 %v15186_v15 }
 0x6eb   : > { %10725 = vmatpush3.msra.mxu1 %v13891_v8  ;;  %10716 = vmatmul.mubr.f32.vlgmr.msra.gmra.mxu0 %v15187_v19  ;;  %v5699_v22 = vpop.permute.xlu1 %5698 }
 0x6ec   : > { %10726 = vmatprep.subr.mxu1 %v13897_v25  ;;  %10734 = vmatprep.mubr.f32.mxu1 %v15186_v15  ;;  %v5694_v16 = vpop.permute.xlu0 %5693 }
 0x6ed   : > { %10727 = vmatpush3.msra.mxu1 %v13897_v25  ;;  %10741 = vmatprep.mubr.f32.mxu0 %v15191_v10 }
 0x6ee   : > { %10728 = vmatprep.subr.mxu1 %v13920_v58 }
 0x6ef   : > { %10729 = vmatpush3.msra.mxu1 %v13920_v58  ;;  %v5704_v35 = vpop.permute.xlu1 %5703 }
 0x6f0   : > { %10730 = vmatprep.subr.mxu1 %v13929_v6  ;;  %v5709_v7 = vpop.permute.xlu0 %5708 }
 0x6f1   : > { %10731 = vmatpush3.msra.mxu1 %v13929_v6 }
 0x6f2   : > { %10732 = vmatprep.subr.mxu1 %v13943_v17 }
 0x6f3   : > { %10733 = vmatpush3.msra.mxu1 %v13943_v17  ;;  %v5714_v61 = vpop.permute.xlu1 %5713 }
 0x6f4   : > { %10735 = vmatmul.mubr.f32.vlgmr.msra.gmra.mxu1 %v15187_v19 }
 0x6f5   : > { %10757 = vmatprep.mubr.f32.mxu1 %v15192_v45 }
 0x725   : > { %v5825_v4 = vpop.f32.mrf.mxu0 }
 0x726   : > { %v5826_v24 = vadd.f32 %v5825_v4, %v5689_v47 }
 0x727   : > { %v5827_v30 = vpop.f32.mrf.mxu0 }
 0x728   : > { %v5828_v8 = vadd.f32 %v5827_v30, %v5689_v47 }
 0x729   : > { %v5836_v34 = vpop.f32.mrf.mxu0 }
 0x72a   : > { %v5837_v23 = vadd.f32 %v5836_v34, %v5694_v16  ;;  %v5719_v34 = vpop.permute.xlu0 %5718 }
 0x72b   : > { %v5838_v41 = vpop.f32.mrf.mxu0 }
 0x72c   : > { %v5839_v59 = vadd.f32 %v5838_v41, %v5694_v16 }
 0x72d   : > { %v5847_v42 = vpop.f32.mrf.mxu0  ;;  %v5994_v36 = vpop.f32.mrf.mxu1 }
 0x72e   : > { %v5995_v50 = vadd.f32 %v5994_v36, %v5826_v24  ;;  %v5848_v6 = vadd.f32 %v5847_v42, %v5699_v22 }
 0x72f   : > { %v5849_v5 = vpop.f32.mrf.mxu0  ;;  %v5996_v25 = vpop.f32.mrf.mxu1 }
 0x730   : > { %v5997_v27 = vadd.f32 %v5996_v25, %v5828_v8  ;;  %v5850_v17 = vadd.f32 %v5849_v5, %v5699_v22 }
 0x731   : > { %v5858_v49 = vpop.f32.mrf.mxu0 }
 0x732   : > { %v6001_v38 = vpop.f32.mrf.mxu1  ;;  %v5859_v1 = vadd.f32 %v5858_v49, %v5704_v35 }
 0x733   : > { %v6002_v58 = vadd.f32 %v6001_v38, %v5837_v23  ;;  %v5860_v26 = vpop.f32.mrf.mxu0  ;;  %v5724_v23 = vpop.permute.xlu1 %5723 }
 0x734   : > { %v6003_v2 = vpop.f32.mrf.mxu1  ;;  %v5861_v54 = vadd.f32 %v5860_v26, %v5704_v35 }
 0x735   : > { %v6004_v53 = vadd.f32 %v6003_v2, %v5839_v59  ;;  %v5869_v46 = vpop.f32.mrf.mxu0 }
 0x736   : > { %v6008_v51 = vpop.f32.mrf.mxu1  ;;  %v5870_v60 = vadd.f32 %v5869_v46, %v5709_v7 }
 0x737   : > { %v6009_v14 = vadd.f32 %v6008_v51, %v5848_v6  ;;  %v5871_v29 = vpop.f32.mrf.mxu0 }
 0x738   : > { %v6010_v37 = vpop.f32.mrf.mxu1  ;;  %v5872_v21 = vadd.f32 %v5871_v29, %v5709_v7 }
 0x739   : > { %v6011_v0 = vadd.f32 %v6010_v37, %v5850_v17  ;;  %v5880_v44 = vpop.f32.mrf.mxu0 }
 0x73a   : > { %v6015_v55 = vpop.f32.mrf.mxu1  ;;  %v5881_v19 = vadd.f32 %v5880_v44, %v5714_v61 }
 0x73b   : > { %v6016_v12 = vadd.f32 %v6015_v55, %v5859_v1  ;;  %v5882_v33 = vpop.f32.mrf.mxu0 }
 0x73c   : > { %v6017_v31 = vpop.f32.mrf.mxu1  ;;  %v5883_v10 = vadd.f32 %v5882_v33, %v5714_v61 }
 0x73d   : > { %v6018_v43 = vadd.f32 %v6017_v31, %v5861_v54  ;;  %v5891_v11 = vpop.f32.mrf.mxu0 }
 0x73e   : > { %v6022_v3 = vpop.f32.mrf.mxu1  ;;  %v5892_v41 = vadd.f32 %v5891_v11, %v5719_v34 }
 0x73f   : > { %v6023_v57 = vadd.f32 %v6022_v3, %v5870_v60  ;;  %v5893_v56 = vpop.f32.mrf.mxu0 }
 0x740   : > { %v6024_v15 = vpop.f32.mrf.mxu1  ;;  %v5894_v5 = vadd.f32 %v5893_v56, %v5719_v34 }
 0x741   : > { %v6025_v9 = vadd.f32 %v6024_v15, %v5872_v21  ;;  %v5902_v18 = vpop.f32.mrf.mxu0 }
 0x742   : > { %v6029_v39 = vpop.f32.mrf.mxu1  ;;  %v5903_v38 = vadd.f32 %v5902_v18, %v5724_v23 }
 0x743   : > { %v6030_v4 = vadd.f32 %v6029_v39, %v5881_v19  ;;  %v5904_v30 = vpop.f32.mrf.mxu0 }
 0x744   : > { %v6031_v47 = vpop.f32.mrf.mxu1  ;;  %v5905_v46 = vadd.f32 %v5904_v30, %v5724_v23 }
 0x745   : > { %v6032_v24 = vadd.f32 %v6031_v47, %v5883_v10  ;;  %v6124_v42 = vpop.f32.mrf.mxu0 }
 0x746   : > { %v6036_v36 = vpop.f32.mrf.mxu1  ;;  %v6125_v8 = vadd.f32 %v6124_v42, %v5995_v50 }
 0x747   : > { %v6037_v25 = vadd.f32 %v6036_v36, %v5892_v41  ;;  %v6126_v16 = vpop.f32.mrf.mxu0 }
 0x748   : > { %v6038_v49 = vpop.f32.mrf.mxu1  ;;  %v6127_v22 = vadd.f32 %v6126_v16, %v5997_v27 }
 0x749   : > { %v6039_v59 = vadd.f32 %v6038_v49, %v5894_v5  ;;  %v6132_v26 = vpop.f32.mrf.mxu0 }
 0x74a   : > { %v6043_v2 = vpop.f32.mrf.mxu1  ;;  %v6133_v6 = vadd.f32 %v6132_v26, %v6002_v58 }
 0x74b   : > { %v6044_v51 = vadd.f32 %v6043_v2, %v5903_v38  ;;  %v6134_v17 = vpop.f32.mrf.mxu0 }
 0x74c   : > { %v6045_v29 = vpop.f32.mrf.mxu1  ;;  %v6135_v35 = vadd.f32 %v6134_v17, %v6004_v53 }
 0x74d   : > { %v6046_v37 = vadd.f32 %v6045_v29, %v5905_v46  ;;  %v6140_v1 = vpop.f32.mrf.mxu0 }
 0x74e   : > { %v6141_v44 = vadd.f32 %v6140_v1, %v6009_v14  ;;  %v6258_v50 = vpop.f32.mrf.mxu1 }
 0x74f   : > { %v6259_v55 = vadd.f32 %v6258_v50, %v6125_v8  ;;  %v6142_v54 = vpop.f32.mrf.mxu0 }
 0x750   : > { %v6143_v33 = vadd.f32 %v6142_v54, %v6011_v0  ;;  %v6260_v7 = vpop.f32.mrf.mxu1 }
 0x751   : > { %v6261_v31 = vadd.f32 %v6260_v7, %v6127_v22  ;;  %v6148_v27 = vpop.f32.mrf.mxu0 }
 0x752   : > { %v6149_v60 = vadd.f32 %v6148_v27, %v6016_v12  ;;  %v6267_v11 = vpop.f32.mrf.mxu1 }
 0x753   : > { %v6268_v3 = vadd.f32 %v6267_v11, %v6133_v6  ;;  %v6150_v21 = vpop.f32.mrf.mxu0 }
 0x754   : > { %v6151_v58 = vadd.f32 %v6150_v21, %v6018_v43  ;;  %v6269_v56 = vpop.f32.mrf.mxu1 }
 0x755   : > { %v6270_v61 = vadd.f32 %v6269_v56, %v6135_v35  ;;  %v6156_v15 = vpop.f32.mrf.mxu0 }
 0x756   : > { %v6157_v19 = vadd.f32 %v6156_v15, %v6023_v57  ;;  %v6276_v53 = vpop.f32.mrf.mxu1 }
 0x757   : > { %v6277_v18 = vadd.f32 %v6276_v53, %v6141_v44  ;;  %v6158_v39 = vpop.f32.mrf.mxu0 }
 0x758   : > { %v6159_v14 = vadd.f32 %v6158_v39, %v6025_v9  ;;  %v6278_v10 = vpop.f32.mrf.mxu1 }
 0x759   : > { %v6279_v30 = vadd.f32 %v6278_v10, %v6143_v33  ;;  %v6164_v34 = vpop.f32.mrf.mxu0 }
 0x75a   : > { %v6165_v0 = vadd.f32 %v6164_v34, %v6030_v4  ;;  %v6285_v47 = vpop.f32.mrf.mxu1 }
 0x75b   : > { %v6286_v41 = vadd.f32 %v6285_v47, %v6149_v60  ;;  %v6166_v42 = vpop.f32.mrf.mxu0 }
 0x75c   : > { %v6167_v12 = vadd.f32 %v6166_v42, %v6032_v24  ;;  %v6287_v36 = vpop.f32.mrf.mxu1 }
 0x75d   : > { %v6288_v8 = vadd.f32 %v6287_v36, %v6151_v58  ;;  %v6172_v5 = vpop.f32.mrf.mxu0 }
 0x75e   : > { %v6173_v43 = vadd.f32 %v6172_v5, %v6037_v25  ;;  %v6294_v16 = vpop.f32.mrf.mxu1 }
 0x75f   : > { %v6295_v23 = vadd.f32 %v6294_v16, %v6157_v19  ;;  %v6174_v49 = vpop.f32.mrf.mxu0 }
 0x760   : > { %v6175_v57 = vadd.f32 %v6174_v49, %v6039_v59  ;;  %v6296_v22 = vpop.f32.mrf.mxu1 }
 0x761   : > { %v6297_v38 = vadd.f32 %v6296_v22, %v6159_v14  ;;  %v6180_v26 = vpop.f32.mrf.mxu0 }
 0x762   : > { %v6181_v9 = vadd.f32 %v6180_v26, %v6044_v51  ;;  %v6303_v2 = vpop.f32.mrf.mxu1 }
 0x763   : > { %v6304_v6 = vadd.f32 %v6303_v2, %v6165_v0  ;;  %v6182_v46 = vpop.f32.mrf.mxu0 }
 0x764   : > { %v6183_v4 = vadd.f32 %v6182_v46, %v6046_v37  ;;  %v6305_v17 = vpop.f32.mrf.mxu1 }
 0x765   : > { %v6306_v29 = vadd.f32 %v6305_v17, %v6167_v12  ;;  %v6405_v35 = vpop.f32.mrf.mxu0 }
 0x766   : > { %v6312_v24 = vpop.f32.mrf.mxu1  ;;  %v6406_v1 = vadd.f32 %v6405_v35, %v6259_v55 }
 0x767   : > { %v6313_v44 = vadd.f32 %v6312_v24, %v6173_v43  ;;  %v6407_v50 = vpop.f32.mrf.mxu0 }
 0x768   : > { %v6314_v25 = vpop.f32.mrf.mxu1  ;;  %v6408_v54 = vadd.f32 %v6407_v50, %v6261_v31 }
 0x769   : > { %v6315_v33 = vadd.f32 %v6314_v25, %v6175_v57  ;;  %v6412_v7 = vpop.f32.mrf.mxu0 }
 0x76a   : > { %v6321_v59 = vpop.f32.mrf.mxu1  ;;  %v6413_v27 = vadd.f32 %v6412_v7, %v6268_v3 }
 0x76b   : > { %v6322_v60 = vadd.f32 %v6321_v59, %v6181_v9  ;;  %v6414_v11 = vpop.f32.mrf.mxu0 }
 0x76c   : > { %v6323_v51 = vpop.f32.mrf.mxu1  ;;  %v6415_v21 = vadd.f32 %v6414_v11, %v6270_v61 }
 0x76d   : > { %v6324_v58 = vadd.f32 %v6323_v51, %v6183_v4  ;;  %v6419_v56 = vpop.f32.mrf.mxu0 }
 0x76e   : > { %v6420_v37 = vadd.f32 %v6419_v56, %v6277_v18  ;;  %v6530_v15 = vpop.f32.mrf.mxu1 }
 0x76f   : > { %v14100_v19 = vadd.f32 %v6530_v15, %v6406_v1  ;;  %v6421_v53 = vpop.f32.mrf.mxu0 }
 0x770   : > { %v6422_v55 = vadd.f32 %v6421_v53, %v6279_v30  ;;  %v6532_v39 = vpop.f32.mrf.mxu1 }
 0x771   : > { %v14102_v14 = vadd.f32 %v6532_v39, %v6408_v54 }
 0x773   : > { %v6426_v31 = vpop.f32.mrf.mxu0 }
 0x774   : > { %v6427_v10 = vadd.f32 %v6426_v31, %v6286_v41  ;;  %v6537_v34 = vpop.f32.mrf.mxu1 }
 0x775   : > { %v14104_v0 = vadd.f32 %v6537_v34, %v6413_v27  ;;  %v6428_v3 = vpop.f32.mrf.mxu0 }
 0x776   : > { %v6429_v47 = vadd.f32 %v6428_v3, %v6288_v8  ;;  %v6539_v42 = vpop.f32.mrf.mxu1 }
 0x777   : > { %v14106_v61 = vadd.f32 %v6539_v42, %v6415_v21  ;;  %v11153_v42 = vld [vmem:[%s14761_s3 + $0x10] sm:$0xff] }
 0x779   : > { %v6433_v12 = vpop.f32.mrf.mxu0 }
 0x77a   : > { %v6434_v18 = vadd.f32 %v6433_v12, %v6295_v23  ;;  %v6544_v36 = vpop.f32.mrf.mxu1 }
 0x77b   : > { %v14108_v5 = vadd.f32 %v6544_v36, %v6420_v37  ;;  %v6435_v43 = vpop.f32.mrf.mxu0 }
 0x77c   : > { %v6436_v30 = vadd.f32 %v6435_v43, %v6297_v38  ;;  %v6546_v16 = vpop.f32.mrf.mxu1 }
 0x77d   : > { %15193 = vst [vmem:[#allocation127_spill] sm:$0xff] %v14108_v5  ;;  %v14110_v49 = vadd.f32 %v6546_v16, %v6422_v55  ;;  %v6440_v57 = vpop.f32.mrf.mxu0 }
 0x77e   : > { %v6441_v41 = vadd.f32 %v6440_v57, %v6304_v6  ;;  %v6551_v22 = vpop.f32.mrf.mxu1 }
 0x77f   : > { %15194 = vst [vmem:[#allocation133_spill] sm:$0xff] %v14110_v49  ;;  %v14112_v26 = vadd.f32 %v6551_v22, %v6427_v10  ;;  %v6442_v9 = vpop.f32.mrf.mxu0 }
 0x780   : > { %v6443_v8 = vadd.f32 %v6442_v9, %v6306_v29  ;;  %v6553_v2 = vpop.f32.mrf.mxu1 }
 0x781   : > { %v14114_v46 = vadd.f32 %v6553_v2, %v6429_v47  ;;  %v6447_v4 = vpop.f32.mrf.mxu0 }
 0x782   : > { %v6448_v23 = vadd.f32 %v6447_v4, %v6313_v44  ;;  %v6558_v17 = vpop.f32.mrf.mxu1 }
 0x783   : > { %v14116_v35 = vadd.f32 %v6558_v17, %v6434_v18  ;;  %v6449_v24 = vpop.f32.mrf.mxu0 }
 0x784   : > { %v6450_v38 = vadd.f32 %v6449_v24, %v6315_v33  ;;  %v6560_v1 = vpop.f32.mrf.mxu1 }
 0x785   : > { %15195 = vst [vmem:[#allocation137_spill] sm:$0xff] %v14116_v35  ;;  %v14118_v50 = vadd.f32 %v6560_v1, %v6436_v30  ;;  %v6454_v25 = vpop.f32.mrf.mxu0 }
 0x786   : > { %v6455_v6 = vadd.f32 %v6454_v25, %v6322_v60  ;;  %v6565_v54 = vpop.f32.mrf.mxu1 }
 0x787   : > { %15196 = vst [vmem:[#allocation140_spill] sm:$0xff] %v14118_v50  ;;  %v14120_v7 = vadd.f32 %v6565_v54, %v6441_v41  ;;  %v6456_v59 = vpop.f32.mrf.mxu0 }
 0x788   : > { %v6457_v29 = vadd.f32 %v6456_v59, %v6324_v58  ;;  %v6567_v27 = vpop.f32.mrf.mxu1  ;;  %v11152_v58 = vld [vmem:[%s14761_s3 + $0x18] sm:$0xff] }
 0x789   : > { %15197 = vst [vmem:[#allocation132_spill] sm:$0xff] %v14120_v7  ;;  %v14122_v11 = vadd.f32 %v6567_v27, %v6443_v8  ;;  %v10641_v60 = vpop.f32.mrf.mxu0  ;;  %v15203_v27 = vld [vmem:[#allocation114_spill] sm:$0xff]  ;;  %v9713_v7 = vld [vmem:[%s14763_s5 + $0x130] sm:$0xff] }
 0x78a   : > { %v6572_v51 = vpop.f32.mrf.mxu1  ;;  %v6706_v10 = vadd.f32 %v11152_v58, %v10641_v60  ;;  %v15207_v58 = vld [vmem:[#allocation122_spill] sm:$0xff] }
 0x78b   : > { %15198 = vst [vmem:[#allocation125_spill] sm:$0xff] %v14122_v11  ;;  %v14124_v44 = vadd.f32 %v6572_v51, %v6448_v23  ;;  %v6695_v55 = vpop.f32.mrf.mxu0 }
 0x78c   : > { %v6574_v21 = vpop.f32.mrf.mxu1  ;;  %v6696_v12 = vadd.f32 %v11153_v42, %v6695_v55  ;;  %v15205_v55 = vld [vmem:[#allocation119_spill] sm:$0xff]  ;;  %v15211_v42 = vld [vmem:[#allocation124_spill] sm:$0xff] }
 0x78d   : > { %15199 = vst [vmem:[#allocation129_spill] sm:$0xff] %v14124_v44  ;;  %v14126_v56 = vadd.f32 %v6574_v21, %v6450_v38 }
 0x78e   : > { %v6579_v33 = vpop.f32.mrf.mxu1 }
 0x78f   : > { %15200 = vst [vmem:[#allocation136_spill] sm:$0xff] %v14126_v56  ;;  %v14128_v37 = vadd.f32 %v6579_v33, %v6455_v6  ;;  %v15204_v33 = vld [vmem:[#allocation117_spill] sm:$0xff] }
 0x790   : > { %v6581_v15 = vpop.f32.mrf.mxu1 }
 0x791   : > { %15201 = vst [vmem:[#allocation138_spill] sm:$0xff] %v14128_v37  ;;  %v14130_v53 = vadd.f32 %v6581_v15, %v6457_v29 }
 0x792   : > { %v10660_v39 = vpop.f32.mrf.mxu1 }
 0x793   : > { %15202 = vst [vmem:[#allocation142_spill] sm:$0xff] %v14130_v53  ;;  %v6823_v18 = vadd.f32 %v10660_v39, %v6706_v10  ;;  %v15208_v10 = vld [vmem:[#allocation97_spill] sm:$0xff] }
 0x794   : > { %v6816_v34 = vpop.f32.mrf.mxu1 }
 0x795   : > { %v6817_v43 = vadd.f32 %v6816_v34, %v6696_v12  ;;  %v15209_v34 = vld [vmem:[#allocation123_spill] sm:$0xff]  ;;  %v15212_v12 = vld [vmem:[#allocation100_spill] sm:$0xff] }
 0x799   : > { %v10679_v31 = vpop.f32.mrf.mxu0 }
 0x79a   : > { %v6918_v30 = vadd.f32 %v10679_v31, %v6823_v18  ;;  %v15206_v31 = vld [vmem:[#allocation121_spill] sm:$0xff]  ;;  %v15213_v18 = vld [vmem:[#allocation102_spill] sm:$0xff] }
 0x79b   : > { %v6910_v3 = vpop.f32.mrf.mxu0 }
 0x79c   : > { %v6911_v57 = vadd.f32 %v6910_v3, %v6817_v43  ;;  %v15210_v3 = vld [vmem:[#allocation98_spill] sm:$0xff] }
 0x7a2   : > { %v10698_v47 = vpop.f32.mrf.mxu1 }
 0x7a3   : > { %v7007_v41 = vadd.f32 %v10698_v47, %v6918_v30  ;;  %v14152_v47 = vand.u32 4294901760, %v14084_v28  ;;  %v15215_v30 = vld [vmem:[#allocation99_spill] sm:$0xff] }
 0x7a4   : > { %v6998_v16 = vpop.f32.mrf.mxu1 }
 0x7a5   : > { %v6999_v9 = vadd.f32 %v6998_v16, %v6911_v57  ;;  %v14162_v43 = vsub.f32 %v14084_v28, %v14152_v47  ;;  %v15216_v16 = vld [vmem:[#allocation105_spill] sm:$0xff]  ;;  %v15217_v57 = vld [vmem:[#allocation107_spill] sm:$0xff] }
 0x7a6   : > { %v15220_v28 = vld [vmem:[#allocation111_spill] sm:$0xff] }
 0x7ab   : > { %v10717_v36 = vpop.f32.mrf.mxu0 }
 0x7ac   : > { %v7108_v8 = vadd.f32 %v10717_v36, %v7007_v41  ;;  %v15214_v36 = vld [vmem:[#allocation44_spill] sm:$0xff]  ;;  %v15218_v41 = vld [vmem:[#allocation101_spill] sm:$0xff] }
 0x7ad   : > { %v7101_v22 = vpop.f32.mrf.mxu0 }
 0x7ae   : > { %v7102_v4 = vadd.f32 %v7101_v22, %v6999_v9  ;;  %v14169_v22 = vand.u32 4294901760, %v14162_v43  ;;  %v15219_v9 = vld [vmem:[#allocation104_spill] sm:$0xff] }
 0x7b4   : > { %v10736_v2 = vpop.f32.mrf.mxu1 }
 0x7b5   : > { %v7193_v23 = vadd.f32 %v10736_v2, %v7108_v8  ;;  %v15221_v8 = vld [vmem:[#allocation108_spill] sm:$0xff]  ;;  %v15222_v2 = vld [vmem:[#allocation47_spill] sm:$0xff] }
 0x7b6   : > { %v7186_v17 = vpop.f32.mrf.mxu1 }
 0x7b7   : > { %v7197_v24 = vmax.f32 %v7193_v23, 0.0  ;;  %v7187_v38 = vadd.f32 %v7186_v17, %v7102_v4  ;;  %v8107_v4 = vsub.f32 %v14162_v43, %v14169_v22  ;;  %v15223_v23 = vld [vmem:[#allocation110_spill] sm:$0xff]  ;;  %v14180_v17 = vand.u32 4294901760, %v14088_v13 }
 0x7b9   : > { %v7227_v1 = vand.u32 4294901760, %v7197_v24  ;;  %v7196_v25 = vmax.f32 %v7187_v38, 0.0  ;;  %v15225_v38 = vld [vmem:[#allocation112_spill] sm:$0xff] }
 0x7bb   : > { %v7375_v6 = vsub.f32 %v7197_v24, %v7227_v1  ;;  %v14138_v54 = vand.u32 4294901760, %v7196_v25  ;;  %10737 = vmatprep.subr.mxu0 %v7227_v1  ;;  %v15224_v24 = vld [vmem:[#allocation103_spill] sm:$0xff] }
 0x7bc   : > { %10738 = vmatpush3.msra.mxu0 %v7227_v1 }
 0x7bd   : > { %v7382_v59 = vsub.f32 %v7196_v25, %v14138_v54  ;;  %10739 = vmatprep.subr.mxu0 %v14138_v54  ;;  %v7376_v29 = vand.u32 4294901760, %v7375_v6  ;;  %v9695_v25 = vld [vmem:[%s14760_s2 + $0x40] sm:$0xff] }
 0x7be   : > { %10740 = vmatpush3.msra.mxu0 %v14138_v54 }
 0x7bf   : > { %10742 = vmatmul.mubr.f32.vlgmr.msra.gmra.mxu0 %v15203_v27  ;;  %10769 = vmatprep.subr.mxu0 %v7375_v6  ;;  %v7377_v51 = vsub.f32 %v7375_v6, %v7376_v29  ;;  %v7383_v21 = vand.u32 4294901760, %v7382_v59  ;;  %v14193_v27 = vand.u32 4294901760, %v14086_v62 }
 0x7c0   : > { %10770 = vmatpush3.msra.mxu0 %v7375_v6  ;;  %10744 = vmatprep.mubr.f32.mxu0 %v15204_v33  ;;  %v15226_v6 = vld [vmem:[#allocation106_spill] sm:$0xff]  ;;  %v15228_v33 = vld [vmem:[#allocation109_spill] sm:$0xff] }
 0x7c1   : > { %10771 = vmatprep.subr.mxu0 %v7382_v59  ;;  %v7378_v15 = vand.u32 4294901760, %v7377_v51  ;;  %v7384_v60 = vsub.f32 %v7382_v59, %v7383_v21  ;;  %v15227_v51 = vld [vmem:[#allocation116_spill] sm:$0xff] }
 0x7c2   : > { %10772 = vmatpush3.msra.mxu0 %v7382_v59  ;;  %v8108_v59 = vand.u32 4294901760, %v8107_v4  ;;  %v14259_v4 = vand.u32 4294901760, %v14094_v48 }
 0x7c3   : > { %10745 = vmatmul.mubr.f32.gmra.mxu0 %v15205_v55  ;;  %10753 = vmatprep.subr.mxu1 %v7378_v15  ;;  %v7385_v39 = vand.u32 4294901760, %v7384_v60  ;;  %v14207_v55 = vand.u32 4294901760, %v14092_v40 }
 0x7c4   : > { %10801 = vmatprep.subr.mxu0 %v7376_v29  ;;  %10754 = vmatpush3.msra.mxu1 %v7378_v15  ;;  %v15229_v15 = vld [vmem:[#allocation113_spill] sm:$0xff] }
 0x7c5   : > { %10755 = vmatprep.subr.mxu1 %v7385_v39  ;;  %10747 = vmatprep.mubr.f32.mxu0 %v15206_v31  ;;  %v15230_v31 = vld [vmem:[#allocation115_spill] sm:$0xff] }
 0x7c6   : > { %10756 = vmatpush3.msra.mxu1 %v7385_v39  ;;  %v14213_v39 = vsub.f32 %v14086_v62, %v14193_v27  ;;  %v14230_v62 = vsub.f32 %v14092_v40, %v14207_v55 }
 0x7c7   : > { %10748 = vmatmul.mubr.f32.gmra.mxu0 %v15207_v58  ;;  %10758 = vmatmul.mubr.f32.vlgmr.msra.gmra.mxu1 %v15208_v10 }
 0x7c8   : > { %10785 = vmatprep.subr.mxu1 %v7227_v1  ;;  %10750 = vmatprep.mubr.f32.mxu0 %v15209_v34 }
 0x7c9   : > { %10786 = vmatpush3.msra.mxu1 %v7227_v1  ;;  %10760 = vmatprep.mubr.f32.mxu1 %v15210_v3 }
 0x7ca   : > { %10787 = vmatprep.subr.mxu1 %v14138_v54 }
 0x7cb   : > { %10788 = vmatpush3.msra.mxu1 %v14138_v54  ;;  %10751 = vmatmul.mubr.f32.gmra.mxu0 %v15211_v42  ;;  %v15231_v42 = vld [vmem:[#allocation118_spill] sm:$0xff] }
 0x7cc   : > { %10761 = vmatmul.mubr.f32.gmra.mxu1 %v15212_v12  ;;  %10817 = vmatprep.subr.mxu1 %v7227_v1 }
 0x7cd   : > { %10763 = vmatprep.mubr.f32.mxu1 %v15213_v18  ;;  %10773 = vmatprep.mubr.f32.mxu0 %v15214_v36 }
 0x7cf   : > { %10774 = vmatmul.mubr.f32.vlgmr.msra.gmra.mxu0 %v15215_v30  ;;  %v14238_v30 = vand.u32 4294901760, %v14096_v20 }
 0x7d0   : > { %10764 = vmatmul.mubr.f32.gmra.mxu1 %v15216_v16  ;;  %10802 = vmatpush3.msra.mxu0 %v7376_v29  ;;  %v9696_v29 = vld [vmem:[%s14760_s2 + $0x48] sm:$0xff] }
 0x7d1   : > { %10803 = vmatprep.subr.mxu0 %v7383_v21  ;;  %10766 = vmatprep.mubr.f32.mxu1 %v15217_v57  ;;  %v7992_v60 = vsel %vm332_vm0, %v9696_v29, 0  ;;  %v14287_v29 = vsub.f32 %v14094_v48, %v14259_v4 }
 0x7d2   : > { %10804 = vmatpush3.msra.mxu0 %v7383_v21  ;;  %10776 = vmatprep.mubr.f32.mxu0 %v15218_v41  ;;  %v7989_v21 = vsel %vm332_vm0, %v9695_v25, 0  ;;  %v14224_v34 = vand.u32 4294901760, %v7992_v60  ;;  %v14243_v41 = vand.u32 4294901760, %v14213_v39 }
 0x7d3   : > { %10833 = vmatprep.subr.mxu0 %v14152_v47  ;;  %10777 = vmatmul.mubr.f32.gmra.mxu0 %v15219_v9  ;;  %v15232_v9 = vld [vmem:[#allocation120_spill] sm:$0xff] }
 0x7d4   : > { %10767 = vmatmul.mubr.f32.gmra.mxu1 %v15220_v28  ;;  %10779 = vmatprep.mubr.f32.mxu0 %v15221_v8 }
 0x7d5   : > { %10789 = vmatprep.mubr.f32.mxu1 %v15222_v2  ;;  %v14254_v2 = vsub.f32 %v7992_v60, %v14224_v34 }
 0x7d7   : > { %10780 = vmatmul.mubr.f32.gmra.mxu0 %v15223_v23 }
 0x7d8   : > { %10790 = vmatmul.mubr.f32.vlgmr.msra.gmra.mxu1 %v15224_v24  ;;  %10782 = vmatprep.mubr.f32.mxu0 %v15225_v38  ;;  %v14269_v24 = vsub.f32 %v14096_v20, %v14238_v30  ;;  %v8121_v38 = vsub.f32 %v14213_v39, %v14243_v41  ;;  %v14282_v20 = vand.u32 4294901760, %v14098_v52 }
 0x7d9   : > { %10818 = vmatpush3.msra.mxu1 %v7227_v1  ;;  %10792 = vmatprep.mubr.f32.mxu1 %v15226_v6  ;;  %v14200_v1 = vsub.f32 %v14088_v13, %v14180_v17  ;;  %v14217_v13 = vand.u32 4294901760, %v14090_v63  ;;  %v8079_v6 = vand.u32 4294901760, %v14254_v2 }
 0x7da   : > { %10819 = vmatprep.subr.mxu1 %v14138_v54 }
 0x7db   : > { %10820 = vmatpush3.msra.mxu1 %v14138_v54  ;;  %10783 = vmatmul.mubr.f32.gmra.mxu0 %v15227_v51  ;;  %v14209_v54 = vand.u32 4294901760, %v7989_v21  ;;  %v14222_v58 = vand.u32 4294901760, %v14200_v1  ;;  %v14247_v40 = vsub.f32 %v14090_v63, %v14217_v13  ;;  %v14264_v63 = vand.u32 4294901760, %v14230_v62 }
 0x7dc   : > { %10852 = vmatprep.subr.mxu1 %v8108_v59  ;;  %10793 = vmatmul.mubr.f32.gmra.mxu1 %v15228_v33  ;;  %v8080_v33 = vsub.f32 %v14254_v2, %v8079_v6 }
 0x7dd   : > { %10795 = vmatprep.mubr.f32.mxu1 %v15229_v15  ;;  %10805 = vmatprep.mubr.f32.mxu0 %v15192_v45  ;;  %v14235_v36 = vsub.f32 %v7989_v21, %v14209_v54  ;;  %v8114_v8 = vsub.f32 %v14200_v1, %v14222_v58  ;;  %v14278_v25 = vand.u32 4294901760, %v14247_v40  ;;  %v14297_v21 = vand.u32 4294901760, %v14269_v24 }
 0x7de   : > { %v8154_v15 = vsub.f32 %v14098_v52, %v14282_v20 }
 0x7df   : > { %10806 = vmatmul.mubr.f32.vlgmr.msra.gmra.mxu0 %v15208_v10  ;;  %v8069_v23 = vand.u32 4294901760, %v14235_v36  ;;  %v8135_v48 = vsub.f32 %v14247_v40, %v14278_v25 }
 0x7e0   : > { %10796 = vmatmul.mubr.f32.gmra.mxu1 %v15230_v31  ;;  %10834 = vmatpush3.msra.mxu0 %v14152_v47  ;;  %v14312_v31 = vand.u32 4294901760, %v14287_v29 }
 0x7e1   : > { %10835 = vmatprep.subr.mxu0 %v14180_v17  ;;  %10798 = vmatprep.mubr.f32.mxu1 %v15231_v42  ;;  %v8070_v51 = vsub.f32 %v14235_v36, %v8069_v23  ;;  %v8142_v42 = vsub.f32 %v14269_v24, %v14297_v21  ;;  %v8136_v52 = vand.u32 4294901760, %v8135_v48 }
 0x7e2   : > { %10836 = vmatpush3.msra.mxu0 %v14180_v17  ;;  %10808 = vmatprep.mubr.f32.mxu0 %v15210_v3 }
 0x7e3   : > { %10837 = vmatprep.subr.mxu0 %v14193_v27  ;;  %10809 = vmatmul.mubr.f32.gmra.mxu0 %v15212_v12  ;;  %v8071_v60 = vand.u32 4294901760, %v8070_v51 }
 0x7e4   : > { %10799 = vmatmul.mubr.f32.gmra.mxu1 %v15232_v9  ;;  %10838 = vmatpush3.msra.mxu0 %v14193_v27  ;;  %v8081_v9 = vand.u32 4294901760, %v8080_v33 }
 0x7e5   : > { %10839 = vmatprep.subr.mxu0 %v14207_v55  ;;  %10811 = vmatprep.mubr.f32.mxu0 %v15213_v18 }
 0x7e6   : > { %10840 = vmatpush3.msra.mxu0 %v14207_v55  ;;  %10821 = vmatprep.mubr.f32.mxu1 %v15192_v45  ;;  %v8115_v45 = vand.u32 4294901760, %v8114_v8  ;;  %v8149_v8 = vsub.f32 %v14287_v29, %v14312_v31 }
 0x7e7   : > { %10841 = vmatprep.subr.mxu0 %v14217_v13  ;;  %10812 = vmatmul.mubr.f32.gmra.mxu0 %v15216_v16 }
 0x7e8   : > { %10822 = vmatmul.mubr.f32.vlgmr.msra.gmra.mxu1 %v15208_v10  ;;  %10842 = vmatpush3.msra.mxu0 %v14217_v13  ;;  %v8128_v10 = vsub.f32 %v14230_v62, %v14264_v63 }
 0x7e9   : > { %10853 = vmatpush3.msra.mxu1 %v8108_v59  ;;  %10843 = vmatprep.subr.mxu0 %v14238_v30  ;;  %v8122_v59 = vand.u32 4294901760, %v8121_v38  ;;  %v8143_v38 = vand.u32 4294901760, %v8142_v42  ;;  %v11160_v42 = vld [vmem:[%s14763_s5 + $0x78] sm:$0xff] }
 0x7ea   : > { %10854 = vmatprep.subr.mxu1 %v8115_v45  ;;  %10844 = vmatpush3.msra.mxu0 %v14238_v30 }
 0x7eb   : > { %10855 = vmatpush3.msra.mxu1 %v8115_v45  ;;  %10814 = vmatprep.mubr.f32.mxu0 %v15217_v57 }
 0x7ec   : > { %10824 = vmatprep.mubr.f32.mxu1 %v15210_v3  ;;  %10845 = vmatprep.subr.mxu0 %v14259_v4  ;;  %v8129_v3 = vand.u32 4294901760, %v8128_v10 }
 0x7ed   : > { %10856 = vmatprep.subr.mxu1 %v8122_v59  ;;  %10815 = vmatmul.mubr.f32.gmra.mxu0 %v15220_v28 }
 0x7ee   : > { %10825 = vmatmul.mubr.f32.gmra.mxu1 %v15212_v12  ;;  %10846 = vmatpush3.msra.mxu0 %v14259_v4  ;;  %v14319_v12 = vand.u32 4294901760, %v8154_v15 }
 0x7ef   : > { %10857 = vmatpush3.msra.mxu1 %v8122_v59  ;;  %10847 = vmatprep.subr.mxu0 %v14282_v20 }
 0x7f0   : > { %10858 = vmatprep.subr.mxu1 %v8129_v3  ;;  %10848 = vmatpush3.msra.mxu0 %v14282_v20  ;;  %v8156_v45 = vsub.f32 %v8154_v15, %v14319_v12 }
 0x7f1   : > { %10859 = vmatpush3.msra.mxu1 %v8129_v3  ;;  %10827 = vmatprep.mubr.f32.mxu1 %v15213_v18  ;;  %v8150_v18 = vand.u32 4294901760, %v8149_v8 }
 0x7f2   : > { %10849 = vmatprep.mubr.f32.mxu0 %v8071_v60  ;;  %10860 = vmatprep.subr.mxu1 %v8136_v52  ;;  %v11159_v60 = vld [vmem:[%s14763_s5 + $0x60] sm:$0xff] }
 0x7f3   : > { %10871 = vmatprep.subr.mxu0 %v14162_v43  ;;  %10828 = vmatmul.mubr.f32.gmra.mxu1 %v15216_v16  ;;  %v8157_v16 = vand.u32 4294901760, %v8156_v45 }
 0x7f4   : > { %10850 = vmatmul.mubr.f32.vlgmr.msra.gmra.mxu0 %v8081_v9  ;;  %10861 = vmatpush3.msra.mxu1 %v8136_v52 }
 0x7f5   : > { %10872 = vmatpush3.msra.mxu0 %v14162_v43  ;;  %10862 = vmatprep.subr.mxu1 %v8143_v38 }
 0x7f6   : > { %10873 = vmatprep.subr.mxu0 %v14200_v1  ;;  %10863 = vmatpush3.msra.mxu1 %v8143_v38 }
 0x7f7   : > { %10874 = vmatpush3.msra.mxu0 %v14200_v1  ;;  %10830 = vmatprep.mubr.f32.mxu1 %v15217_v57 }
 0x7f8   : > { %10864 = vmatprep.subr.mxu1 %v8150_v18  ;;  %10875 = vmatprep.subr.mxu0 %v14213_v39 }
 0x7f9   : > { %10831 = vmatmul.mubr.f32.gmra.mxu1 %v15220_v28  ;;  %10876 = vmatpush3.msra.mxu0 %v14213_v39  ;;  %v11154_v39 = vld [vmem:[%s14763_s5 + $0x48] sm:$0xff] }
 0x7fa   : > { %10865 = vmatpush3.msra.mxu1 %v8150_v18  ;;  %10877 = vmatprep.subr.mxu0 %v14230_v62 }
 0x7fb   : > { %10866 = vmatprep.subr.mxu1 %v8157_v16  ;;  %10878 = vmatpush3.msra.mxu0 %v14230_v62 }
 0x7fc   : > { %10867 = vmatpush3.msra.mxu1 %v8157_v16  ;;  %10868 = vmatprep.mubr.f32.mxu1 %v14209_v54 }
 0x7fd   : > { %10879 = vmatprep.subr.mxu0 %v14247_v40  ;;  %10890 = vmatprep.subr.mxu1 %v14152_v47 }
 0x7fe   : > { %10869 = vmatmul.mubr.f32.vlgmr.msra.gmra.mxu1 %v14224_v34  ;;  %10880 = vmatpush3.msra.mxu0 %v14247_v40  ;;  %v11156_v40 = vld [vmem:[%s14763_s5 + $0x58] sm:$0xff] }
 0x7ff   : > { %10891 = vmatpush3.msra.mxu1 %v14152_v47  ;;  %10881 = vmatprep.subr.mxu0 %v14269_v24 }
 0x800   : > { %10892 = vmatprep.subr.mxu1 %v14180_v17  ;;  %10882 = vmatpush3.msra.mxu0 %v14269_v24 }
 0x801   : > { %10893 = vmatpush3.msra.mxu1 %v14180_v17  ;;  %10883 = vmatprep.subr.mxu0 %v14287_v29 }
 0x802   : > { %10894 = vmatprep.subr.mxu1 %v14193_v27  ;;  %10884 = vmatpush3.msra.mxu0 %v14287_v29  ;;  %v11158_v29 = vld [vmem:[%s14763_s5 + $0x68] sm:$0xff] }
 0x803   : > { %10895 = vmatpush3.msra.mxu1 %v14193_v27  ;;  %10885 = vmatprep.subr.mxu0 %v8154_v15 }
 0x804   : > { %10896 = vmatprep.subr.mxu1 %v14207_v55  ;;  %10886 = vmatpush3.msra.mxu0 %v8154_v15 }
 0x805   : > { %10887 = vmatprep.mubr.f32.mxu0 %v14235_v36  ;;  %10897 = vmatpush3.msra.mxu1 %v14207_v55  ;;  %v11155_v36 = vld [vmem:[%s14763_s5 + $0x40] sm:$0xff] }
 0x806   : > { %10888 = vmatmul.mubr.f32.vlgmr.msra.gmra.mxu0 %v14254_v2  ;;  %10898 = vmatprep.subr.mxu1 %v14217_v13 }
 0x807   : > { %10909 = vmatprep.subr.mxu0 %v14169_v22  ;;  %10899 = vmatpush3.msra.mxu1 %v14217_v13 }
 0x808   : > { %10910 = vmatpush3.msra.mxu0 %v14169_v22  ;;  %10900 = vmatprep.subr.mxu1 %v14238_v30 }
 0x809   : > { %10911 = vmatprep.subr.mxu0 %v14222_v58  ;;  %10901 = vmatpush3.msra.mxu1 %v14238_v30 }
 0x80a   : > { %10912 = vmatpush3.msra.mxu0 %v14222_v58  ;;  %10902 = vmatprep.subr.mxu1 %v14259_v4 }
 0x80b   : > { %10913 = vmatprep.subr.mxu0 %v14243_v41  ;;  %10903 = vmatpush3.msra.mxu1 %v14259_v4 }
 0x80c   : > { %10914 = vmatpush3.msra.mxu0 %v14243_v41  ;;  %10904 = vmatprep.subr.mxu1 %v14282_v20 }
 0x80d   : > { %10915 = vmatprep.subr.mxu0 %v14264_v63  ;;  %10905 = vmatpush3.msra.mxu1 %v14282_v20 }
 0x80e   : > { %10906 = vmatprep.mubr.f32.mxu1 %v8069_v23  ;;  %10916 = vmatpush3.msra.mxu0 %v14264_v63 }
 0x80f   : > { %10907 = vmatmul.mubr.f32.vlgmr.msra.gmra.mxu1 %v8079_v6  ;;  %10917 = vmatprep.subr.mxu0 %v14278_v25  ;;  %v11157_v6 = vld [vmem:[%s14763_s5 + $0x50] sm:$0xff] }
 0x810   : > { %10928 = vmatprep.subr.mxu1 %v14152_v47  ;;  %10918 = vmatpush3.msra.mxu0 %v14278_v25 }
 0x811   : > { %10929 = vmatpush3.msra.mxu1 %v14152_v47  ;;  %10919 = vmatprep.subr.mxu0 %v14297_v21  ;;  %v9699_v47 = vld [vmem:[%s14762_s4 + $0x100] sm:$0xff] }
 0x812   : > { %10930 = vmatprep.subr.mxu1 %v14180_v17  ;;  %10920 = vmatpush3.msra.mxu0 %v14297_v21  ;;  %v8595_v43 = vsel %vm1095_vm1, %v9699_v47, 0 }
 0x813   : > { %10931 = vmatpush3.msra.mxu1 %v14180_v17  ;;  %10921 = vmatprep.subr.mxu0 %v14312_v31  ;;  %v14405_v57 = vand.u32 4294901760, %v8595_v43 }
 0x814   : > { %10932 = vmatprep.subr.mxu1 %v14193_v27  ;;  %10922 = vmatpush3.msra.mxu0 %v14312_v31 }
 0x815   : > { %10933 = vmatpush3.msra.mxu1 %v14193_v27  ;;  %10923 = vmatprep.subr.mxu0 %v14319_v12  ;;  %v14408_v22 = vsub.f32 %v8595_v43, %v14405_v57  ;;  %v11161_v43 = vld [vmem:[%s14763_s5 + $0x70] sm:$0xff] }
 0x816   : > { %10934 = vmatprep.subr.mxu1 %v14207_v55  ;;  %10924 = vmatpush3.msra.mxu0 %v14319_v12 }
 0x817   : > { %10925 = vmatprep.mubr.f32.mxu0 %v14209_v54  ;;  %10935 = vmatpush3.msra.mxu1 %v14207_v55  ;;  %v8687_v28 = vand.u32 4294901760, %v14408_v22 }
 0x818   : > { %10926 = vmatmul.mubr.f32.vlgmr.msra.gmra.mxu0 %v14224_v34  ;;  %10936 = vmatprep.subr.mxu1 %v14217_v13 }
 0x819   : > { %10937 = vmatpush3.msra.mxu1 %v14217_v13  ;;  %10944 = vmatprep.mubr.f32.mxu1 %v14209_v54  ;;  %v8688_v17 = vsub.f32 %v14408_v22, %v8687_v28 }
 0x81a   : > { %10938 = vmatprep.subr.mxu1 %v14238_v30 }
 0x81b   : > { %10939 = vmatpush3.msra.mxu1 %v14238_v30  ;;  %v8689_v27 = vand.u32 4294901760, %v8688_v17 }
 0x81c   : > { %10940 = vmatprep.subr.mxu1 %v14259_v4 }
 0x81d   : > { %10941 = vmatpush3.msra.mxu1 %v14259_v4  ;;  %10951 = vmatprep.mubr.f32.mxu0 %v8689_v27 }
 0x81e   : > { %10942 = vmatprep.subr.mxu1 %v14282_v20 }
 0x81f   : > { %10943 = vmatpush3.msra.mxu1 %v14282_v20 }
 0x820   : > { %10945 = vmatmul.mubr.f32.vlgmr.msra.gmra.mxu1 %v14224_v34 }
 0x821   : > { %10967 = vmatprep.mubr.f32.mxu1 %v14405_v57 }
 0x87f   : > { %v10743_v1 = vpop.f32.mrf.mxu0 }
 0x880   : > { %v7282_v13 = vadd.f32 %v11154_v39, %v10743_v1 }
 0x881   : > { %v7271_v55 = vpop.f32.mrf.mxu0 }
 0x882   : > { %v7272_v30 = vadd.f32 %v11155_v36, %v7271_v55 }
 0x883   : > { %v10746_v54 = vpop.f32.mrf.mxu0 }
 0x884   : > { %v7302_v2 = vadd.f32 %v11156_v40, %v10746_v54 }
 0x885   : > { %v7291_v58 = vpop.f32.mrf.mxu0 }
 0x886   : > { %v7292_v20 = vadd.f32 %v11157_v6, %v7291_v58 }
 0x887   : > { %v10749_v34 = vpop.f32.mrf.mxu0  ;;  %v10759_v62 = vpop.f32.mrf.mxu1 }
 0x888   : > { %v7429_v41 = vadd.f32 %v10759_v62, %v7282_v13  ;;  %v7322_v10 = vadd.f32 %v11158_v29, %v10749_v34 }
 0x889   : > { %v7311_v4 = vpop.f32.mrf.mxu0  ;;  %v7422_v63 = vpop.f32.mrf.mxu1 }
 0x88a   : > { %v7423_v23 = vadd.f32 %v7422_v63, %v7272_v30  ;;  %v7312_v31 = vadd.f32 %v11159_v60, %v7311_v4 }
 0x88b   : > { %v10752_v24 = vpop.f32.mrf.mxu0 }
 0x88c   : > { %v10762_v25 = vpop.f32.mrf.mxu1  ;;  %v7342_v52 = vadd.f32 %v11160_v42, %v10752_v24 }
 0x88d   : > { %v7441_v51 = vadd.f32 %v10762_v25, %v7302_v2  ;;  %v7331_v59 = vpop.f32.mrf.mxu0 }
 0x88e   : > { %v7434_v21 = vpop.f32.mrf.mxu1  ;;  %v7332_v17 = vadd.f32 %v11161_v43, %v7331_v59 }
 0x88f   : > { %v7435_v48 = vadd.f32 %v7434_v21, %v7292_v20  ;;  %v10775_v33 = vpop.f32.mrf.mxu0 }
 0x890   : > { %v10765_v15 = vpop.f32.mrf.mxu1  ;;  %v7548_v3 = vadd.f32 %v10775_v33, %v7429_v41 }
 0x891   : > { %v7453_v9 = vadd.f32 %v10765_v15, %v7322_v10  ;;  %v7540_v12 = vpop.f32.mrf.mxu0 }
 0x892   : > { %v7446_v8 = vpop.f32.mrf.mxu1  ;;  %v7541_v38 = vadd.f32 %v7540_v12, %v7423_v23 }
 0x893   : > { %v7447_v45 = vadd.f32 %v7446_v8, %v7312_v31  ;;  %v10778_v18 = vpop.f32.mrf.mxu0 }
 0x894   : > { %v10768_v16 = vpop.f32.mrf.mxu1  ;;  %v7562_v47 = vadd.f32 %v10778_v18, %v7441_v51 }
 0x895   : > { %v7465_v27 = vadd.f32 %v10768_v16, %v7342_v52  ;;  %v7554_v1 = vpop.f32.mrf.mxu0 }
 0x896   : > { %v7458_v55 = vpop.f32.mrf.mxu1  ;;  %v7555_v54 = vadd.f32 %v7554_v1, %v7435_v48 }
 0x897   : > { %v7459_v39 = vadd.f32 %v7458_v55, %v7332_v17  ;;  %v10781_v13 = vpop.f32.mrf.mxu0 }
 0x898   : > { %v7576_v58 = vadd.f32 %v10781_v13, %v7453_v9  ;;  %v10791_v34 = vpop.f32.mrf.mxu1 }
 0x899   : > { %v7673_v62 = vadd.f32 %v10791_v34, %v7548_v3  ;;  %v7568_v36 = vpop.f32.mrf.mxu0 }
 0x89a   : > { %v7569_v30 = vadd.f32 %v7568_v36, %v7447_v45  ;;  %v7664_v41 = vpop.f32.mrf.mxu1 }
 0x89b   : > { %v7665_v40 = vadd.f32 %v7664_v41, %v7541_v38  ;;  %v10784_v2 = vpop.f32.mrf.mxu0 }
 0x89c   : > { %v7590_v4 = vadd.f32 %v10784_v2, %v7465_v27  ;;  %v10794_v63 = vpop.f32.mrf.mxu1 }
 0x89d   : > { %v7689_v23 = vadd.f32 %v10794_v63, %v7562_v47  ;;  %v7582_v24 = vpop.f32.mrf.mxu0 }
 0x89e   : > { %v7583_v25 = vadd.f32 %v7582_v24, %v7459_v39  ;;  %v7680_v6 = vpop.f32.mrf.mxu1 }
 0x89f   : > { %v7681_v20 = vadd.f32 %v7680_v6, %v7555_v54  ;;  %v10807_v29 = vpop.f32.mrf.mxu0  ;;  %v9698_v6 = vld [vmem:[%s14761_s3 + $0x48] sm:$0xff] }
 0x8a0   : > { %v10797_v10 = vpop.f32.mrf.mxu1  ;;  %v7804_v51 = vadd.f32 %v10807_v29, %v7673_v62 }
 0x8a1   : > { %v7705_v59 = vadd.f32 %v10797_v10, %v7576_v58  ;;  %v7797_v21 = vpop.f32.mrf.mxu0  ;;  %v9701_v10 = vld [vmem:[%s14762_s4 + $0x110] sm:$0xff] }
 0x8a2   : > { %v7696_v48 = vpop.f32.mrf.mxu1  ;;  %v7798_v33 = vadd.f32 %v7797_v21, %v7665_v40  ;;  %v9702_v21 = vld [vmem:[%s14762_s4 + $0x118] sm:$0xff] }
 0x8a3   : > { %v7697_v15 = vadd.f32 %v7696_v48, %v7569_v30  ;;  %v10810_v3 = vpop.f32.mrf.mxu0 }
 0x8a4   : > { %v10800_v60 = vpop.f32.mrf.mxu1  ;;  %v7816_v31 = vadd.f32 %v10810_v3, %v7689_v23 }
 0x8a5   : > { %v7721_v42 = vadd.f32 %v10800_v60, %v7590_v4  ;;  %v7809_v52 = vpop.f32.mrf.mxu0 }
 0x8a6   : > { %v7712_v9 = vpop.f32.mrf.mxu1  ;;  %v7810_v12 = vadd.f32 %v7809_v52, %v7681_v20 }
 0x8a7   : > { %v7713_v8 = vadd.f32 %v7712_v9, %v7583_v25  ;;  %v10813_v38 = vpop.f32.mrf.mxu0  ;;  %v9700_v25 = vld [vmem:[%s14762_s4 + $0x108] sm:$0xff] }
 0x8a8   : > { %v7828_v45 = vadd.f32 %v10813_v38, %v7705_v59  ;;  %v10823_v18 = vpop.f32.mrf.mxu1 }
 0x8a9   : > { %v14439_v16 = vadd.f32 %v10823_v18, %v7804_v51  ;;  %v7821_v47 = vpop.f32.mrf.mxu0  ;;  %v8598_v51 = vsel %vm1095_vm1, %v9700_v25, 0 }
 0x8aa   : > { %v7822_v43 = vadd.f32 %v7821_v47, %v7697_v15  ;;  %v7912_v17 = vpop.f32.mrf.mxu1  ;;  %v9697_v15 = vld [vmem:[%s14761_s3 + $0x40] sm:$0xff]  ;;  %v14472_v60 = vand.u32 4294901760, %v8598_v51 }
 0x8ab   : > { %v14441_v27 = vadd.f32 %v7912_v17, %v7798_v33  ;;  %v8601_v33 = vsel %vm1095_vm1, %v9701_v10, 0 }
 0x8ac   : > { %v14484_v47 = vsub.f32 %v8598_v51, %v14472_v60 }
 0x8ad   : > { %v10816_v1 = vpop.f32.mrf.mxu0 }
 0x8ae   : > { %v7840_v55 = vadd.f32 %v10816_v1, %v7721_v42  ;;  %v10826_v54 = vpop.f32.mrf.mxu1  ;;  %v9703_v42 = vld [vmem:[%s14762_s4 + $0x120] sm:$0xff]  ;;  %v9705_v1 = vld [vmem:[%s14762_s4 + $0x130] sm:$0xff] }
 0x8af   : > { %v14443_v39 = vadd.f32 %v10826_v54, %v7816_v31  ;;  %v7833_v13 = vpop.f32.mrf.mxu0  ;;  %v8604_v31 = vsel %vm1095_vm1, %v9702_v21, 0  ;;  %v8607_v17 = vsel %vm1095_vm1, %v9703_v42, 0 }
 0x8b0   : > { %v7834_v58 = vadd.f32 %v7833_v13, %v7713_v8  ;;  %v7924_v34 = vpop.f32.mrf.mxu1 }
 0x8b1   : > { %v14445_v62 = vadd.f32 %v7924_v34, %v7810_v12  ;;  %v14478_v12 = vand.u32 4294901760, %v8601_v33 }
 0x8b3   : > { %v10829_v36 = vpop.f32.mrf.mxu1 }
 0x8b4   : > { %v14447_v30 = vadd.f32 %v10829_v36, %v7828_v45  ;;  %v10851_v24 = vpop.f32.mrf.mxu0  ;;  %v9704_v45 = vld [vmem:[%s14762_s4 + $0x128] sm:$0xff] }
 0x8b5   : > { %v7936_v41 = vpop.f32.mrf.mxu1  ;;  %v8084_v48 = vadd.f32 %v10851_v24, %v9698_v6  ;;  %v8610_v34 = vsel %vm1095_vm1, %v9704_v45, 0  ;;  %v9706_v24 = vld [vmem:[%s14762_s4 + $0x138] sm:$0xff]  ;;  %v8697_v6 = vand.u32 4294901760, %v14484_v47 }
 0x8b6   : > { %v14449_v40 = vadd.f32 %v7936_v41, %v7822_v43  ;;  %v8073_v20 = vpop.f32.mrf.mxu0  ;;  %v14486_v43 = vand.u32 4294901760, %v8604_v31  ;;  %v14506_v51 = vand.u32 4294901760, %v8610_v34 }
 0x8b7   : > { %v8074_v8 = vadd.f32 %v9697_v15, %v8073_v20 }
 0x8b8   : > { %v14504_v20 = vsub.f32 %v8604_v31, %v14486_v43  ;;  %v8698_v31 = vsub.f32 %v14484_v47, %v8697_v6  ;;  %v14520_v45 = vsub.f32 %v8610_v34, %v14506_v51 }
 0x8b9   : > { %v10832_v2 = vpop.f32.mrf.mxu1 }
 0x8ba   : > { %v14451_v4 = vadd.f32 %v10832_v2, %v7840_v55  ;;  %v14496_v2 = vand.u32 4294901760, %v8607_v17 }
 0x8bb   : > { %v7948_v63 = vpop.f32.mrf.mxu1 }
 0x8bc   : > { %v14453_v23 = vadd.f32 %v7948_v63, %v7834_v58  ;;  %v14493_v58 = vsub.f32 %v8601_v33, %v14478_v12  ;;  %v8613_v63 = vsel %vm1095_vm1, %v9705_v1, 0  ;;  %v8616_v33 = vsel %vm1095_vm1, %v9706_v24, 0 }
 0x8bd   : > { %v14513_v42 = vsub.f32 %v8607_v17, %v14496_v2 }
 0x8be   : > { %v10870_v29 = vpop.f32.mrf.mxu1  ;;  %v14890_v21 = vand.u32 4294901760, %v14493_v58 }
 0x8bf   : > { %v8201_v38 = vadd.f32 %v10870_v29, %v8084_v48  ;;  %v14509_v48 = vand.u32 4294901760, %v8613_v63 }
 0x8c0   : > { %v8194_v3 = vpop.f32.mrf.mxu1  ;;  %v8708_v1 = vsub.f32 %v14493_v58, %v14890_v21 }
 0x8c1   : > { %v8195_v55 = vadd.f32 %v8194_v3, %v8074_v8  ;;  %v14528_v17 = vsub.f32 %v8613_v63, %v14509_v48 }
 0x8c6   : > { %v10889_v59 = vpop.f32.mrf.mxu0 }
 0x8c7   : > { %v8296_v54 = vadd.f32 %v10889_v59, %v8201_v38 }
 0x8c8   : > { %v8288_v52 = vpop.f32.mrf.mxu0 }
 0x8c9   : > { %v8289_v36 = vadd.f32 %v8288_v52, %v8195_v55 }
 0x8cf   : > { %v10908_v9 = vpop.f32.mrf.mxu1 }
 0x8d0   : > { %v8385_v41 = vadd.f32 %v10908_v9, %v8296_v54  ;;  %v14889_v9 = vand.u32 4294901760, %v14504_v20 }
 0x8d1   : > { %v8376_v13 = vpop.f32.mrf.mxu1 }
 0x8d2   : > { %v8377_v29 = vadd.f32 %v8376_v13, %v8289_v36  ;;  %v14888_v13 = vand.u32 4294901760, %v14513_v42  ;;  %v8699_v36 = vand.u32 4294901760, %v8698_v31  ;;  %v8718_v34 = vsub.f32 %v14504_v20, %v14889_v9 }
 0x8d8   : > { %v10927_v18 = vpop.f32.mrf.mxu0 }
 0x8d9   : > { %v8486_v10 = vadd.f32 %v10927_v18, %v8385_v41  ;;  %v14522_v18 = vand.u32 4294901760, %v8616_v33 }
 0x8da   : > { %v8479_v25 = vpop.f32.mrf.mxu0 }
 0x8db   : > { %v8480_v15 = vadd.f32 %v8479_v25, %v8377_v29  ;;  %v14891_v25 = vand.u32 4294901760, %v14520_v45  ;;  %v14542_v63 = vsub.f32 %v8616_v33, %v14522_v18  ;;  %v8709_v29 = vand.u32 4294901760, %v8708_v1 }
 0x8e0   : > { %v10946_v59 = vpop.f32.mrf.mxu1 }
 0x8e1   : > { %v8571_v3 = vadd.f32 %v10946_v59, %v8486_v10  ;;  %v8747_v10 = vand.u32 4294901760, %v14528_v17 }
 0x8e2   : > { %v8564_v52 = vpop.f32.mrf.mxu1 }
 0x8e3   : > { %v8575_v8 = vmax.f32 %v8571_v3, 0.0  ;;  %v8565_v38 = vadd.f32 %v8564_v52, %v8480_v15  ;;  %v8728_v3 = vsub.f32 %v14513_v42, %v14888_v13  ;;  %v8719_v52 = vand.u32 4294901760, %v8718_v34 }
 0x8e4   : > { %v8748_v1 = vsub.f32 %v14528_v17, %v8747_v10 }
 0x8e5   : > { %v14530_v55 = vand.u32 4294901760, %v8575_v8  ;;  %v8574_v54 = vmax.f32 %v8565_v38, 0.0  ;;  %v8757_v38 = vand.u32 4294901760, %v14542_v63  ;;  %v8729_v34 = vand.u32 4294901760, %v8728_v3 }
 0x8e7   : > { %v8795_v41 = vsub.f32 %v8575_v8, %v14530_v55  ;;  %v14537_v24 = vand.u32 4294901760, %v8574_v54  ;;  %10947 = vmatprep.subr.mxu0 %v14530_v55  ;;  %v8738_v8 = vsub.f32 %v14520_v45, %v14891_v25  ;;  %v8758_v21 = vsub.f32 %v14542_v63, %v8757_v38 }
 0x8e8   : > { %10948 = vmatpush3.msra.mxu0 %v14530_v55  ;;  %v8749_v25 = vand.u32 4294901760, %v8748_v1  ;;  %v9710_v1 = vld [vmem:[%s14763_s5 + $0x118] sm:$0xff] }
 0x8e9   : > { %v8802_v59 = vsub.f32 %v8574_v54, %v14537_v24  ;;  %10949 = vmatprep.subr.mxu0 %v14537_v24  ;;  %v8796_v15 = vand.u32 4294901760, %v8795_v41  ;;  %v8739_v9 = vand.u32 4294901760, %v8738_v8 }
 0x8ea   : > { %10950 = vmatpush3.msra.mxu0 %v14537_v24 }
 0x8eb   : > { %10952 = vmatmul.mubr.f32.vlgmr.msra.gmra.mxu0 %v8699_v36  ;;  %10979 = vmatprep.subr.mxu0 %v8795_v41  ;;  %v8797_v33 = vsub.f32 %v8795_v41, %v8796_v15  ;;  %v8803_v31 = vand.u32 4294901760, %v8802_v59 }
 0x8ec   : > { %10980 = vmatpush3.msra.mxu0 %v8795_v41  ;;  %10954 = vmatprep.mubr.f32.mxu0 %v8709_v29  ;;  %v8759_v41 = vand.u32 4294901760, %v8758_v21  ;;  %v15233_v21 = vand.u32 4294901760, %v14493_v58 }
 0x8ed   : > { %10981 = vmatprep.subr.mxu0 %v8802_v59  ;;  %v8798_v54 = vand.u32 4294901760, %v8797_v33  ;;  %v8804_v13 = vsub.f32 %v8802_v59, %v8803_v31 }
 0x8ee   : > { %10982 = vmatpush3.msra.mxu0 %v8802_v59 }
 0x8ef   : > { %10955 = vmatmul.mubr.f32.gmra.mxu0 %v8719_v52  ;;  %10963 = vmatprep.subr.mxu1 %v8798_v54  ;;  %v8805_v36 = vand.u32 4294901760, %v8804_v13 }
 0x8f0   : > { %11011 = vmatprep.subr.mxu0 %v8796_v15  ;;  %10964 = vmatpush3.msra.mxu1 %v8798_v54 }
 0x8f1   : > { %10965 = vmatprep.subr.mxu1 %v8805_v36  ;;  %10957 = vmatprep.mubr.f32.mxu0 %v8729_v34 }
 0x8f2   : > { %10966 = vmatpush3.msra.mxu1 %v8805_v36 }
 0x8f3   : > { %10958 = vmatmul.mubr.f32.gmra.mxu0 %v8739_v9  ;;  %10968 = vmatmul.mubr.f32.vlgmr.msra.gmra.mxu1 %v14472_v60 }
 0x8f4   : > { %10995 = vmatprep.subr.mxu1 %v14530_v55  ;;  %10960 = vmatprep.mubr.f32.mxu0 %v8749_v25 }
 0x8f5   : > { %10996 = vmatpush3.msra.mxu1 %v14530_v55  ;;  %10970 = vmatprep.mubr.f32.mxu1 %v14478_v12 }
 0x8f6   : > { %10997 = vmatprep.subr.mxu1 %v14537_v24 }
 0x8f7   : > { %10998 = vmatpush3.msra.mxu1 %v14537_v24  ;;  %10961 = vmatmul.mubr.f32.gmra.mxu0 %v8759_v41 }
 0x8f8   : > { %10971 = vmatmul.mubr.f32.gmra.mxu1 %v14486_v43  ;;  %11027 = vmatprep.subr.mxu1 %v14530_v55 }
 0x8f9   : > { %10973 = vmatprep.mubr.f32.mxu1 %v14496_v2  ;;  %10983 = vmatprep.mubr.f32.mxu0 %v14408_v22  ;;  %v15234_v22 = vand.u32 4294901760, %v14504_v20 }
 0x8fb   : > { %10984 = vmatmul.mubr.f32.vlgmr.msra.gmra.mxu0 %v14484_v47  ;;  %v15236_v47 = vand.u32 4294901760, %v14520_v45 }
 0x8fc   : > { %10974 = vmatmul.mubr.f32.gmra.mxu1 %v14506_v51  ;;  %11012 = vmatpush3.msra.mxu0 %v8796_v15  ;;  %v9708_v15 = vld [vmem:[%s14763_s5 + $0x108] sm:$0xff] }
 0x8fd   : > { %11013 = vmatprep.subr.mxu0 %v8803_v31  ;;  %10976 = vmatprep.mubr.f32.mxu1 %v14509_v48 }
 0x8fe   : > { %11014 = vmatpush3.msra.mxu0 %v8803_v31  ;;  %10986 = vmatprep.mubr.f32.mxu0 %v14493_v58 }
 0x8ff   : > { %10987 = vmatmul.mubr.f32.gmra.mxu0 %v14504_v20 }
 0x900   : > { %10977 = vmatmul.mubr.f32.gmra.mxu1 %v14522_v18  ;;  %10989 = vmatprep.mubr.f32.mxu0 %v14513_v42 }
 0x901   : > { %10999 = vmatprep.mubr.f32.mxu1 %v8687_v28  ;;  %v15235_v28 = vand.u32 4294901760, %v14513_v42 }
 0x903   : > { %10990 = vmatmul.mubr.f32.gmra.mxu0 %v14520_v45 }
 0x904   : > { %11000 = vmatmul.mubr.f32.vlgmr.msra.gmra.mxu1 %v8697_v6  ;;  %10992 = vmatprep.mubr.f32.mxu0 %v14528_v17 }
 0x905   : > { %11028 = vmatpush3.msra.mxu1 %v14530_v55  ;;  %11002 = vmatprep.mubr.f32.mxu1 %v15233_v21 }
 0x906   : > { %11029 = vmatprep.subr.mxu1 %v14537_v24 }
 0x907   : > { %11030 = vmatpush3.msra.mxu1 %v14537_v24  ;;  %10993 = vmatmul.mubr.f32.gmra.mxu0 %v14542_v63 }
 0x908   : > { %11003 = vmatmul.mubr.f32.gmra.mxu1 %v15234_v22  ;;  %11015 = vmatprep.mubr.f32.mxu0 %v14405_v57  ;;  %v9712_v22 = vld [vmem:[%s14763_s5 + $0x128] sm:$0xff] }
 0x909   : > { %11005 = vmatprep.mubr.f32.mxu1 %v15235_v28 }
 0x90b   : > { %11016 = vmatmul.mubr.f32.vlgmr.msra.gmra.mxu0 %v14472_v60 }
 0x90c   : > { %11006 = vmatmul.mubr.f32.gmra.mxu1 %v15236_v47  ;;  %11018 = vmatprep.mubr.f32.mxu0 %v14478_v12 }
 0x90d   : > { %11008 = vmatprep.mubr.f32.mxu1 %v8747_v10 }
 0x90f   : > { %11019 = vmatmul.mubr.f32.gmra.mxu0 %v14486_v43 }
 0x910   : > { %11009 = vmatmul.mubr.f32.gmra.mxu1 %v8757_v38  ;;  %11021 = vmatprep.mubr.f32.mxu0 %v14496_v2  ;;  %v9707_v38 = vld [vmem:[%s14763_s5 + $0x100] sm:$0xff] }
 0x911   : > { %11031 = vmatprep.mubr.f32.mxu1 %v14405_v57 }
 0x913   : > { %11022 = vmatmul.mubr.f32.gmra.mxu0 %v14506_v51 }
 0x914   : > { %11032 = vmatmul.mubr.f32.vlgmr.msra.gmra.mxu1 %v14472_v60  ;;  %11024 = vmatprep.mubr.f32.mxu0 %v14509_v48 }
 0x915   : > { %11034 = vmatprep.mubr.f32.mxu1 %v14478_v12 }
 0x917   : > { %11025 = vmatmul.mubr.f32.gmra.mxu0 %v14522_v18 }
 0x918   : > { %11035 = vmatmul.mubr.f32.gmra.mxu1 %v14486_v43 }
 0x919   : > { %11037 = vmatprep.mubr.f32.mxu1 %v14496_v2 }
 0x91c   : > { %11038 = vmatmul.mubr.f32.gmra.mxu1 %v14506_v51 }
 0x91d   : > { %11040 = vmatprep.mubr.f32.mxu1 %v14509_v48 }
 0x920   : > { %11041 = vmatmul.mubr.f32.gmra.mxu1 %v14522_v18 }
 0x9ab   : > { %v10953_v57 = vpop.f32.mrf.mxu0 }
 0x9ac   : > { %v8702_v31 = vadd.f32 %v10953_v57, %v9708_v15  ;;  %v9709_v57 = vld [vmem:[%s14763_s5 + $0x110] sm:$0xff] }
 0x9ad   : > { %v8691_v58 = vpop.f32.mrf.mxu0 }
 0x9ae   : > { %v8692_v41 = vadd.f32 %v9707_v38, %v8691_v58  ;;  %v9711_v58 = vld [vmem:[%s14763_s5 + $0x120] sm:$0xff] }
 0x9af   : > { %v10956_v6 = vpop.f32.mrf.mxu0 }
 0x9b0   : > { %v8722_v21 = vadd.f32 %v10956_v6, %v9710_v1  ;;  %v9714_v6 = vld [vmem:[%s14763_s5 + $0x138] sm:$0xff] }
 0x9b1   : > { %v8711_v60 = vpop.f32.mrf.mxu0 }
 0x9b2   : > { %v8712_v50 = vadd.f32 %v9709_v57, %v8711_v60 }
 0x9b3   : > { %v10959_v20 = vpop.f32.mrf.mxu0  ;;  %v10969_v42 = vpop.f32.mrf.mxu1 }
 0x9b4   : > { %v8849_v28 = vadd.f32 %v10969_v42, %v8702_v31  ;;  %v8742_v53 = vadd.f32 %v10959_v20, %v9712_v22 }
 0x9b5   : > { %v8731_v9 = vpop.f32.mrf.mxu0  ;;  %v8842_v12 = vpop.f32.mrf.mxu1 }
 0x9b6   : > { %v8843_v32 = vadd.f32 %v8842_v12, %v8692_v41  ;;  %v8732_v22 = vadd.f32 %v9711_v58, %v8731_v9 }
 0x9b7   : > { %v10962_v45 = vpop.f32.mrf.mxu0 }
 0x9b8   : > { %v10972_v17 = vpop.f32.mrf.mxu1  ;;  %v8762_v60 = vadd.f32 %v10962_v45, %v9714_v6 }
 0x9b9   : > { %v14613_v55 = vpop.f32.mrf.mxu0  ;;  %v8861_v42 = vadd.f32 %v10972_v17, %v8722_v21 }
 0x9ba   : > { %v8854_v43 = vpop.f32.mrf.mxu1 }
 0x9bb   : > { %v10985_v2 = vpop.f32.mrf.mxu0  ;;  %v8855_v11 = vadd.f32 %v8854_v43, %v8712_v50 }
 0x9bc   : > { %v10975_v13 = vpop.f32.mrf.mxu1  ;;  %v8968_v56 = vadd.f32 %v10985_v2, %v8849_v28 }
 0x9bd   : > { %v8960_v51 = vpop.f32.mrf.mxu0  ;;  %v8873_v28 = vadd.f32 %v10975_v13, %v8742_v53  ;;  %v8752_v53 = vadd.f32 %v9713_v7, %v14613_v55 }
 0x9be   : > { %v8866_v24 = vpop.f32.mrf.mxu1  ;;  %v8961_v31 = vadd.f32 %v8960_v51, %v8843_v32 }
 0x9bf   : > { %v10988_v48 = vpop.f32.mrf.mxu0 }
 0x9c0   : > { %v10978_v25 = vpop.f32.mrf.mxu1  ;;  %v8982_v12 = vadd.f32 %v10988_v48, %v8861_v42 }
 0x9c1   : > { %v8974_v18 = vpop.f32.mrf.mxu0  ;;  %v8885_v45 = vadd.f32 %v10978_v25, %v8762_v60 }
 0x9c2   : > { %v14615_v63 = vpop.f32.mrf.mxu1  ;;  %v8975_v49 = vadd.f32 %v8974_v18, %v8855_v11 }
 0x9c3   : > { %v10991_v29 = vpop.f32.mrf.mxu0 }
 0x9c4   : > { %v11001_v10 = vpop.f32.mrf.mxu1  ;;  %v8996_v51 = vadd.f32 %v10991_v29, %v8873_v28 }
 0x9c5   : > { %v8988_v59 = vpop.f32.mrf.mxu0  ;;  %v9093_v38 = vadd.f32 %v11001_v10, %v8968_v56  ;;  %v8867_v56 = vadd.f32 %v8866_v24, %v8732_v22  ;;  %v8879_v24 = vadd.f32 %v14615_v63, %v8752_v53 }
 0x9c6   : > { %v9084_v3 = vpop.f32.mrf.mxu1 }
 0x9c7   : > { %v10994_v52 = vpop.f32.mrf.mxu0  ;;  %v9085_v2 = vadd.f32 %v9084_v3, %v8961_v31  ;;  %v8989_v13 = vadd.f32 %v8988_v59, %v8867_v56 }
 0x9c8   : > { %v11004_v33 = vpop.f32.mrf.mxu1  ;;  %v9010_v29 = vadd.f32 %v10994_v52, %v8885_v45  ;;  %v15241_v45 = vld [vmem:[#allocation137_spill] sm:$0xff] }
 0x9c9   : > { %v14620_v8 = vpop.f32.mrf.mxu0  ;;  %v9109_v5 = vadd.f32 %v11004_v33, %v8982_v12 }
 0x9ca   : > { %v9100_v54 = vpop.f32.mrf.mxu1  ;;  %v9003_v7 = vadd.f32 %v14620_v8, %v8879_v24 }
 0x9cb   : > { %v11017_v34 = vpop.f32.mrf.mxu0  ;;  %v9101_v43 = vadd.f32 %v9100_v54, %v8975_v49 }
 0x9cc   : > { %v11007_v36 = vpop.f32.mrf.mxu1  ;;  %v9224_v41 = vadd.f32 %v11017_v34, %v9093_v38 }
 0x9cd   : > { %v9217_v47 = vpop.f32.mrf.mxu0  ;;  %v9125_v21 = vadd.f32 %v11007_v36, %v8996_v51  ;;  %v15238_v51 = vld [vmem:[#allocation133_spill] sm:$0xff] }
 0x9ce   : > { %v9116_v15 = vpop.f32.mrf.mxu1  ;;  %v9218_v17 = vadd.f32 %v9217_v47, %v9085_v2 }
 0x9cf   : > { %v11020_v44 = vpop.f32.mrf.mxu0 }
 0x9d0   : > { %v11010_v37 = vpop.f32.mrf.mxu1  ;;  %v9236_v48 = vadd.f32 %v11020_v44, %v9109_v5  ;;  %v9117_v5 = vadd.f32 %v9116_v15, %v8989_v13 }
 0x9d1   : > { %v9229_v1 = vpop.f32.mrf.mxu0  ;;  %v9141_v25 = vadd.f32 %v11010_v37, %v9010_v29  ;;  %v15243_v29 = vld [vmem:[#allocation138_spill] sm:$0xff] }
 0x9d2   : > { %v9132_v35 = vpop.f32.mrf.mxu1  ;;  %v9230_v58 = vadd.f32 %v9229_v1, %v9101_v43 }
 0x9d3   : > { %v11023_v20 = vpop.f32.mrf.mxu0  ;;  %v9133_v52 = vadd.f32 %v9132_v35, %v9003_v7 }
 0x9d4   : > { %v11033_v57 = vpop.f32.mrf.mxu1  ;;  %v9248_v44 = vadd.f32 %v11023_v20, %v9125_v21 }
 0x9d5   : > { %v9339_v32 = vadd.f32 %v11033_v57, %v9224_v41  ;;  %v9241_v10 = vpop.f32.mrf.mxu0 }
 0x9d6   : > { %v9332_v50 = vpop.f32.mrf.mxu1  ;;  %v9242_v59 = vadd.f32 %v9241_v10, %v9117_v5 }
 0x9d7   : > { %v9379_v3 = vadd.f32 %v9339_v32, %v14439_v16  ;;  %v9333_v9 = vadd.f32 %v9332_v50, %v9218_v17  ;;  %v11026_v33 = vpop.f32.mrf.mxu0 }
 0x9d8   : > { %v11036_v34 = vpop.f32.mrf.mxu1  ;;  %v9260_v6 = vadd.f32 %v11026_v33, %v9141_v25 }
 0x9d9   : > { %v9378_v11 = vadd.f32 %v9333_v9, %v14441_v27  ;;  %v9351_v18 = vadd.f32 %v11036_v34, %v9236_v48  ;;  %9393 = vperm.xlu1 %11087, %v9379_v3   ;;  %v9253_v47 = vpop.f32.mrf.mxu0  ;;  %v15239_v48 = vld [vmem:[#allocation132_spill] sm:$0xff] }
 0x9da   : > { %v9344_v49 = vpop.f32.mrf.mxu1  ;;  %v9254_v31 = vadd.f32 %v9253_v47, %v9133_v52  ;;  %v15242_v34 = vld [vmem:[#allocation140_spill] sm:$0xff] }
 0x9db   : > { %v9381_v16 = vadd.f32 %v9351_v18, %v14443_v39  ;;  %v9345_v54 = vadd.f32 %v9344_v49, %v9230_v58  ;;  %9388 = vperm.xlu0 %11086, %v9378_v11   ;;  %v15244_v49 = vld [vmem:[#allocation142_spill] sm:$0xff] }
 0x9dc   : > { %v11039_v55 = vpop.f32.mrf.mxu1 }
 0x9dd   : > { %v9380_v27 = vadd.f32 %v9345_v54, %v14445_v62  ;;  %v9363_v36 = vadd.f32 %v11039_v55, %v9248_v44  ;;  %9403 = vperm.xlu1 %11087, %v9381_v16   ;;  %v15245_v54 = vld [vmem:[#allocation129_spill] sm:$0xff]  ;;  %v15246_v55 = vld [vmem:[#allocation136_spill] sm:$0xff] }
 0x9de   : > { %v9356_v63 = vpop.f32.mrf.mxu1 }
 0x9df   : > { %v9383_v15 = vadd.f32 %v9363_v36, %v14447_v30  ;;  %v9357_v42 = vadd.f32 %v9356_v63, %v9242_v59  ;;  %9398 = vperm.xlu0 %11086, %v9380_v27  }
 0x9e0   : > { %v11042_v39 = vpop.f32.mrf.mxu1 }
 0x9e1   : > { %v9382_v38 = vadd.f32 %v9357_v42, %v14449_v40  ;;  %v9375_v8 = vadd.f32 %v11042_v39, %v9260_v6  ;;  %9413 = vperm.xlu1 %11087, %v9383_v15  }
 0x9e2   : > { %v9368_v37 = vpop.f32.mrf.mxu1 }
 0x9e3   : > { %v9385_v1 = vadd.f32 %v9375_v8, %v14451_v4  ;;  %v9369_v62 = vadd.f32 %v9368_v37, %v9254_v31  ;;  %9408 = vperm.xlu0 %11086, %v9382_v38  }
 0x9e5   : > { %v9384_v12 = vadd.f32 %v9369_v62, %v14453_v23  ;;  %9423 = vperm.xlu1 %11087, %v9385_v1   ;;  %v15247_v62 = vld [vmem:[#allocation18_spill] sm:$0xff] }
 0x9e7   : > { %9418 = vperm.xlu0 %11086, %v9384_v12  }
 0xa54   : > { %v9394_v35 = vpop.permute.xlu1 %9393 }
 0xa55   : > { %v9428_v30 = vadd.f32 %v9394_v35, %v14104_v0  ;;  %v9429_v2 = vadd.f32 %v9394_v35, %v14106_v61  ;;  %v15237_v61 = vld [vmem:[#allocation127_spill] sm:$0xff] }
 0xa56   : > { %v9389_v41 = vpop.permute.xlu0 %9388 }
 0xa57   : > { %v9444_v20 = vmul.f32 0.5, %v9428_v30  ;;  %v9445_v22 = vmul.f32 0.5, %v9429_v2  ;;  %v9426_v40 = vadd.f32 %v9389_v41, %v14100_v19  ;;  %v9427_v60 = vadd.f32 %v9389_v41, %v14102_v14  ;;  %v15248_v41 = vld [vmem:[#allocation17_spill] sm:$0xff] }
 0xa58   : > { %v9404_v28 = vpop.permute.xlu1 %9403 }
 0xa59   : > { %11120 = vtanh.f32 %v9444_v20  ;;  %v9442_v4 = vmul.f32 0.5, %v9426_v40  ;;  %v9443_v57 = vmul.f32 0.5, %v9427_v60  ;;  %v9432_v23 = vadd.f32 %v9404_v28, %v14112_v26  ;;  %v15240_v26 = vld [vmem:[#allocation125_spill] sm:$0xff] }
 0xa5a   : > { %11122 = vtanh.f32 %v9445_v22  ;;  %v9433_v17 = vadd.f32 %v9404_v28, %v14114_v46  ;;  %v9399_v32 = vpop.permute.xlu0 %9398  ;;  %v15249_v28 = vld [vmem:[#allocation20_spill] sm:$0xff] }
 0xa5b   : > { %11124 = vtanh.f32 %v9442_v4  ;;  %v9448_v0 = vmul.f32 0.5, %v9432_v23  ;;  %v9430_v56 = vadd.f32 %v9399_v32, %v15237_v61  ;;  %v9431_v10 = vadd.f32 %v9399_v32, %v15238_v51  ;;  %v15250_v32 = vld [vmem:[#allocation19_spill] sm:$0xff] }
 0xa5c   : > { %11126 = vtanh.f32 %v9443_v57  ;;  %v9449_v19 = vmul.f32 0.5, %v9433_v17  ;;  %v9414_v50 = vpop.permute.xlu1 %9413 }
 0xa5d   : > { %11128 = vtanh.f32 %v9448_v0  ;;  %v9446_v14 = vmul.f32 0.5, %v9430_v56  ;;  %v9447_v43 = vmul.f32 0.5, %v9431_v10  ;;  %v9436_v3 = vadd.f32 %v9414_v50, %v15239_v48  ;;  %v15251_v10 = vld [vmem:[#allocation14_spill] sm:$0xff]  ;;  %v15252_v48 = vld [vmem:[#allocation13_spill] sm:$0xff] }
 0xa5e   : > { %11130 = vtanh.f32 %v9449_v19  ;;  %v9437_v9 = vadd.f32 %v9414_v50, %v15240_v26  ;;  %v9409_v53 = vpop.permute.xlu0 %9408 }
 0xa5f   : > { %11132 = vtanh.f32 %v9446_v14  ;;  %v9452_v46 = vmul.f32 0.5, %v9436_v3  ;;  %v9434_v13 = vadd.f32 %v9409_v53, %v15241_v45  ;;  %v9435_v21 = vadd.f32 %v9409_v53, %v15242_v34 }
 0xa60   : > { %11134 = vtanh.f32 %v9447_v43  ;;  %v9453_v58 = vmul.f32 0.5, %v9437_v9  ;;  %v9424_v11 = vpop.permute.xlu1 %9423 }
 0xa61   : > { %11136 = vtanh.f32 %v9452_v46  ;;  %v9450_v18 = vmul.f32 0.5, %v9434_v13  ;;  %v9451_v24 = vmul.f32 0.5, %v9435_v21  ;;  %v9440_v33 = vadd.f32 %v9424_v11, %v15243_v29  ;;  %v15253_v46 = vld [vmem:[#allocation16_spill] sm:$0xff] }
 0xa62   : > { %11138 = vtanh.f32 %v9453_v58  ;;  %v9441_v5 = vadd.f32 %v9424_v11, %v15244_v49  ;;  %v9419_v44 = vpop.permute.xlu0 %9418  ;;  %v15254_v58 = vld [vmem:[#allocation15_spill] sm:$0xff] }
 0xa63   : > { %11140 = vtanh.f32 %v9450_v18  ;;  %v9456_v16 = vmul.f32 0.5, %v9440_v33  ;;  %v9438_v7 = vadd.f32 %v9419_v44, %v15245_v54  ;;  %v9439_v25 = vadd.f32 %v9419_v44, %v15246_v55  ;;  %v15255_v33 = vld [vmem:[#allocation10_spill] sm:$0xff]  ;;  %v15256_v54 = vld [vmem:[#allocation9_spill] sm:$0xff] }
 0xa64   : > { %11142 = vtanh.f32 %v9451_v24  ;;  %v9457_v59 = vmul.f32 0.5, %v9441_v5 }
 0xa65   : > { %11144 = vtanh.f32 %v9456_v16  ;;  %v9454_v27 = vmul.f32 0.5, %v9438_v7  ;;  %v9455_v36 = vmul.f32 0.5, %v9439_v25 }
 0xa66   : > { %v11121_v47 = vpop.eup %11120  ;;  %11146 = vtanh.f32 %v9457_v59 }
 0xa67   : > { %v11123_v63 = vpop.eup %11122  ;;  %v9476_v52 = vmul.f32 0.5, %v11121_v47  ;;  %11148 = vtanh.f32 %v9454_v27  ;;  %v15257_v27 = vld [vmem:[#allocation12_spill] sm:$0xff] }
 0xa68   : > { %v11125_v6 = vpop.eup %11124  ;;  %v9477_v15 = vmul.f32 0.5, %v11123_v63  ;;  %11150 = vtanh.f32 %v9455_v36 }
 0xa69   : > { %v11127_v42 = vpop.eup %11126  ;;  %v9492_v39 = vadd.f32 0.5, %v9476_v52  ;;  %v9474_v31 = vmul.f32 0.5, %v11125_v6  ;;  %v15258_v52 = vld [vmem:[#allocation11_spill] sm:$0xff] }
 0xa6a   : > { %v11129_v38 = vpop.eup %11128  ;;  %v9493_v8 = vadd.f32 0.5, %v9477_v15  ;;  %v9475_v37 = vmul.f32 0.5, %v11127_v42 }
 0xa6b   : > { %v11131_v1 = vpop.eup %11130  ;;  %v9508_v12 = vmul.f32 %v9492_v39, %v15247_v62  ;;  %v9490_v35 = vadd.f32 0.5, %v9474_v31  ;;  %v9480_v30 = vmul.f32 0.5, %v11129_v38  ;;  %v15259_v39 = vld [vmem:[#allocation6_spill] sm:$0xff]  ;;  %v15261_v62 = vld [vmem:[#allocation8_spill] sm:$0xff] }
 0xa6c   : > { %v11133_v2 = vpop.eup %11132  ;;  %v9509_v20 = vmul.f32 %v9493_v8, %v15248_v41  ;;  %v9491_v22 = vadd.f32 0.5, %v9475_v37  ;;  %v9481_v40 = vmul.f32 0.5, %v11131_v1  ;;  %v15260_v8 = vld [vmem:[#allocation5_spill] sm:$0xff] }
 0xa6d   : > { %v11135_v60 = vpop.eup %11134  ;;  %9524 = vst [vmem:[%s14675_s14 + $0x10] sm:$0xff] %v9508_v12  ;;  %v9506_v4 = vmul.f32 %v9490_v35, %v15249_v28  ;;  %v9496_v57 = vadd.f32 0.5, %v9480_v30  ;;  %v9478_v23 = vmul.f32 0.5, %v11133_v2  ;;  %v15262_v35 = vld [vmem:[#allocation7_spill] sm:$0xff] }
 0xa6e   : > { %v11137_v17 = vpop.eup %11136  ;;  %9525 = vst [vmem:[%s14675_s14 + $0x18] sm:$0xff] %v9509_v20  ;;  %v9507_v0 = vmul.f32 %v9491_v22, %v15250_v32  ;;  %v9497_v61 = vadd.f32 0.5, %v9481_v40  ;;  %v9479_v56 = vmul.f32 0.5, %v11135_v60 }
 0xa6f   : > { %v11139_v51 = vpop.eup %11138  ;;  %9522 = vst [vmem:[%s14675_s14] sm:$0xff] %v9506_v4  ;;  %v9512_v19 = vmul.f32 %v9496_v57, %v15251_v10  ;;  %v9494_v50 = vadd.f32 0.5, %v9478_v23  ;;  %v9484_v14 = vmul.f32 0.5, %v11137_v17 }
 0xa70   : > { %v11141_v43 = vpop.eup %11140  ;;  %9523 = vst [vmem:[%s14675_s14 + $0x8] sm:$0xff] %v9507_v0  ;;  %v9513_v3 = vmul.f32 %v9497_v61, %v15252_v48  ;;  %v9495_v26 = vadd.f32 0.5, %v9479_v56  ;;  %v9485_v9 = vmul.f32 0.5, %v11139_v51 }
 0xa71   : > { %v11143_v53 = vpop.eup %11142  ;;  %9528 = vst [vmem:[%s14675_s14 + $0x30] sm:$0xff] %v9512_v19  ;;  %v9510_v45 = vmul.f32 %v9494_v50, %v15253_v46  ;;  %v9500_v13 = vadd.f32 0.5, %v9484_v14  ;;  %v9482_v34 = vmul.f32 0.5, %v11141_v43 }
 0xa72   : > { %v11145_v21 = vpop.eup %11144  ;;  %9529 = vst [vmem:[%s14675_s14 + $0x38] sm:$0xff] %v9513_v3  ;;  %v9511_v11 = vmul.f32 %v9495_v26, %v15254_v58  ;;  %v9501_v18 = vadd.f32 0.5, %v9485_v9  ;;  %v9483_v24 = vmul.f32 0.5, %v11143_v53 }
 0xa73   : > { %v11147_v29 = vpop.eup %11146  ;;  %9526 = vst [vmem:[%s14675_s14 + $0x20] sm:$0xff] %v9510_v45  ;;  %v9516_v49 = vmul.f32 %v9500_v13, %v15255_v33  ;;  %v9498_v5 = vadd.f32 0.5, %v9482_v34  ;;  %v9488_v44 = vmul.f32 0.5, %v11145_v21 }
 0xa74   : > { %v11149_v16 = vpop.eup %11148  ;;  %9527 = vst [vmem:[%s14675_s14 + $0x28] sm:$0xff] %v9511_v11  ;;  %v9517_v7 = vmul.f32 %v9501_v18, %v15256_v54  ;;  %v9499_v55 = vadd.f32 0.5, %v9483_v24  ;;  %v9489_v25 = vmul.f32 0.5, %v11147_v29 }
 0xa75   : > { %v11151_v59 = vpop.eup %11150  ;;  %9532 = vst [vmem:[%s14675_s14 + $0x50] sm:$0xff] %v9516_v49  ;;  %v9514_v36 = vmul.f32 %v9498_v5, %v15257_v27  ;;  %v9504_v47 = vadd.f32 0.5, %v9488_v44  ;;  %v9486_v63 = vmul.f32 0.5, %v11149_v16 }
 0xa76   : > { %9533 = vst [vmem:[%s14675_s14 + $0x58] sm:$0xff] %v9517_v7  ;;  %v9515_v6 = vmul.f32 %v9499_v55, %v15258_v52  ;;  %v9505_v15 = vadd.f32 0.5, %v9489_v25  ;;  %v9487_v42 = vmul.f32 0.5, %v11151_v59 }
 0xa77   : > { %9530 = vst [vmem:[%s14675_s14 + $0x40] sm:$0xff] %v9514_v36  ;;  %v9520_v31 = vmul.f32 %v9504_v47, %v15259_v39  ;;  %v9502_v38 = vadd.f32 0.5, %v9486_v63 }
 0xa78   : > { %9531 = vst [vmem:[%s14675_s14 + $0x48] sm:$0xff] %v9515_v6  ;;  %v9521_v37 = vmul.f32 %v9505_v15, %v15260_v8  ;;  %v9503_v1 = vadd.f32 0.5, %v9487_v42 }
 0xa79   : > { %9536 = vst [vmem:[%s14675_s14 + $0x70] sm:$0xff] %v9520_v31  ;;  %v9518_v12 = vmul.f32 %v9502_v38, %v15261_v62 }
 0xa7a   : > { %9537 = vst [vmem:[%s14675_s14 + $0x78] sm:$0xff] %v9521_v37  ;;  %v9519_v30 = vmul.f32 %v9503_v1, %v15262_v35 }
 0xa7b   : > { %9534 = vst [vmem:[%s14675_s14 + $0x60] sm:$0xff] %v9518_v12 }
 0xa7c   : > { %9535 = vst [vmem:[%s14675_s14 + $0x68] sm:$0xff] %v9519_v30 }
 0xa7d   : > { %11175 = shalt.err (!%p11172_p3)
}
 0xa7e   : > { %s11176_s9 = scalar_lea.hbm %s14708_s19, 2048  ;;  %s11180_s12 = scalar_lea.hbm %s14764_s6, 4096 }
 0xa7f   : > { %p11177_p4 = scmp.ne.s32.totalorder %s14708_s19, %s11176_s9  ;;  %p11181_p9 = scmp.lt.s32.totalorder %s14708_s19, %s14764_s6 }
 0xa80   : > { %p11182_p10 = scmp.lt.s32.totalorder %s11180_s12, %s11176_s9 }
 0xa81   : > { %p11178_p7 = pnand %p11177_p4, %p11302_p5 }
 0xa82   : > { %p11183_p11 = por %p11182_p10, %p11181_p9 }
 0xa83   : > { %p11179_p8 = pneg %p11178_p7 }
 0xa85   : > { %p11184_p12 = pnand %p11183_p11, %p11179_p8 }
 0xa87   : > { %11187 = shalt.err (!%p11184_p12)
}
 0xa88   : > { %s11227_s15 = smov 256   ;;  %s11228_s17 = smov 16  }
 0xa89   : > { %11043 = dma.vmem_to_hbm [thread:$0]  (%p11302_p5), %s14710_s16, 2048, %s14708_s19, %s14718_s25, %s11227_s15, %s11227_s15, %s11228_s17  }
 0xa8a PF: > { %p11049_p13 = scmp.ge.s32.totalorder %s11222_s24, 2  ;;  %s9567_s18 = sand.u32 1, %s11210_s21  }
 0xa8b   : > { %s9568_s20 = scalar_lea.sflag [#allocation3], %s9567_s18 }
 0xa8c   : > { %p11046_p0 = pnand %p11049_p13, %p11306_p6 }
 0xa8e   : > { %p11047_p1 = pneg %p11046_p0 }
 0xa90   : > { %11205 = dma.done.wait (%p11047_p1), %s9568_s20, 2048  }
 0xa91   : > { %11207 = vsyncadd (%p11047_p1), %s9568_s20, 4294965248  ;;  %p16_p2 = scmp.ge.s32.totalorder %s11289_s27, 4   ;;  %s15263_s21 = smov %s11214_s22 }
 0xa92   : > { %s15264_s22 = smov %s11218_s23  ;;  %s15265_s23 = smov %s11300_s30 }
 0xa93   : > { %s15266_s24 = smov %s11289_s27  ;;  %18 = sbr.rel (!%p16_p2) target bundleno = 3 (0x3), region = 98 }
 0xa98   :  { %9573 = vsyncpa [#allocation3], 1 }
 0xa99   :  { %9575 = vsyncpa [#allocation3 + $0x1], 1 }

</bundles_post_ra>
